<compile_context>
chip_gen: v5e
topology: v5e:2x2
jax: 0.10.0
libtpu: 0.0.40
codegen_flags: <defaults>
</compile_context>

<pallas_src>
import jax
import jax.numpy as jnp
from jax.experimental import pallas as pl
from jax.experimental.pallas import tpu as pltpu

_X_TILE_BUDGET = 16 * 1024 * 1024  # bytes per x tile (Pallas double-buffers it)


def _round_up(x, m):
    return (x + m - 1) // m * m


def _pick_block_n(n):
    """Multiple-of-8 batch tile (or n itself when n < 8) with small pad waste."""
    if n <= 8:
        return n
    block_n = 8
    for bn in (128, 64, 32, 16):
        if ((-n) % bn) * 8 <= n:        # <= ~12.5% padded rows
            block_n = bn
            break
    # v7x megacore: keep >=2 parallel N blocks when the batch allows it.
    if block_n > 8 and _round_up(n, block_n) // block_n == 1:
        block_n //= 2
    return block_n


def _mlp_head(pooled, w1_ref, b1_ref, w2_ref, b2_ref, o_ref):
    """pooled: (block_n, 512) f32 global-average-pooled activations."""
    h = jnp.dot(pooled, w1_ref[...], preferred_element_type=jnp.float32)
    h = jnp.maximum(h + b1_ref[...], 0.0)                        # dense_1 + ReLU
    logits = jnp.dot(h, w2_ref[...], preferred_element_type=jnp.float32)
    o_ref[...] = jax.nn.sigmoid(logits + b2_ref[...]).astype(o_ref.dtype)


def _make_single_block_kernel(inv_s):
    """Whole spatial extent in one block: no accumulator, no branching."""
    def kernel(x_ref, w1_ref, b1_ref, w2_ref, b2_ref, o_ref):
        pooled = jnp.sum(x_ref[...], axis=-1) * inv_s            # (bn, C) f32
        _mlp_head(pooled, w1_ref, b1_ref, w2_ref, b2_ref, o_ref)
    return kernel


def _make_multi_block_kernel(s_total, block_s):
    """Spatial axis tiled: f32 accumulator with pl.when init/finalize."""
    inv_s = 1.0 / s_total
    needs_mask = (s_total % block_s) != 0

    def kernel(x_ref, w1_ref, b1_ref, w2_ref, b2_ref, o_ref, acc_ref):
        k = pl.program_id(1)

        @pl.when(k == 0)
        def _():
            acc_ref[...] = jnp.zeros_like(acc_ref)

        x = x_ref[...]                                           # (bn, C, bs) f32
        if needs_mask:
            # Zero the ragged spatial tail of the last block (stale lanes).
            col = jax.lax.broadcasted_iota(jnp.int32, x.shape, 2)
            x = jnp.where(col < s_total - k * block_s, x, 0.0)
        acc_ref[...] += jnp.sum(x, axis=-1)

        @pl.when(k == pl.num_programs(1) - 1)
        def _():
            _mlp_head(acc_ref[...] * inv_s, w1_ref, b1_ref, w2_ref, b2_ref, o_ref)

    return kernel


def targetnet_forward(x, w1, b1, w2, b2):
    """x: (N, 512, D, H, W) float32 feature map. Returns (N, n_class) float32."""
    N, C, D, H, W = x.shape
    S = D * H * W
    hidden = w1.shape[1]
    n_class = w2.shape[1]
    ncp = max(128, _round_up(n_class, 128))     # lane-dense padded output width

    # Native layout: (N, C, D, H, W) -> (N, C, S) is a free reshape; C stays on
    # sublanes, the spatial reduction runs along the (contiguous) lane axis.
    x3 = x.reshape(N, C, S).astype(jnp.float32)

    # --- tile selection (sized for v7x's 64 MiB VMEM; bigger tiles are wasted
    #     on the HBM roofline anyway) -----------------------------------------
    block_n = _pick_block_n(N)
    col_bytes = C * 4                                   # one spatial column, f32
    max_cols = _X_TILE_BUDGET // (block_n * col_bytes)
    if S > max_cols:
        # Prefer wide (contiguous, lane-dense) spatial blocks over tall batch
        # blocks when the spatial axis needs tiling.
        while block_n > 8 and _X_TILE_BUDGET // (block_n * col_bytes) < 512:
            block_n //= 2
        max_cols = _X_TILE_BUDGET // (block_n * col_bytes)

    if S <= max_cols:
        block_s, multi_s = S, False
    else:
        block_s, multi_s = (max_cols // 128) * 128, True

    n_pad = _round_up(N, block_n)
    if n_pad != N:                                      # only pad when needed
        x3 = jnp.pad(x3, ((0, n_pad - N), (0, 0), (0, 0)))
    n_blocks = n_pad // block_n
    s_blocks = pl.cdiv(S, block_s)

    # --- small, resident parameters (all f32; ~2.6 MiB total) ----------------
    w1f = w1.astype(jnp.float32)
    b1_2d = b1.reshape(1, hidden).astype(jnp.float32)
    w2_p = jnp.zeros((hidden, ncp), jnp.float32).at[:, :n_class].set(
        w2.astype(jnp.float32))
    b2_p = jnp.zeros((1, ncp), jnp.float32).at[0, :n_class].set(
        b2.astype(jnp.float32))

    if multi_s:
        kernel = _make_multi_block_kernel(S, block_s)
        grid = (n_blocks, s_blocks)
        x_map = lambda i, k: (i, 0, k)
        w_map = lambda i, k: (0, 0)
        o_map = lambda i, k: (i, 0)
        scratch = [pltpu.VMEM((block_n, C), jnp.float32)]
        semantics = ("parallel", "arbitrary")
    else:
        kernel = _make_single_block_kernel(1.0 / S)
        grid = (n_blocks,)
        x_map = lambda i: (i, 0, 0)
        w_map = lambda i: (0, 0)
        o_map = lambda i: (i, 0)
        scratch = []
        semantics = ("parallel",)

    x_tile_bytes = block_n * C * block_s * 4
    w_bytes = (C * hidden + hidden * ncp + hidden + ncp) * 4
    vmem_limit = int(min(48 * 1024 * 1024,
                         max(32 * 1024 * 1024,
                             2 * x_tile_bytes + 2 * w_bytes + 4 * 1024 * 1024)))

    cost = pl.CostEstimate(
        flops=(n_pad * C * S                      # pooling adds
               + 2 * n_pad * C * hidden           # dense_1
               + 2 * n_pad * hidden * ncp),       # dense_2
        transcendentals=n_pad * ncp,              # sigmoid
        bytes_accessed=x3.size * 4 + w_bytes + n_pad * ncp * 4,
    )

    out_pad = pl.pallas_call(
        kernel,
        out_shape=jax.ShapeDtypeStruct((n_pad, ncp), jnp.float32),
        grid_spec=pltpu.PrefetchScalarGridSpec(
            num_scalar_prefetch=0,
            grid=grid,
            in_specs=[
                # x: tiled over (N, S); C kept whole on sublanes.
                pl.BlockSpec((block_n, C, block_s), x_map),
                # parameters: constant index maps -> fetched once, resident.
                pl.BlockSpec((C, hidden), w_map),
                pl.BlockSpec((1, hidden), w_map),
                pl.BlockSpec((hidden, ncp), w_map),
                pl.BlockSpec((1, ncp), w_map),
            ],
            out_specs=pl.BlockSpec((block_n, ncp), o_map),
            scratch_shapes=scratch,
        ),
        compiler_params=pltpu.CompilerParams(
            dimension_semantics=semantics,
            vmem_limit_bytes=vmem_limit,
        ),
        cost_estimate=cost,
    )(x3, w1f, b1_2d, w2_p, b2_p)

    return out_pad[:N, :n_class]


def make_params(key, n_class=1):
    k1, k2, k3, k4 = jax.random.split(key, 4)
    # nn.Linear(512, 1024): stored transposed as (512, 1024)
    w1 = jax.random.normal(k1, (512, 1024), jnp.float32) * 0.02
    b1 = jax.random.normal(k2, (1024,), jnp.float32) * 0.01
    # nn.Linear(1024, n_class): stored transposed as (1024, n_class)
    w2 = jax.random.normal(k3, (1024, n_class), jnp.float32) * 0.02
    b2 = jax.random.normal(k4, (n_class,), jnp.float32) * 0.01
    return w1, b1, w2, b2


def reference_forward(x, w1, b1, w2, b2):
    pooled = jnp.mean(x.reshape(x.shape[0], x.shape[1], -1), axis=-1)
    h = jnp.maximum(pooled @ w1 + b1, 0.0)
    return jax.nn.sigmoid(h @ w2 + b2)


if __name__ == "__main__":
    key = jax.random.PRNGKey(0)
    kx, kp = jax.random.split(key)

    # Small shapes consistent with the head: C must be 512 for dense_1.
    N, C, D, H, W = 2, 512, 2, 4, 4
    n_class = 1
    x = jax.random.normal(kx, (N, C, D, H, W), jnp.float32)
    w1, b1, w2, b2 = make_params(kp, n_class=n_class)

    out = jax.block_until_ready(targetnet_forward(x, w1, b1, w2, b2))
    ref = reference_forward(x, w1, b1, w2, b2)

    assert out.shape == (N, n_class)
    # Full-f32 data path now -> tight tolerance vs. the f32 reference.
    assert jnp.allclose(out, ref, atol=1e-3, rtol=1e-3), "mismatch vs reference"

    print("KERNEL_OK")
</pallas_src>

<mosaic_0001>
module attributes {stable_mosaic.version = 11 : i64} {
  func.func @kernel(%arg0: i32, %arg1: memref<2x512x32xf32, #tpu.memory_space<vmem>>, %arg2: memref<512x1024xf32, #tpu.memory_space<vmem>>, %arg3: memref<1x1024xf32, #tpu.memory_space<vmem>>, %arg4: memref<1024x128xf32, #tpu.memory_space<vmem>>, %arg5: memref<1x128xf32, #tpu.memory_space<vmem>>, %arg6: memref<2x128xf32, #tpu.memory_space<vmem>>) attributes {dimension_semantics = [#tpu.dimension_semantics<parallel>], iteration_bounds = array<i64: 1>, scalar_prefetch = 0 : i64, scratch_operands = 0 : i64, tpu.core_type = #tpu.core_type<tc>, window_params = [{transform_indices = @transform_0, window_bounds = array<i64: 2, 512, 32>}, {pipeline_mode = #tpu.pipeline_mode<synchronous>, transform_indices = @transform_1, window_bounds = array<i64: 512, 1024>}, {pipeline_mode = #tpu.pipeline_mode<synchronous>, transform_indices = @transform_2, window_bounds = array<i64: 1, 1024>}, {pipeline_mode = #tpu.pipeline_mode<synchronous>, transform_indices = @transform_3, window_bounds = array<i64: 1024, 128>}, {pipeline_mode = #tpu.pipeline_mode<synchronous>, transform_indices = @transform_4, window_bounds = array<i64: 1, 128>}, {transform_indices = @transform_5, window_bounds = array<i64: 2, 128>}]} {
    %c0 = arith.constant 0 : index
    %c0_0 = arith.constant 0 : index
    %c0_1 = arith.constant 0 : index
    %0 = vector.load %arg1[%c0, %c0_0, %c0_1] : memref<2x512x32xf32, #tpu.memory_space<vmem>>, vector<2x512x32xf32>
    %cst = arith.constant dense<0.000000e+00> : vector<2x512xf32>
    %1 = vector.multi_reduction <add>, %0, %cst [2] : vector<2x512x32xf32> to vector<2x512xf32>
    %cst_2 = arith.constant 3.125000e-02 : f32
    %2 = vector.broadcast %cst_2 : f32 to vector<2x512xf32>
    %3 = arith.mulf %1, %2 : vector<2x512xf32>
    %c0_3 = arith.constant 0 : index
    %c0_4 = arith.constant 0 : index
    %4 = vector.load %arg2[%c0_3, %c0_4] : memref<512x1024xf32, #tpu.memory_space<vmem>>, vector<512x1024xf32>
    %cst_5 = arith.constant dense<0.000000e+00> : vector<2x1024xf32>
    %5 = tpu.matmul %3, %4, %cst_5 {dimension_numbers = #tpu.dot_dimension_numbers<[1], [0], [0], [1], [0, 0, 1, 1], [], []>} : vector<2x512xf32>, vector<512x1024xf32>, vector<2x1024xf32> -> vector<2x1024xf32>
    %c0_6 = arith.constant 0 : index
    %c0_7 = arith.constant 0 : index
    %6 = vector.load %arg3[%c0_6, %c0_7] : memref<1x1024xf32, #tpu.memory_space<vmem>>, vector<1x1024xf32>
    %7 = vector.broadcast %6 : vector<1x1024xf32> to vector<2x1024xf32>
    %8 = arith.addf %5, %7 : vector<2x1024xf32>
    %cst_8 = arith.constant 0.000000e+00 : f32
    %9 = vector.broadcast %cst_8 : f32 to vector<2x1024xf32>
    %10 = arith.maximumf %8, %9 : vector<2x1024xf32>
    %c0_9 = arith.constant 0 : index
    %c0_10 = arith.constant 0 : index
    %11 = vector.load %arg4[%c0_9, %c0_10] : memref<1024x128xf32, #tpu.memory_space<vmem>>, vector<1024x128xf32>
    %cst_11 = arith.constant dense<0.000000e+00> : vector<2x128xf32>
    %12 = tpu.matmul %10, %11, %cst_11 {dimension_numbers = #tpu.dot_dimension_numbers<[1], [0], [0], [1], [0, 0, 1, 1], [], []>} : vector<2x1024xf32>, vector<1024x128xf32>, vector<2x128xf32> -> vector<2x128xf32>
    %c0_12 = arith.constant 0 : index
    %c0_13 = arith.constant 0 : index
    %13 = vector.load %arg5[%c0_12, %c0_13] : memref<1x128xf32, #tpu.memory_space<vmem>>, vector<1x128xf32>
    %14 = vector.broadcast %13 : vector<1x128xf32> to vector<2x128xf32>
    %15 = arith.addf %12, %14 : vector<2x128xf32>
    %16 = arith.negf %15 : vector<2x128xf32>
    %17 = math.exp %16 : vector<2x128xf32>
    %cst_14 = arith.constant 1.000000e+00 : f32
    %18 = vector.broadcast %cst_14 : f32 to vector<2x128xf32>
    %19 = arith.addf %18, %17 : vector<2x128xf32>
    %20 = arith.divf %18, %19 : vector<2x128xf32>
    %c0_15 = arith.constant 0 : index
    %c0_16 = arith.constant 0 : index
    %21 = vector.load %arg6[%c0_15, %c0_16] : memref<2x128xf32, #tpu.memory_space<vmem>>, vector<2x128xf32>
    tpu.vector_store %arg6[%c0_15, %c0_16], %20 {strides = array<i32>} : memref<2x128xf32, #tpu.memory_space<vmem>>, vector<2x128xf32>,
    return
  }
  func.func @transform_0(%arg0: i32) -> (i32, i32, i32) {
    %c0_i32 = arith.constant 0 : i32
    %c0_i32_0 = arith.constant 0 : i32
    %c0_i32_1 = arith.constant 0 : i32
    return %arg0, %c0_i32, %c0_i32_0 : i32, i32, i32
  }
  func.func @transform_1(%arg0: i32) -> (i32, i32) {
    %c0_i32 = arith.constant 0 : i32
    %c0_i32_0 = arith.constant 0 : i32
    %c0_i32_1 = arith.constant 0 : i32
    return %c0_i32, %c0_i32_0 : i32, i32
  }
  func.func @transform_2(%arg0: i32) -> (i32, i32) {
    %c0_i32 = arith.constant 0 : i32
    %c0_i32_0 = arith.constant 0 : i32
    %c0_i32_1 = arith.constant 0 : i32
    return %c0_i32, %c0_i32_0 : i32, i32
  }
  func.func @transform_3(%arg0: i32) -> (i32, i32) {
    %c0_i32 = arith.constant 0 : i32
    %c0_i32_0 = arith.constant 0 : i32
    %c0_i32_1 = arith.constant 0 : i32
    return %c0_i32, %c0_i32_0 : i32, i32
  }
  func.func @transform_4(%arg0: i32) -> (i32, i32) {
    %c0_i32 = arith.constant 0 : i32
    %c0_i32_0 = arith.constant 0 : i32
    %c0_i32_1 = arith.constant 0 : i32
    return %c0_i32, %c0_i32_0 : i32, i32
  }
  func.func @transform_5(%arg0: i32) -> (i32, i32) {
    %c0_i32 = arith.constant 0 : i32
    %c0_i32_0 = arith.constant 0 : i32
    return %arg0, %c0_i32 : i32, i32
  }
}

</mosaic_0001>

<bundles_post_ra>
// kernel: tpu_custom_call.1
= control target key start
LH: loop header
LB: loop body
LE: loop exit
PB: predicated region body
PF: predicated region fallthrough
CT: control target
= control target key end

     0   :  { %10 = vsyncpa [#allocation3], 0  ;;  %s3960_s0 = inlined_call_operand.vmem [shape: f32[2,512,32], index: 0, kind: input, shape index: {}]   ;;  %s3961_s1 = inlined_call_operand.hbm [shape: f32[512,1024], index: 1, kind: input, shape index: {}]   ;;  %s3962_s2 = inlined_call_operand.hbm [shape: f32[1,1024], index: 2, kind: input, shape index: {}]   ;;  %s3963_s3 = inlined_call_operand.hbm [shape: f32[1024,128], index: 3, kind: input, shape index: {}]   ;;  %s3964_s4 = inlined_call_operand.hbm [shape: f32[1,128], index: 4, kind: input, shape index: {}]   ;;  %s3965_s5 = inlined_call_operand.hbm [shape: f32[2,128], index: 5, kind: output, shape index: {}]  }
   0x1   :  { %11 = vsyncpa [#allocation6], 0 }
   0x2   :  { %12 = vsyncpa [#allocation9], 0  ;;  %s34_s20 = sshll.u32 %s3962_s2, 4  ;;  %s35_s20 = int_to_ptr.hbm [resolvable:$true] %s34_s20 }
   0x3   :  { %13 = vsyncpa [#allocation4], 0  ;;  %s2790_s21 = smov [#allocation5]   ;;  %s20_s25 = sshll.u32 %s3961_s1, 4  ;;  %s21_s25 = int_to_ptr.hbm [resolvable:$true] %s20_s25 }
   0x4   :  { %s36_s22 = sshll.u32 %s2790_s21, 4  ;;  %s2791_s26 = smov [#allocation2]   ;;  %s37_s22 = int_to_ptr.vmem [resolvable:$true] %s36_s22 }
   0x5   :  { %39 = dma.hbm_to_vmem [thread:$0]  %s35_s20, 128, %s37_s22, [#allocation6]  }
   0x6   :  { %s22_s27 = sshll.u32 %s2791_s26, 4  ;;  %s2792_s28 = smov 1024   ;;  %s23_s27 = int_to_ptr.vmem [resolvable:$true] %s22_s27 }
   0x7   :  { %s2793_s29 = smov 64   ;;  %s44_s2 = sshll.u32 %s3963_s3, 4  ;;  %s45_s2 = int_to_ptr.hbm [resolvable:$true] %s44_s2 }
   0x8   :  { %28 = dma.hbm_to_vmem [thread:$0]  %s21_s25, 65536, %s23_s27, [#allocation3], %s2792_s28, %s2792_s28, %s2793_s29  }
   0x9   :  { %s2794_s7 = smov [#allocation7]   ;;  %s58_s1 = sshll.u32 %s3964_s4, 4  ;;  %s59_s1 = int_to_ptr.hbm [resolvable:$true] %s58_s1 }
   0xa   :  { %s46_s8 = sshll.u32 %s2794_s7, 4  ;;  %s2795_s11 = smov 128   ;;  %s47_s8 = int_to_ptr.vmem [resolvable:$true] %s46_s8 }
   0xb   :  { %s2796_s12 = smov 8   ;;  %s2797_s13 = smov [#allocation8]  }
   0xc   :  { %52 = dma.hbm_to_vmem [thread:$0]  %s45_s2, 16384, %s47_s8, [#allocation6], %s2795_s11, %s2795_s11, %s2796_s12  }
   0xd   :  { %s60_s14 = sshll.u32 %s2797_s13, 4  ;;  %s61_s14 = int_to_ptr.vmem [resolvable:$true] %s60_s14 }
   0xe   :  { %63 = dma.hbm_to_vmem [thread:$0]  %s59_s1, 16, %s61_s14, [#allocation9]  }
   0xf   :  { %2782 = dma.done.wait [#allocation3], 65536  }
  0x10   :  { %2783 = vsyncadd [#allocation3], 4294901760 }
  0x11   :  { %2784 = dma.done.wait [#allocation6], 16512  }
  0x12   :  { %2785 = vsyncadd [#allocation6], 4294950784 }
  0x13   :  { %2786 = dma.done.wait [#allocation9], 16  }
  0x14   :  { %2787 = vsyncadd [#allocation9], 4294967280  ;;  %vm208_vm0 = vcmask 261120   ;;  %v176_v0 = vld [vmem:[%s3960_s0 + $0x300] sm:$0xff]  ;;  %v114_v1 = vld [vmem:[%s3960_s0 + $0x110] sm:$0xff]  ;;  %vm1384_vm1 = vcmask 130112  }
  0x15   :  { %v112_v2 = vld [vmem:[%s3960_s0 + $0x100] sm:$0xff]  ;;  %v497_v3 = vsel %vm208_vm0, %v176_v0, 0.0  ;;  %v311_v4 = vsel %vm208_vm0, %v114_v1, 0.0  ;;  %v177_v6 = vld [vmem:[%s3960_s0 + $0x308] sm:$0xff]  ;;  %v178_v7 = vld [vmem:[%s3960_s0 + $0x310] sm:$0xff]  ;;  %vm1388_vm2 = vcmask 195712  }
  0x16   :  { %v305_v5 = vsel %vm208_vm0, %v112_v2, 0.0  ;;  %498 = vadd.xlane.f32.xlu1 %v497_v3  ;;  %312 = vadd.xlane.f32.xlu2 %v311_v4  ;;  %v113_v8 = vld [vmem:[%s3960_s0 + $0x108] sm:$0xff]  ;;  %v500_v9 = vsel %vm208_vm0, %v177_v6, 0.0  ;;  %v503_v10 = vsel %vm208_vm0, %v178_v7, 0.0  ;;  %v115_v12 = vld [vmem:[%s3960_s0 + $0x118] sm:$0xff]  ;;  %v80_v14 = vld [vmem:[%s3960_s0] sm:$0xff] }
  0x17   :  { %306 = vadd.xlane.f32.xlu0 %v305_v5  ;;  %v308_v11 = vsel %vm208_vm0, %v113_v8, 0.0  ;;  %v81_v13 = vld [vmem:[%s3960_s0 + $0x8] sm:$0xff]  ;;  %v314_v15 = vsel %vm208_vm0, %v115_v12, 0.0  ;;  %v209_v17 = vsel %vm208_vm0, %v80_v14, 0.0  ;;  %v144_v18 = vld [vmem:[%s3960_s0 + $0x200] sm:$0xff]  ;;  %v179_v25 = vld [vmem:[%s3960_s0 + $0x318] sm:$0xff] }
  0x18   :  { %v212_v16 = vsel %vm208_vm0, %v81_v13, 0.0  ;;  %v129_v19 = vld [vmem:[%s3960_s0 + $0x188] sm:$0xff]  ;;  %v128_v20 = vld [vmem:[%s3960_s0 + $0x180] sm:$0xff]  ;;  %v401_v21 = vsel %vm208_vm0, %v144_v18, 0.0  ;;  %v506_v28 = vsel %vm208_vm0, %v179_v25, 0.0  ;;  %v82_v31 = vld [vmem:[%s3960_s0 + $0x10] sm:$0xff] }
  0x19   :  { %v356_v22 = vsel %vm208_vm0, %v129_v19, 0.0  ;;  %v353_v23 = vsel %vm208_vm0, %v128_v20, 0.0  ;;  %v192_v24 = vld [vmem:[%s3960_s0 + $0x380] sm:$0xff]  ;;  %v145_v26 = vld [vmem:[%s3960_s0 + $0x208] sm:$0xff]  ;;  %v215_v34 = vsel %vm208_vm0, %v82_v31, 0.0  ;;  %v146_v37 = vld [vmem:[%s3960_s0 + $0x210] sm:$0xff]  ;;  %v1379_v31 = vlaneseq }
  0x1a   :  { %v545_v27 = vsel %vm208_vm0, %v192_v24, 0.0  ;;  %v404_v29 = vsel %vm208_vm0, %v145_v26, 0.0  ;;  %v116_v30 = vld [vmem:[%s3960_s0 + $0x120] sm:$0xff]  ;;  %v193_v32 = vld [vmem:[%s3960_s0 + $0x388] sm:$0xff]  ;;  %v130_v38 = vld [vmem:[%s3960_s0 + $0x190] sm:$0xff]  ;;  %v407_v40 = vsel %vm208_vm0, %v146_v37, 0.0 }
  0x1b   :  { %v317_v33 = vsel %vm208_vm0, %v116_v30, 0.0  ;;  %v548_v35 = vsel %vm208_vm0, %v193_v32, 0.0  ;;  %v180_v36 = vld [vmem:[%s3960_s0 + $0x320] sm:$0xff]  ;;  %v359_v41 = vsel %vm208_vm0, %v130_v38, 0.0  ;;  %v83_v43 = vld [vmem:[%s3960_s0 + $0x18] sm:$0xff]  ;;  %v194_v44 = vld [vmem:[%s3960_s0 + $0x390] sm:$0xff] }
  0x1c   :  { %v509_v39 = vsel %vm208_vm0, %v180_v36, 0.0  ;;  %v96_v42 = vld [vmem:[%s3960_s0 + $0x80] sm:$0xff]  ;;  %v218_v46 = vsel %vm208_vm0, %v83_v43, 0.0  ;;  %v551_v47 = vsel %vm208_vm0, %v194_v44, 0.0  ;;  %v131_v48 = vld [vmem:[%s3960_s0 + $0x198] sm:$0xff]  ;;  %v117_v49 = vld [vmem:[%s3960_s0 + $0x128] sm:$0xff] }
  0x1d   :  { %v257_v45 = vsel %vm208_vm0, %v96_v42, 0.0  ;;  %v97_v50 = vld [vmem:[%s3960_s0 + $0x88] sm:$0xff]  ;;  %v362_v51 = vsel %vm208_vm0, %v131_v48, 0.0  ;;  %v320_v52 = vsel %vm208_vm0, %v117_v49, 0.0  ;;  %v160_v55 = vld [vmem:[%s3960_s0 + $0x280] sm:$0xff]  ;;  %v147_v56 = vld [vmem:[%s3960_s0 + $0x218] sm:$0xff] }
  0x1e   :  { %501 = vadd.xlane.f32.xlu1 %v500_v9  ;;  %504 = vadd.xlane.f32.xlu2 %v503_v10  ;;  %v260_v53 = vsel %vm208_vm0, %v97_v50, 0.0  ;;  %v161_v54 = vld [vmem:[%s3960_s0 + $0x288] sm:$0xff]  ;;  %v449_v58 = vsel %vm208_vm0, %v160_v55, 0.0  ;;  %v410_v59 = vsel %vm208_vm0, %v147_v56, 0.0  ;;  %v84_v60 = vld [vmem:[%s3960_s0 + $0x20] sm:$0xff]  ;;  %v195_v61 = vld [vmem:[%s3960_s0 + $0x398] sm:$0xff] }
  0x1f   :  { %309 = vadd.xlane.f32.xlu0 %v308_v11  ;;  %v452_v57 = vsel %vm208_vm0, %v161_v54, 0.0  ;;  %v181_v62 = vld [vmem:[%s3960_s0 + $0x328] sm:$0xff]  ;;  %v221_v63 = vsel %vm208_vm0, %v84_v60, 0.0  ;;  %v554_v0 = vsel %vm208_vm0, %v195_v61, 0.0  ;;  %v132_v2 = vld [vmem:[%s3960_s0 + $0x1a0] sm:$0xff]  ;;  %v118_v3 = vld [vmem:[%s3960_s0 + $0x130] sm:$0xff] }
  0x20   :  { %v512_v1 = vsel %vm208_vm0, %v181_v62, 0.0  ;;  %v98_v4 = vld [vmem:[%s3960_s0 + $0x90] sm:$0xff]  ;;  %v365_v5 = vsel %vm208_vm0, %v132_v2, 0.0  ;;  %v323_v6 = vsel %vm208_vm0, %v118_v3, 0.0  ;;  %v148_v10 = vld [vmem:[%s3960_s0 + $0x220] sm:$0xff]  ;;  %v99_v14 = vld [vmem:[%s3960_s0 + $0x98] sm:$0xff] }
  0x21   :  { %v263_v7 = vsel %vm208_vm0, %v98_v4, 0.0  ;;  %v182_v8 = vld [vmem:[%s3960_s0 + $0x330] sm:$0xff]  ;;  %v413_v13 = vsel %vm208_vm0, %v148_v10, 0.0  ;;  %v149_v20 = vld [vmem:[%s3960_s0 + $0x228] sm:$0xff]  ;;  %v163_v30 = vld [vmem:[%s3960_s0 + $0x298] sm:$0xff]  ;;  %v3033_v36 = vand.u32 127, %v1379_v31 }
  0x22   :  { %v162_v9 = vld [vmem:[%s3960_s0 + $0x290] sm:$0xff]  ;;  %v515_v11 = vsel %vm208_vm0, %v182_v8, 0.0  ;;  %v197_v26 = vld [vmem:[%s3960_s0 + $0x3a8] sm:$0xff]  ;;  %vm1392_vm3 = vcmask 261312   ;;  %vm1396_vm4 = vcmask 326912   ;;  %vm1400_vm5 = vcmask 392512  }
  0x23   :  { %v455_v12 = vsel %vm208_vm0, %v162_v9, 0.0  ;;  %v3036_v38 = vadd.s32 4294967288, %v3033_v36  ;;  %v150_v2 = vld [vmem:[%s3960_s0 + $0x230] sm:$0xff]  ;;  %vm1404_vm6 = vcmask 458112   ;;  %vm1408_vm7 = vcmask 523712   ;;  %s2635_s13 = sshll.u32 %s3965_s5, 4  ;;  %s2636_s13 = int_to_ptr.hbm [resolvable:$true] %s2635_s13 }
  0x24   :  { %vm1412_vm8 = vcmask 589312   ;;  %vm1416_vm9 = vcmask 654912   ;;  %vm1420_vm10 = vcmask 720512   ;;  %vm1424_vm11 = vcmask 786112  }
  0x25   :  { %vm1428_vm12 = vcmask 851712   ;;  %vm1432_vm13 = vcmask 917312   ;;  %vm1436_vm14 = vcmask 982912   ;;  %vm1440_vm15 = vcmask 1048512  }
  0x26   :  { %315 = vadd.xlane.f32.xlu2 %v314_v15  ;;  %213 = vadd.xlane.f32.xlu1 %v212_v16  ;;  %v85_v15 = vld [vmem:[%s3960_s0 + $0x28] sm:$0xff]  ;;  %v196_v16 = vld [vmem:[%s3960_s0 + $0x3a0] sm:$0xff] }
  0x27   :  { %210 = vadd.xlane.f32.xlu0 %v209_v17  ;;  %v266_v17 = vsel %vm208_vm0, %v99_v14, 0.0  ;;  %v224_v18 = vsel %vm208_vm0, %v85_v15, 0.0  ;;  %v557_v19 = vsel %vm208_vm0, %v196_v16, 0.0 }
  0x2e   :  { %402 = vadd.xlane.f32.xlu2 %v401_v21  ;;  %357 = vadd.xlane.f32.xlu1 %v356_v22  ;;  %v133_v21 = vld [vmem:[%s3960_s0 + $0x1a8] sm:$0xff]  ;;  %v119_v22 = vld [vmem:[%s3960_s0 + $0x138] sm:$0xff] }
  0x2f   :  { %354 = vadd.xlane.f32.xlu0 %v353_v23  ;;  %v416_v23 = vsel %vm208_vm0, %v149_v20, 0.0  ;;  %v368_v24 = vsel %vm208_vm0, %v133_v21, 0.0  ;;  %v326_v25 = vsel %vm208_vm0, %v119_v22, 0.0  ;;  %v184_v22 = vld [vmem:[%s3960_s0 + $0x340] sm:$0xff] }
  0x36   :  { %546 = vadd.xlane.f32.xlu2 %v545_v27  ;;  %507 = vadd.xlane.f32.xlu1 %v506_v28  ;;  %v183_v27 = vld [vmem:[%s3960_s0 + $0x338] sm:$0xff] }
  0x37   :  { %405 = vadd.xlane.f32.xlu0 %v404_v29 }
  0x3e   :  { %318 = vadd.xlane.f32.xlu2 %v317_v33  ;;  %216 = vadd.xlane.f32.xlu1 %v215_v34  ;;  %v560_v33 = vsel %vm208_vm0, %v197_v26, 0.0  ;;  %v518_v34 = vsel %vm208_vm0, %v183_v27, 0.0 }
  0x3f   :  { %549 = vadd.xlane.f32.xlu0 %v548_v35  ;;  %v458_v35 = vsel %vm208_vm0, %v163_v30, 0.0 }
  0x46   :  { %510 = vadd.xlane.f32.xlu2 %v509_v39  ;;  %408 = vadd.xlane.f32.xlu1 %v407_v40  ;;  %v120_v39 = vld [vmem:[%s3960_s0 + $0x140] sm:$0xff] }
  0x47   :  { %360 = vadd.xlane.f32.xlu0 %v359_v41  ;;  %v100_v40 = vld [vmem:[%s3960_s0 + $0xa0] sm:$0xff]  ;;  %v3045_v41 = vadd.s32 4294967280, %v3033_v36 }
  0x4e   :  { %258 = vadd.xlane.f32.xlu2 %v257_v45  ;;  %219 = vadd.xlane.f32.xlu1 %v218_v46  ;;  %v86_v45 = vld [vmem:[%s3960_s0 + $0x30] sm:$0xff] }
  0x4f   :  { %552 = vadd.xlane.f32.xlu0 %v551_v47  ;;  %v227_v56 = vsel %vm208_vm0, %v86_v45, 0.0 }
  0x56   :  { %363 = vadd.xlane.f32.xlu2 %v362_v51  ;;  %321 = vadd.xlane.f32.xlu1 %v320_v52  ;;  %v329_v51 = vsel %vm208_vm0, %v120_v39, 0.0  ;;  %v269_v52 = vsel %vm208_vm0, %v100_v40, 0.0  ;;  %v101_v39 = vld [vmem:[%s3960_s0 + $0xa8] sm:$0xff] }
  0x57   :  { %261 = vadd.xlane.f32.xlu0 %v260_v53 }
  0x5e   :  { %453 = vadd.xlane.f32.xlu2 %v452_v57  ;;  %450 = vadd.xlane.f32.xlu1 %v449_v58 }
  0x5f   :  { %411 = vadd.xlane.f32.xlu0 %v410_v59 }
  0x66   :  { %222 = vadd.xlane.f32.xlu2 %v221_v63  ;;  %555 = vadd.xlane.f32.xlu1 %v554_v0  ;;  %v3063_v63 = vadd.s32 4294967272, %v3033_v36 }
  0x67   :  { %513 = vadd.xlane.f32.xlu0 %v512_v1  ;;  %v164_v1 = vld [vmem:[%s3960_s0 + $0x2a0] sm:$0xff] }
  0x68   :  { %v461_v10 = vsel %vm208_vm0, %v164_v1, 0.0 }
  0x6e   :  { %366 = vadd.xlane.f32.xlu2 %v365_v5  ;;  %324 = vadd.xlane.f32.xlu1 %v323_v6  ;;  %v134_v5 = vld [vmem:[%s3960_s0 + $0x1b0] sm:$0xff] }
  0x6f   :  { %264 = vadd.xlane.f32.xlu0 %v263_v7  ;;  %v371_v14 = vsel %vm208_vm0, %v134_v5, 0.0 }
  0x76   :  { %516 = vadd.xlane.f32.xlu2 %v515_v11  ;;  %456 = vadd.xlane.f32.xlu1 %v455_v12  ;;  %v419_v11 = vsel %vm208_vm0, %v150_v2, 0.0 }
  0x77   :  { %414 = vadd.xlane.f32.xlu0 %v413_v13 }
  0x7e   :  { %267 = vadd.xlane.f32.xlu2 %v266_v17  ;;  %225 = vadd.xlane.f32.xlu1 %v224_v18  ;;  %v87_v18 = vld [vmem:[%s3960_s0 + $0x38] sm:$0xff] }
  0x7f   :  { %558 = vadd.xlane.f32.xlu0 %v557_v19  ;;  %v198_v19 = vld [vmem:[%s3960_s0 + $0x3b0] sm:$0xff]  ;;  %v230_v26 = vsel %vm208_vm0, %v87_v18, 0.0 }
  0x80   :  { %v563_v27 = vsel %vm208_vm0, %v198_v19, 0.0 }
  0x86   :  { %417 = vadd.xlane.f32.xlu2 %v416_v23  ;;  %369 = vadd.xlane.f32.xlu1 %v368_v24 }
  0x87   :  { %327 = vadd.xlane.f32.xlu0 %v326_v25 }
  0x89   :  { %v499_v28 = vpop.xlane.xlu1 %498  ;;  %v313_v29 = vpop.xlane.xlu2 %312 }
  0x8a   :  { %v307_v32 = vpop.xlane.xlu0 %306  ;;  %v689_v37 = vmul.f32 0.03125, %v499_v28  ;;  %v627_v46 = vmul.f32 0.03125, %v313_v29  ;;  %v521_v29 = vsel %vm208_vm0, %v184_v22, 0.0 }
  0x8b   :  { %v625_v42 = vmul.f32 0.03125, %v307_v32 }
  0x8c   :  { %v1597_v53 = vperm.slane %v689_v37, %v3033_v36  ;;  %v1476_v59 = vperm.slane %v627_v46, %v3045_v41 }
  0x8d   :  { %v1473_v57 = vperm.slane %v625_v42, %v3033_v36 }
  0x8e   :  { %561 = vadd.xlane.f32.xlu2 %v560_v33  ;;  %519 = vadd.xlane.f32.xlu1 %v518_v34  ;;  %v135_v33 = vld [vmem:[%s3960_s0 + $0x1b8] sm:$0xff]  ;;  %v121_v34 = vld [vmem:[%s3960_s0 + $0x148] sm:$0xff] }
  0x8f   :  { %459 = vadd.xlane.f32.xlu0 %v458_v35  ;;  %v374_v45 = vsel %vm208_vm0, %v135_v33, 0.0  ;;  %v332_v46 = vsel %vm208_vm0, %v121_v34, 0.0  ;;  %v122_v33 = vld [vmem:[%s3960_s0 + $0x150] sm:$0xff] }
  0x91   :  { %v502_v43 = vpop.xlane.xlu1 %501  ;;  %v505_v44 = vpop.xlane.xlu2 %504 }
  0x92   :  { %v690_v47 = vmul.f32 0.03125, %v502_v43  ;;  %v691_v48 = vmul.f32 0.03125, %v505_v44  ;;  %v310_v49 = vpop.xlane.xlu0 %309 }
  0x93   :  { %v626_v50 = vmul.f32 0.03125, %v310_v49 }
  0x94   :  { %v1598_v54 = vperm.slane %v690_v47, %v3036_v38  ;;  %v1600_v55 = vperm.slane %v691_v48, %v3045_v41  ;;  %v272_v48 = vsel %vm208_vm0, %v101_v39, 0.0 }
  0x95   :  { %v1474_v58 = vperm.slane %v626_v50, %v3036_v38 }
  0x96   :  { %v1599_v60 = vsel %vm1384_vm1, %v1598_v54, %v1597_v53  ;;  %330 = vadd.xlane.f32.xlu2 %v329_v51  ;;  %270 = vadd.xlane.f32.xlu1 %v269_v52  ;;  %v3118_v53 = vadd.s32 4294967264, %v3033_v36  ;;  %v185_v54 = vld [vmem:[%s3960_s0 + $0x348] sm:$0xff] }
  0x97   :  { %v1601_v61 = vsel %vm1388_vm2, %v1600_v55, %v1599_v60  ;;  %v1475_v62 = vsel %vm1384_vm1, %v1474_v58, %v1473_v57  ;;  %228 = vadd.xlane.f32.xlu0 %v227_v56  ;;  %v165_v55 = vld [vmem:[%s3960_s0 + $0x2a8] sm:$0xff]  ;;  %v151_v58 = vld [vmem:[%s3960_s0 + $0x238] sm:$0xff]  ;;  %v524_v1 = vsel %vm208_vm0, %v185_v54, 0.0 }
  0x98   :  { %v1477_v0 = vsel %vm1388_vm2, %v1476_v59, %v1475_v62  ;;  %v464_v2 = vsel %vm208_vm0, %v165_v55, 0.0  ;;  %v422_v5 = vsel %vm208_vm0, %v151_v58, 0.0 }
  0x99   :  { %v316_v3 = vpop.xlane.xlu2 %315  ;;  %v214_v4 = vpop.xlane.xlu1 %213 }
  0x9a   :  { %v628_v6 = vmul.f32 0.03125, %v316_v3  ;;  %v594_v7 = vmul.f32 0.03125, %v214_v4  ;;  %v211_v8 = vpop.xlane.xlu0 %210 }
  0x9b   :  { %v593_v9 = vmul.f32 0.03125, %v211_v8 }
  0x9c   :  { %v1478_v12 = vperm.slane %v628_v6, %v3063_v63  ;;  %v1383_v13 = vperm.slane %v594_v7, %v3036_v38 }
  0x9d   :  { %v1381_v15 = vperm.slane %v593_v9, %v3033_v36 }
  0x9e   :  { %v1479_v16 = vsel %vm1392_vm3, %v1478_v12, %v1477_v0  ;;  %462 = vadd.xlane.f32.xlu2 %v461_v10  ;;  %420 = vadd.xlane.f32.xlu1 %v419_v11  ;;  %v102_v10 = vld [vmem:[%s3960_s0 + $0xb0] sm:$0xff]  ;;  %v88_v11 = vld [vmem:[%s3960_s0 + $0x40] sm:$0xff] }
  0x9f   :  { %v1385_v17 = vsel %vm1384_vm1, %v1383_v13, %v1381_v15  ;;  %372 = vadd.xlane.f32.xlu0 %v371_v14  ;;  %v199_v14 = vld [vmem:[%s3960_s0 + $0x3b8] sm:$0xff]  ;;  %v275_v19 = vsel %vm208_vm0, %v102_v10, 0.0 }
  0xa1   :  { %v403_v20 = vpop.xlane.xlu2 %402  ;;  %v358_v21 = vpop.xlane.xlu1 %357 }
  0xa2   :  { %v642_v23 = vmul.f32 0.03125, %v358_v21  ;;  %v355_v24 = vpop.xlane.xlu0 %354  ;;  %v657_v31 = vmul.f32 0.03125, %v403_v20  ;;  %v233_v20 = vsel %vm208_vm0, %v88_v11, 0.0 }
  0xa3   :  { %v641_v25 = vmul.f32 0.03125, %v355_v24 }
  0xa4   :  { %v1505_v28 = vperm.slane %v642_v23, %v3036_v38  ;;  %v1535_v43 = vperm.slane %v657_v31, %v3033_v36  ;;  %v566_v23 = vsel %vm208_vm0, %v199_v14, 0.0 }
  0xa5   :  { %v1504_v30 = vperm.slane %v641_v25, %v3033_v36 }
  0xa6   :  { %231 = vadd.xlane.f32.xlu2 %v230_v26  ;;  %564 = vadd.xlane.f32.xlu1 %v563_v27 }
  0xa7   :  { %v3098_v32 = vsel %vm1384_vm1, %v1505_v28, %v1504_v30  ;;  %522 = vadd.xlane.f32.xlu0 %v521_v29  ;;  %v152_v28 = vld [vmem:[%s3960_s0 + $0x240] sm:$0xff] }
  0xa8   :  { %v136_v29 = vld [vmem:[%s3960_s0 + $0x1c0] sm:$0xff] }
  0xa9   :  { %v547_v35 = vpop.xlane.xlu2 %546  ;;  %v508_v37 = vpop.xlane.xlu1 %507  ;;  %v377_v39 = vsel %vm208_vm0, %v136_v29, 0.0 }
  0xaa   :  { %v692_v40 = vmul.f32 0.03125, %v508_v37  ;;  %v406_v42 = vpop.xlane.xlu0 %405  ;;  %v705_v51 = vmul.f32 0.03125, %v547_v35 }
  0xab   :  { %v658_v44 = vmul.f32 0.03125, %v406_v42  ;;  %v335_v42 = vsel %vm208_vm0, %v122_v33, 0.0 }
  0xac   :  { %v1602_v47 = vperm.slane %v692_v40, %v3063_v63  ;;  %v1628_v62 = vperm.slane %v705_v51, %v3033_v36 }
  0xad   :  { %v1536_v49 = vperm.slane %v658_v44, %v3036_v38 }
  0xae   :  { %v1603_v50 = vsel %vm1392_vm3, %v1602_v47, %v1601_v61  ;;  %375 = vadd.xlane.f32.xlu2 %v374_v45  ;;  %333 = vadd.xlane.f32.xlu1 %v332_v46  ;;  %v3185_v47 = vadd.s32 4294967256, %v3033_v36 }
  0xaf   :  { %v1537_v52 = vsel %vm1384_vm1, %v1536_v49, %v1535_v43  ;;  %273 = vadd.xlane.f32.xlu0 %v272_v48  ;;  %v200_v48 = vld [vmem:[%s3960_s0 + $0x3c0] sm:$0xff]  ;;  %v186_v49 = vld [vmem:[%s3960_s0 + $0x350] sm:$0xff] }
  0xb1   :  { %v319_v56 = vpop.xlane.xlu2 %318  ;;  %v217_v57 = vpop.xlane.xlu1 %216 }
  0xb2   :  { %v629_v59 = vmul.f32 0.03125, %v319_v56  ;;  %v595_v60 = vmul.f32 0.03125, %v217_v57  ;;  %v550_v61 = vpop.xlane.xlu0 %549 }
  0xb3   :  { %v706_v0 = vmul.f32 0.03125, %v550_v61 }
  0xb4   :  { %v1480_v3 = vperm.slane %v629_v59, %v3118_v53  ;;  %v1387_v4 = vperm.slane %v595_v60, %v3045_v41  ;;  %v569_v59 = vsel %vm208_vm0, %v200_v48, 0.0  ;;  %v527_v60 = vsel %vm208_vm0, %v186_v49, 0.0  ;;  %v187_v49 = vld [vmem:[%s3960_s0 + $0x358] sm:$0xff] }
  0xb5   :  { %v1629_v6 = vperm.slane %v706_v0, %v3036_v38 }
  0xb6   :  { %v3137_v7 = vsel %vm1396_vm4, %v1480_v3, %v1479_v16  ;;  %v1389_v8 = vsel %vm1388_vm2, %v1387_v4, %v1385_v17  ;;  %525 = vadd.xlane.f32.xlu2 %v524_v1  ;;  %465 = vadd.xlane.f32.xlu1 %v464_v2 }
  0xb7   :  { %v1630_v9 = vsel %vm1384_vm1, %v1629_v6, %v1628_v62  ;;  %423 = vadd.xlane.f32.xlu0 %v422_v5  ;;  %v123_v5 = vld [vmem:[%s3960_s0 + $0x158] sm:$0xff] }
  0xb8   :  { %v103_v6 = vld [vmem:[%s3960_s0 + $0xb8] sm:$0xff]  ;;  %v338_v14 = vsel %vm208_vm0, %v123_v5, 0.0 }
  0xb9   :  { %v511_v12 = vpop.xlane.xlu2 %510  ;;  %v409_v13 = vpop.xlane.xlu1 %408 }
  0xba   :  { %v693_v15 = vmul.f32 0.03125, %v511_v12  ;;  %v659_v16 = vmul.f32 0.03125, %v409_v13  ;;  %v361_v17 = vpop.xlane.xlu0 %360 }
  0xbb   :  { %v643_v18 = vmul.f32 0.03125, %v361_v17 }
  0xbc   :  { %v1604_v21 = vperm.slane %v693_v15, %v3118_v53  ;;  %v1538_v22 = vperm.slane %v659_v16, %v3045_v41  ;;  %v278_v15 = vsel %vm208_vm0, %v103_v6, 0.0 }
  0xbd   :  { %v1507_v24 = vperm.slane %v643_v18, %v3045_v41 }
  0xbe   :  { %v3157_v25 = vsel %vm1396_vm4, %v1604_v21, %v1603_v50  ;;  %v3160_v26 = vsel %vm1388_vm2, %v1538_v22, %v1537_v52  ;;  %276 = vadd.xlane.f32.xlu2 %v275_v19  ;;  %234 = vadd.xlane.f32.xlu1 %v233_v20  ;;  %v166_v52 = vld [vmem:[%s3960_s0 + $0x2b0] sm:$0xff]  ;;  %v153_v22 = vld [vmem:[%s3960_s0 + $0x248] sm:$0xff] }
  0xbf   :  { %v1508_v27 = vsel %vm1388_vm2, %v1507_v24, %v3098_v32  ;;  %567 = vadd.xlane.f32.xlu0 %v566_v23  ;;  %v425_v32 = vsel %vm208_vm0, %v152_v28, 0.0  ;;  %v467_v0 = vsel %vm208_vm0, %v166_v52, 0.0  ;;  %v428_v33 = vsel %vm208_vm0, %v153_v22, 0.0 }
  0xc1   :  { %v259_v30 = vpop.xlane.xlu2 %258  ;;  %v220_v31 = vpop.xlane.xlu1 %219 }
  0xc2   :  { %v596_v34 = vmul.f32 0.03125, %v220_v31  ;;  %v553_v35 = vpop.xlane.xlu0 %552  ;;  %v609_v45 = vmul.f32 0.03125, %v259_v30 }
  0xc3   :  { %v707_v37 = vmul.f32 0.03125, %v553_v35 }
  0xc4   :  { %v1391_v40 = vperm.slane %v596_v34, %v3063_v63  ;;  %v1442_v57 = vperm.slane %v609_v45, %v3033_v36  ;;  %v90_v45 = vld [vmem:[%s3960_s0 + $0x50] sm:$0xff] }
  0xc5   :  { %v1631_v43 = vperm.slane %v707_v37, %v3045_v41 }
  0xc6   :  { %v3179_v44 = vsel %vm1392_vm3, %v1391_v40, %v1389_v8  ;;  %426 = vadd.xlane.f32.xlu2 %v425_v32  ;;  %378 = vadd.xlane.f32.xlu1 %v377_v39 }
  0xc7   :  { %v3182_v46 = vsel %vm1388_vm2, %v1631_v43, %v1630_v9  ;;  %336 = vadd.xlane.f32.xlu0 %v335_v42  ;;  %v3261_v43 = vadd.s32 4294967248, %v3033_v36 }
  0xc9   :  { %v364_v50 = vpop.xlane.xlu2 %363  ;;  %v322_v51 = vpop.xlane.xlu1 %321 }
  0xca   :  { %v644_v54 = vmul.f32 0.03125, %v364_v50  ;;  %v630_v55 = vmul.f32 0.03125, %v322_v51  ;;  %v262_v56 = vpop.xlane.xlu0 %261 }
  0xcb   :  { %v610_v58 = vmul.f32 0.03125, %v262_v56 }
  0xcc   :  { %v1509_v61 = vperm.slane %v644_v54, %v3063_v63  ;;  %v1482_v62 = vperm.slane %v630_v55, %v3185_v47  ;;  %v239_v54 = vsel %vm208_vm0, %v90_v45, 0.0 }
  0xcd   :  { %v1443_v1 = vperm.slane %v610_v58, %v3036_v38  ;;  %v530_v58 = vsel %vm208_vm0, %v187_v49, 0.0 }
  0xce   :  { %v3204_v2 = vsel %vm1392_vm3, %v1509_v61, %v1508_v27  ;;  %v3208_v3 = vsel %vm1400_vm5, %v1482_v62, %v3137_v7  ;;  %570 = vadd.xlane.f32.xlu2 %v569_v59  ;;  %528 = vadd.xlane.f32.xlu1 %v527_v60  ;;  %v89_v7 = vld [vmem:[%s3960_s0 + $0x48] sm:$0xff] }
  0xcf   :  { %v3211_v4 = vsel %vm1384_vm1, %v1443_v1, %v1442_v57  ;;  %468 = vadd.xlane.f32.xlu0 %v467_v0  ;;  %v236_v18 = vsel %vm208_vm0, %v89_v7, 0.0  ;;  %v137_v27 = vld [vmem:[%s3960_s0 + $0x1c8] sm:$0xff]  ;;  %v138_v0 = vld [vmem:[%s3960_s0 + $0x1d0] sm:$0xff]  ;;  %v124_v1 = vld [vmem:[%s3960_s0 + $0x160] sm:$0xff] }
  0xd0   :  { %v380_v37 = vsel %vm208_vm0, %v137_v27, 0.0 }
  0xd1   :  { %v454_v8 = vpop.xlane.xlu2 %453  ;;  %v451_v9 = vpop.xlane.xlu1 %450 }
  0xd2   :  { %v674_v10 = vmul.f32 0.03125, %v454_v8  ;;  %v673_v11 = vmul.f32 0.03125, %v451_v9  ;;  %v412_v12 = vpop.xlane.xlu0 %411 }
  0xd3   :  { %v660_v13 = vmul.f32 0.03125, %v412_v12 }
  0xd4   :  { %v1567_v16 = vperm.slane %v674_v10, %v3036_v38  ;;  %v1566_v17 = vperm.slane %v673_v11, %v3033_v36  ;;  %v167_v38 = vld [vmem:[%s3960_s0 + $0x2b8] sm:$0xff]  ;;  %v341_v10 = vsel %vm208_vm0, %v124_v1, 0.0 }
  0xd5   :  { %v1540_v19 = vperm.slane %v660_v13, %v3063_v63  ;;  %v470_v31 = vsel %vm208_vm0, %v167_v38, 0.0 }
  0xd6   :  { %v3229_v20 = vsel %vm1384_vm1, %v1567_v16, %v1566_v17  ;;  %339 = vadd.xlane.f32.xlu2 %v338_v14  ;;  %279 = vadd.xlane.f32.xlu1 %v278_v15 }
  0xd7   :  { %v3233_v21 = vsel %vm1392_vm3, %v1540_v19, %v3160_v26  ;;  %237 = vadd.xlane.f32.xlu0 %v236_v18  ;;  %v168_v18 = vld [vmem:[%s3960_s0 + $0x2c0] sm:$0xff] }
  0xd9   :  { %v223_v23 = vpop.xlane.xlu2 %222  ;;  %v556_v24 = vpop.xlane.xlu1 %555 }
  0xda   :  { %v597_v28 = vmul.f32 0.03125, %v223_v23  ;;  %v708_v29 = vmul.f32 0.03125, %v556_v24  ;;  %v514_v30 = vpop.xlane.xlu0 %513 }
  0xdb   :  { %v694_v26 = vmul.f32 0.03125, %v514_v30 }
  0xdc   :  { %v1395_v34 = vperm.slane %v597_v28, %v3118_v53  ;;  %v1633_v35 = vperm.slane %v708_v29, %v3063_v63  ;;  %v473_v28 = vsel %vm208_vm0, %v168_v18, 0.0  ;;  %v169_v18 = vld [vmem:[%s3960_s0 + $0x2c8] sm:$0xff] }
  0xdd   :  { %v1606_v32 = vperm.slane %v694_v26, %v3185_v47 }
  0xde   :  { %v3252_v39 = vsel %vm1396_vm4, %v1395_v34, %v3179_v44  ;;  %v3256_v40 = vsel %vm1392_vm3, %v1633_v35, %v3182_v46  ;;  %471 = vadd.xlane.f32.xlu2 %v470_v31  ;;  %429 = vadd.xlane.f32.xlu1 %v428_v33  ;;  %v201_v44 = vld [vmem:[%s3960_s0 + $0x3c8] sm:$0xff] }
  0xdf   :  { %v1607_v42 = vsel %vm1400_vm5, %v1606_v32, %v3157_v25  ;;  %381 = vadd.xlane.f32.xlu0 %v380_v37  ;;  %v572_v55 = vsel %vm208_vm0, %v201_v44, 0.0  ;;  %v105_v37 = vld [vmem:[%s3960_s0 + $0xc8] sm:$0xff]  ;;  %v91_v32 = vld [vmem:[%s3960_s0 + $0x58] sm:$0xff]  ;;  %v3343_v44 = vadd.s32 4294967240, %v3033_v36 }
  0xe1   :  { %v367_v48 = vpop.xlane.xlu2 %366  ;;  %v325_v46 = vpop.xlane.xlu1 %324 }
  0xe2   :  { %v645_v50 = vmul.f32 0.03125, %v367_v48  ;;  %v631_v25 = vmul.f32 0.03125, %v325_v46  ;;  %v265_v51 = vpop.xlane.xlu0 %264 }
  0xe3   :  { %v611_v52 = vmul.f32 0.03125, %v265_v51 }
  0xe4   :  { %v1511_v56 = vperm.slane %v645_v50, %v3118_v53  ;;  %v1484_v57 = vperm.slane %v631_v25, %v3261_v43  ;;  %v284_v50 = vsel %vm208_vm0, %v105_v37, 0.0  ;;  %v242_v25 = vsel %vm208_vm0, %v91_v32, 0.0 }
  0xe5   :  { %v1445_v59 = vperm.slane %v611_v52, %v3045_v41 }
  0xe6   :  { %v3280_v60 = vsel %vm1396_vm4, %v1511_v56, %v3204_v2  ;;  %v3284_v61 = vsel %vm1404_vm6, %v1484_v57, %v3208_v3  ;;  %240 = vadd.xlane.f32.xlu2 %v239_v54  ;;  %573 = vadd.xlane.f32.xlu1 %v572_v55  ;;  %v104_v3 = vld [vmem:[%s3960_s0 + $0xc0] sm:$0xff] }
  0xe7   :  { %v1446_v62 = vsel %vm1388_vm2, %v1445_v59, %v3211_v4  ;;  %531 = vadd.xlane.f32.xlu0 %v530_v58  ;;  %v383_v4 = vsel %vm208_vm0, %v138_v0, 0.0  ;;  %v281_v13 = vsel %vm208_vm0, %v104_v3, 0.0  ;;  %v155_v59 = vld [vmem:[%s3960_s0 + $0x258] sm:$0xff] }
  0xe9   :  { %v517_v2 = vpop.xlane.xlu2 %516  ;;  %v457_v5 = vpop.xlane.xlu1 %456 }
  0xea   :  { %v695_v6 = vmul.f32 0.03125, %v517_v2  ;;  %v675_v8 = vmul.f32 0.03125, %v457_v5  ;;  %v415_v9 = vpop.xlane.xlu0 %414 }
  0xeb   :  { %v661_v7 = vmul.f32 0.03125, %v415_v9 }
  0xec   :  { %v1608_v11 = vperm.slane %v695_v6, %v3261_v43  ;;  %v1569_v12 = vperm.slane %v675_v8, %v3045_v41  ;;  %v188_v41 = vld [vmem:[%s3960_s0 + $0x360] sm:$0xff] }
  0xed   :  { %v1542_v14 = vperm.slane %v661_v7, %v3118_v53 }
  0xee   :  { %v3304_v15 = vsel %vm1404_vm6, %v1608_v11, %v1607_v42  ;;  %v3308_v16 = vsel %vm1388_vm2, %v1569_v12, %v3229_v20  ;;  %384 = vadd.xlane.f32.xlu2 %v383_v4  ;;  %342 = vadd.xlane.f32.xlu1 %v341_v10  ;;  %v154_v20 = vld [vmem:[%s3960_s0 + $0x250] sm:$0xff] }
  0xef   :  { %v1543_v17 = vsel %vm1396_vm4, %v1542_v14, %v3233_v21  ;;  %282 = vadd.xlane.f32.xlu0 %v281_v13  ;;  %v533_v21 = vsel %vm208_vm0, %v188_v41, 0.0  ;;  %v431_v26 = vsel %vm208_vm0, %v154_v20, 0.0  ;;  %v3388_v14 = vadd.s32 4294967232, %v3033_v36 }
  0xf1   :  { %v268_v19 = vpop.xlane.xlu2 %267  ;;  %v226_v38 = vpop.xlane.xlu1 %225 }
  0xf2   :  { %v612_v22 = vmul.f32 0.03125, %v268_v19  ;;  %v598_v23 = vmul.f32 0.03125, %v226_v38  ;;  %v559_v24 = vpop.xlane.xlu0 %558 }
  0xf3   :  { %v709_v27 = vmul.f32 0.03125, %v559_v24 }
  0xf4   :  { %v1447_v29 = vperm.slane %v612_v22, %v3063_v63  ;;  %v1399_v30 = vperm.slane %v598_v23, %v3185_v47 }
  0xf5   :  { %v1635_v31 = vperm.slane %v709_v27, %v3118_v53 }
  0xf6   :  { %v3328_v33 = vsel %vm1392_vm3, %v1447_v29, %v1446_v62  ;;  %v3332_v34 = vsel %vm1400_vm5, %v1399_v30, %v3252_v39  ;;  %534 = vadd.xlane.f32.xlu2 %v533_v21  ;;  %474 = vadd.xlane.f32.xlu1 %v473_v28  ;;  %v202_v39 = vld [vmem:[%s3960_s0 + $0x3d0] sm:$0xff]  ;;  %v139_v62 = vld [vmem:[%s3960_s0 + $0x1d8] sm:$0xff]  ;;  %v476_v21 = vsel %vm208_vm0, %v169_v18, 0.0 }
  0xf7   :  { %v1636_v35 = vsel %vm1396_vm4, %v1635_v31, %v3256_v40  ;;  %432 = vadd.xlane.f32.xlu0 %v431_v26  ;;  %v575_v54 = vsel %vm208_vm0, %v202_v39, 0.0  ;;  %v386_v8 = vsel %vm208_vm0, %v139_v62, 0.0  ;;  %v126_v31 = vld [vmem:[%s3960_s0 + $0x170] sm:$0xff] }
  0xf9   :  { %v418_v42 = vpop.xlane.xlu2 %417  ;;  %v370_v45 = vpop.xlane.xlu1 %369 }
  0xfa   :  { %v662_v48 = vmul.f32 0.03125, %v418_v42  ;;  %v646_v40 = vmul.f32 0.03125, %v370_v45  ;;  %v328_v46 = vpop.xlane.xlu0 %327 }
  0xfb   :  { %v632_v49 = vmul.f32 0.03125, %v328_v46 }
  0xfc   :  { %v1544_v51 = vperm.slane %v662_v48, %v3185_v47  ;;  %v1513_v52 = vperm.slane %v646_v40, %v3185_v47 }
  0xfd   :  { %v1486_v55 = vperm.slane %v632_v49, %v3343_v44 }
  0xfe   :  { %v3355_v56 = vsel %vm1400_vm5, %v1544_v51, %v1543_v17  ;;  %v3359_v57 = vsel %vm1400_vm5, %v1513_v52, %v3280_v60  ;;  %285 = vadd.xlane.f32.xlu2 %v284_v50  ;;  %243 = vadd.xlane.f32.xlu1 %v242_v25  ;;  %v125_v60 = vld [vmem:[%s3960_s0 + $0x168] sm:$0xff] }
  0xff   :  { %v1487_v58 = vsel %vm1408_vm7, %v1486_v55, %v3284_v61  ;;  %576 = vadd.xlane.f32.xlu0 %v575_v54  ;;  %v434_v61 = vsel %vm208_vm0, %v155_v59, 0.0  ;;  %v344_v4 = vsel %vm208_vm0, %v125_v60, 0.0  ;;  %v189_v17 = vld [vmem:[%s3960_s0 + $0x368] sm:$0xff]  ;;  %v156_v55 = vld [vmem:[%s3960_s0 + $0x260] sm:$0xff] }
 0x100   :  { %v536_v23 = vsel %vm208_vm0, %v189_v17, 0.0  ;;  %v190_v17 = vld [vmem:[%s3960_s0 + $0x370] sm:$0xff] }
 0x101   :  { %v562_v0 = vpop.xlane.xlu2 %561  ;;  %v520_v1 = vpop.xlane.xlu1 %519 }
 0x102   :  { %v710_v2 = vmul.f32 0.03125, %v562_v0  ;;  %v696_v5 = vmul.f32 0.03125, %v520_v1  ;;  %v460_v3 = vpop.xlane.xlu0 %459 }
 0x103   :  { %v676_v6 = vmul.f32 0.03125, %v460_v3 }
 0x104   :  { %v1637_v9 = vperm.slane %v710_v2, %v3185_v47  ;;  %v1610_v7 = vperm.slane %v696_v5, %v3343_v44  ;;  %v437_v2 = vsel %vm208_vm0, %v156_v55, 0.0 }
 0x105   :  { %v1571_v10 = vperm.slane %v676_v6, %v3063_v63  ;;  %v203_v63 = vld [vmem:[%s3960_s0 + $0x3d8] sm:$0xff] }
 0x106   :  { %v3379_v11 = vsel %vm1400_vm5, %v1637_v9, %v1636_v35  ;;  %v3383_v12 = vsel %vm1408_vm7, %v1610_v7, %v3304_v15  ;;  %435 = vadd.xlane.f32.xlu2 %v434_v61  ;;  %387 = vadd.xlane.f32.xlu1 %v386_v8  ;;  %v578_v22 = vsel %vm208_vm0, %v203_v63, 0.0  ;;  %v106_v35 = vld [vmem:[%s3960_s0 + $0xd0] sm:$0xff] }
 0x107   :  { %v1572_v13 = vsel %vm1392_vm3, %v1571_v10, %v3308_v16  ;;  %345 = vadd.xlane.f32.xlu0 %v344_v4  ;;  %v287_v40 = vsel %vm208_vm0, %v106_v35, 0.0  ;;  %v3463_v4 = vadd.s32 4294967224, %v3033_v36  ;;  %v93_v10 = vld [vmem:[%s3960_s0 + $0x68] sm:$0xff] }
 0x109   :  { %v331_v41 = vpop.xlane.xlu2 %330  ;;  %v271_v15 = vpop.xlane.xlu1 %270 }
 0x10a   :  { %v633_v19 = vmul.f32 0.03125, %v331_v41  ;;  %v613_v16 = vmul.f32 0.03125, %v271_v15  ;;  %v229_v38 = vpop.xlane.xlu0 %228 }
 0x10b   :  { %v599_v20 = vmul.f32 0.03125, %v229_v38 }
 0x10c   :  { %v1488_v24 = vperm.slane %v633_v19, %v3388_v14  ;;  %v1449_v27 = vperm.slane %v613_v16, %v3118_v53  ;;  %v248_v19 = vsel %vm208_vm0, %v93_v10, 0.0 }
 0x10d   :  { %v1403_v28 = vperm.slane %v599_v20, %v3261_v43 }
 0x10e   :  { %v3406_v29 = vsel %vm1412_vm8, %v1488_v24, %v1487_v58  ;;  %v3410_v30 = vsel %vm1396_vm4, %v1449_v27, %v3328_v33  ;;  %579 = vadd.xlane.f32.xlu2 %v578_v22  ;;  %537 = vadd.xlane.f32.xlu1 %v536_v23  ;;  %v92_v33 = vld [vmem:[%s3960_s0 + $0x60] sm:$0xff]  ;;  %v539_v22 = vsel %vm208_vm0, %v190_v17, 0.0 }
 0x10f   :  { %v1405_v26 = vsel %vm1404_vm6, %v1403_v28, %v3332_v34  ;;  %477 = vadd.xlane.f32.xlu0 %v476_v21  ;;  %v347_v34 = vsel %vm208_vm0, %v126_v31, 0.0  ;;  %v245_v50 = vsel %vm208_vm0, %v92_v33, 0.0  ;;  %v141_v28 = vld [vmem:[%s3960_s0 + $0x1e8] sm:$0xff] }
 0x111   :  { %v463_v37 = vpop.xlane.xlu2 %462  ;;  %v421_v32 = vpop.xlane.xlu1 %420 }
 0x112   :  { %v677_v42 = vmul.f32 0.03125, %v463_v37  ;;  %v663_v45 = vmul.f32 0.03125, %v421_v32  ;;  %v373_v39 = vpop.xlane.xlu0 %372 }
 0x113   :  { %v647_v48 = vmul.f32 0.03125, %v373_v39 }
 0x114   :  { %v1573_v46 = vperm.slane %v677_v42, %v3118_v53  ;;  %v1546_v49 = vperm.slane %v663_v45, %v3261_v43  ;;  %v170_v53 = vld [vmem:[%s3960_s0 + $0x2d0] sm:$0xff] }
 0x115   :  { %v1515_v25 = vperm.slane %v647_v48, %v3261_v43 }
 0x116   :  { %v3430_v51 = vsel %vm1396_vm4, %v1573_v46, %v1572_v13  ;;  %v3434_v52 = vsel %vm1404_vm6, %v1546_v49, %v3355_v56  ;;  %348 = vadd.xlane.f32.xlu2 %v347_v34  ;;  %288 = vadd.xlane.f32.xlu1 %v287_v40  ;;  %v140_v56 = vld [vmem:[%s3960_s0 + $0x1e0] sm:$0xff] }
 0x117   :  { %v1516_v54 = vsel %vm1404_vm6, %v1515_v25, %v3359_v57  ;;  %246 = vadd.xlane.f32.xlu0 %v245_v50  ;;  %v479_v57 = vsel %vm208_vm0, %v170_v53, 0.0  ;;  %v389_v6 = vsel %vm208_vm0, %v140_v56, 0.0  ;;  %v204_v13 = vld [vmem:[%s3960_s0 + $0x3e0] sm:$0xff]  ;;  %v171_v25 = vld [vmem:[%s3960_s0 + $0x2d8] sm:$0xff] }
 0x118   :  { %v581_v16 = vsel %vm208_vm0, %v204_v13, 0.0  ;;  %v3544_v13 = vadd.s32 4294967216, %v3033_v36 }
 0x119   :  { %v232_v58 = vpop.xlane.xlu2 %231  ;;  %v565_v59 = vpop.xlane.xlu1 %564 }
 0x11a   :  { %v600_v62 = vmul.f32 0.03125, %v232_v58  ;;  %v711_v0 = vmul.f32 0.03125, %v565_v59  ;;  %v523_v1 = vpop.xlane.xlu0 %522 }
 0x11b   :  { %v697_v60 = vmul.f32 0.03125, %v523_v1 }
 0x11c   :  { %v1407_v5 = vperm.slane %v600_v62, %v3343_v44  ;;  %v1639_v3 = vperm.slane %v711_v0, %v3261_v43  ;;  %v482_v62 = vsel %vm208_vm0, %v171_v25, 0.0  ;;  %v206_v25 = vld [vmem:[%s3960_s0 + $0x3f0] sm:$0xff] }
 0x11d   :  { %v1612_v61 = vperm.slane %v697_v60, %v3388_v14 }
 0x11e   :  { %v3454_v8 = vsel %vm1408_vm7, %v1407_v5, %v1405_v26  ;;  %v3458_v9 = vsel %vm1404_vm6, %v1639_v3, %v3379_v11  ;;  %480 = vadd.xlane.f32.xlu2 %v479_v57  ;;  %438 = vadd.xlane.f32.xlu1 %v437_v2  ;;  %v127_v26 = vld [vmem:[%s3960_s0 + $0x178] sm:$0xff] }
 0x11f   :  { %v1613_v7 = vsel %vm1412_vm8, %v1612_v61, %v3383_v12  ;;  %390 = vadd.xlane.f32.xlu0 %v389_v6  ;;  %v350_v45 = vsel %vm208_vm0, %v127_v26, 0.0  ;;  %v108_v6 = vld [vmem:[%s3960_s0 + $0xe0] sm:$0xff]  ;;  %v94_v61 = vld [vmem:[%s3960_s0 + $0x70] sm:$0xff] }
 0x121   :  { %v376_v63 = vpop.xlane.xlu2 %375  ;;  %v334_v11 = vpop.xlane.xlu1 %333 }
 0x122   :  { %v648_v41 = vmul.f32 0.03125, %v376_v63  ;;  %v634_v12 = vmul.f32 0.03125, %v334_v11  ;;  %v274_v15 = vpop.xlane.xlu0 %273 }
 0x123   :  { %v614_v18 = vmul.f32 0.03125, %v274_v15 }
 0x124   :  { %v1517_v38 = vperm.slane %v648_v41, %v3343_v44  ;;  %v1490_v20 = vperm.slane %v634_v12, %v3463_v4  ;;  %v293_v41 = vsel %vm208_vm0, %v108_v6, 0.0  ;;  %v251_v12 = vsel %vm208_vm0, %v94_v61, 0.0 }
 0x125   :  { %v1451_v23 = vperm.slane %v614_v18, %v3185_v47 }
 0x126   :  { %v3481_v24 = vsel %vm1408_vm7, %v1517_v38, %v1516_v54  ;;  %v3485_v27 = vsel %vm1416_vm9, %v1490_v20, %v3406_v29  ;;  %249 = vadd.xlane.f32.xlu2 %v248_v19  ;;  %582 = vadd.xlane.f32.xlu1 %v581_v16  ;;  %v107_v29 = vld [vmem:[%s3960_s0 + $0xd8] sm:$0xff] }
 0x127   :  { %v1452_v21 = vsel %vm1400_vm5, %v1451_v23, %v3410_v30  ;;  %540 = vadd.xlane.f32.xlu0 %v539_v22  ;;  %v392_v30 = vsel %vm208_vm0, %v141_v28, 0.0  ;;  %v290_v34 = vsel %vm208_vm0, %v107_v29, 0.0  ;;  %v172_v23 = vld [vmem:[%s3960_s0 + $0x2e0] sm:$0xff] }
 0x129   :  { %v526_v31 = vpop.xlane.xlu2 %525  ;;  %v466_v35 = vpop.xlane.xlu1 %465 }
 0x12a   :  { %v698_v37 = vmul.f32 0.03125, %v526_v31  ;;  %v678_v32 = vmul.f32 0.03125, %v466_v35  ;;  %v424_v33 = vpop.xlane.xlu0 %423 }
 0x12b   :  { %v664_v42 = vmul.f32 0.03125, %v424_v33 }
 0x12c   :  { %v1614_v39 = vperm.slane %v698_v37, %v3463_v4  ;;  %v1575_v48 = vperm.slane %v678_v32, %v3185_v47  ;;  %v191_v47 = vld [vmem:[%s3960_s0 + $0x378] sm:$0xff] }
 0x12d   :  { %v1548_v40 = vperm.slane %v664_v42, %v3343_v44 }
 0x12e   :  { %v3505_v46 = vsel %vm1416_vm9, %v1614_v39, %v1613_v7  ;;  %v3509_v49 = vsel %vm1400_vm5, %v1575_v48, %v3430_v51  ;;  %393 = vadd.xlane.f32.xlu2 %v392_v30  ;;  %351 = vadd.xlane.f32.xlu1 %v350_v45  ;;  %v157_v51 = vld [vmem:[%s3960_s0 + $0x268] sm:$0xff] }
 0x12f   :  { %v1549_v50 = vsel %vm1408_vm7, %v1548_v40, %v3434_v52  ;;  %291 = vadd.xlane.f32.xlu0 %v290_v34  ;;  %v542_v52 = vsel %vm208_vm0, %v191_v47, 0.0  ;;  %v440_v60 = vsel %vm208_vm0, %v157_v51, 0.0  ;;  %v3589_v40 = vadd.s32 4294967208, %v3033_v36 }
 0x131   :  { %v277_v54 = vpop.xlane.xlu2 %276  ;;  %v235_v53 = vpop.xlane.xlu1 %234 }
 0x132   :  { %v615_v55 = vmul.f32 0.03125, %v277_v54  ;;  %v601_v58 = vmul.f32 0.03125, %v235_v53  ;;  %v568_v59 = vpop.xlane.xlu0 %567 }
 0x133   :  { %v712_v56 = vmul.f32 0.03125, %v568_v59 }
 0x134   :  { %v1453_v0 = vperm.slane %v615_v55, %v3261_v43  ;;  %v1411_v1 = vperm.slane %v601_v58, %v3388_v14 }
 0x135   :  { %v1641_v57 = vperm.slane %v712_v56, %v3343_v44 }
 0x136   :  { %v3529_v2 = vsel %vm1404_vm6, %v1453_v0, %v1452_v21  ;;  %v3533_v5 = vsel %vm1412_vm8, %v1411_v1, %v3454_v8  ;;  %543 = vadd.xlane.f32.xlu2 %v542_v52  ;;  %483 = vadd.xlane.f32.xlu1 %v482_v62  ;;  %v205_v8 = vld [vmem:[%s3960_s0 + $0x3e8] sm:$0xff]  ;;  %v158_v21 = vld [vmem:[%s3960_s0 + $0x270] sm:$0xff]  ;;  %v587_v52 = vsel %vm208_vm0, %v206_v25, 0.0  ;;  %v1041_v25 = vld [vmem:[#allocation2 + $0xa00] sm:$0xff] }
 0x137   :  { %v1642_v3 = vsel %vm1408_vm7, %v1641_v57, %v3458_v9  ;;  %441 = vadd.xlane.f32.xlu0 %v440_v60  ;;  %v584_v19 = vsel %vm208_vm0, %v205_v8, 0.0  ;;  %v443_v32 = vsel %vm208_vm0, %v158_v21, 0.0  ;;  %v173_v57 = vld [vmem:[%s3960_s0 + $0x2e8] sm:$0xff]  ;;  %v174_v21 = vld [vmem:[%s3960_s0 + $0x2f0] sm:$0xff] }
 0x139   :  { %v427_v7 = vpop.xlane.xlu2 %426  ;;  %v379_v10 = vpop.xlane.xlu1 %378 }
 0x13a   :  { %v665_v63 = vmul.f32 0.03125, %v427_v7  ;;  %v649_v9 = vmul.f32 0.03125, %v379_v10  ;;  %v337_v11 = vpop.xlane.xlu0 %336 }
 0x13b   :  { %v635_v17 = vmul.f32 0.03125, %v337_v11 }
 0x13c   :  { %v1550_v15 = vperm.slane %v665_v63, %v3388_v14  ;;  %v1519_v18 = vperm.slane %v649_v9, %v3388_v14  ;;  %v1097_v63 = vld [vmem:[#allocation2 + $0xbc0] sm:$0xff]  ;;  %v488_v9 = vsel %vm208_vm0, %v173_v57, 0.0 }
 0x13d   :  { %v1492_v16 = vperm.slane %v635_v17, %v3544_v13  ;;  %1708 = vmatpush.msra.mxu2 %v1097_v63 }
 0x13e   :  { %v3556_v38 = vsel %vm1412_vm8, %v1550_v15, %v1549_v50  ;;  %v3560_v20 = vsel %vm1412_vm8, %v1519_v18, %v3481_v24  ;;  %294 = vadd.xlane.f32.xlu2 %v293_v41  ;;  %252 = vadd.xlane.f32.xlu1 %v251_v12  ;;  %v142_v24 = vld [vmem:[%s3960_s0 + $0x1f0] sm:$0xff]  ;;  %v95_v50 = vld [vmem:[%s3960_s0 + $0x78] sm:$0xff]  ;;  %v1089_v15 = vld [vmem:[#allocation2 + $0xb80] sm:$0xff] }
 0x13f   :  { %v1493_v22 = vsel %vm1420_vm10, %v1492_v16, %v3485_v27  ;;  %585 = vadd.xlane.f32.xlu0 %v584_v19  ;;  %v485_v27 = vsel %vm208_vm0, %v172_v23, 0.0  ;;  %v395_v30 = vsel %vm208_vm0, %v142_v24, 0.0  ;;  %v254_v58 = vsel %vm208_vm0, %v95_v50, 0.0  ;;  %1709 = vmatpush.msra.mxu2 %v1089_v15  ;;  %v1073_v23 = vld [vmem:[#allocation2 + $0xb00] sm:$0xff]  ;;  %v207_v24 = vld [vmem:[%s3960_s0 + $0x3f8] sm:$0xff] }
 0x141   :  { %v571_v28 = vpop.xlane.xlu2 %570  ;;  %v529_v26 = vpop.xlane.xlu1 %528 }
 0x142   :  { %v713_v31 = vmul.f32 0.03125, %v571_v28  ;;  %v699_v35 = vmul.f32 0.03125, %v529_v26  ;;  %v469_v29 = vpop.xlane.xlu0 %468  ;;  %v110_v28 = vld [vmem:[%s3960_s0 + $0xf0] sm:$0xff] }
 0x143   :  { %v679_v37 = vmul.f32 0.03125, %v469_v29  ;;  %v1065_v29 = vld [vmem:[#allocation2 + $0xac0] sm:$0xff] }
 0x144   :  { %v1643_v33 = vperm.slane %v713_v31, %v3388_v14  ;;  %v1616_v42 = vperm.slane %v699_v35, %v3544_v13 }
 0x145   :  { %v1577_v45 = vperm.slane %v679_v37, %v3261_v43  ;;  %v109_v43 = vld [vmem:[%s3960_s0 + $0xe8] sm:$0xff] }
 0x146   :  { %v3580_v39 = vsel %vm1412_vm8, %v1643_v33, %v1642_v3  ;;  %v3584_v48 = vsel %vm1420_vm10, %v1616_v42, %v3505_v46  ;;  %486 = vadd.xlane.f32.xlu2 %v485_v27  ;;  %444 = vadd.xlane.f32.xlu1 %v443_v32  ;;  %v296_v55 = vsel %vm208_vm0, %v109_v43, 0.0  ;;  %v159_v3 = vld [vmem:[%s3960_s0 + $0x278] sm:$0xff]  ;;  %v491_v27 = vsel %vm208_vm0, %v174_v21, 0.0 }
 0x147   :  { %v1578_v34 = vsel %vm1404_vm6, %v1577_v45, %v3509_v49  ;;  %396 = vadd.xlane.f32.xlu0 %v395_v30  ;;  %v446_v11 = vsel %vm208_vm0, %v159_v3, 0.0  ;;  %v299_v32 = vsel %vm208_vm0, %v110_v28, 0.0  ;;  %v590_v30 = vsel %vm208_vm0, %v207_v24, 0.0  ;;  %v1057_v45 = vld [vmem:[#allocation2 + $0xa80] sm:$0xff] }
 0x148   :  { %v1025_v3 = vld [vmem:[#allocation2 + $0x980] sm:$0xff] }
 0x149   :  { %v340_v47 = vpop.xlane.xlu2 %339  ;;  %v280_v46 = vpop.xlane.xlu1 %279  ;;  %v841_v24 = vld [vmem:[#allocation2 + $0x3c0] sm:$0xff] }
 0x14a   :  { %v636_v54 = vmul.f32 0.03125, %v340_v47  ;;  %v616_v49 = vmul.f32 0.03125, %v280_v46  ;;  %v238_v53 = vpop.xlane.xlu0 %237  ;;  %v1049_v47 = vld [vmem:[#allocation2 + $0xa40] sm:$0xff]  ;;  %1668 = vmatpush.msra.mxu0 %v841_v24 }
 0x14b   :  { %v602_v51 = vmul.f32 0.03125, %v238_v53 }
 0x14c   :  { %v1494_v59 = vperm.slane %v636_v54, %v3589_v40  ;;  %v1455_v56 = vperm.slane %v616_v49, %v3343_v44  ;;  %v3666_v54 = vadd.s32 4294967200, %v3033_v36  ;;  %v175_v49 = vld [vmem:[%s3960_s0 + $0x2f8] sm:$0xff] }
 0x14d   :  { %v1415_v62 = vperm.slane %v602_v51, %v3463_v4  ;;  %v111_v51 = vld [vmem:[%s3960_s0 + $0xf8] sm:$0xff] }
 0x14e   :  { %v3607_v0 = vsel %vm1424_vm11, %v1494_v59, %v1493_v22  ;;  %v3611_v1 = vsel %vm1408_vm7, %v1455_v56, %v3529_v2  ;;  %297 = vadd.xlane.f32.xlu2 %v296_v55  ;;  %255 = vadd.xlane.f32.xlu1 %v254_v58  ;;  %v143_v2 = vld [vmem:[%s3960_s0 + $0x1f8] sm:$0xff]  ;;  %v1081_v22 = vld [vmem:[#allocation2 + $0xb40] sm:$0xff]  ;;  %v302_v57 = vsel %vm208_vm0, %v111_v51, 0.0  ;;  %s2798_s0 = smov [#allocation10]  }
 0x14f   :  { %v1417_v60 = vsel %vm1416_vm9, %v1415_v62, %v3533_v5  ;;  %588 = vadd.xlane.f32.xlu0 %v587_v52  ;;  %v398_v12 = vsel %vm208_vm0, %v143_v2, 0.0  ;;  %1710 = vmatpush.msra.mxu2 %v1081_v22  ;;  %v1033_v59 = vld [vmem:[#allocation2 + $0x9c0] sm:$0xff]  ;;  %v494_v52 = vsel %vm208_vm0, %v175_v49, 0.0  ;;  %vm1659_vm0 = vcmask 1041409   ;;  %s2633_s1 = sshll.u32 %s2798_s0, 4  ;;  %s2634_s1 = int_to_ptr.vmem [resolvable:$true] %s2633_s1 }
 0x150   :  { %v1225_v51 = vld [vmem:[#allocation2 + $0xfc0] sm:$0xff] }
 0x151   :  { %v472_v6 = vpop.xlane.xlu2 %471  ;;  %v430_v61 = vpop.xlane.xlu1 %429  ;;  %1711 = vmatpush.msra.mxu2 %v1073_v23  ;;  %v1098_v23 = vld [vmem:[#allocation2 + $0xbc8] sm:$0xff]  ;;  %1728 = vmatpush.msra.mxu3 %v1225_v51  ;;  %v729_v51 = vld [vmem:[#allocation2 + $0x40] sm:$0xff] }
 0x152   :  { %v680_v7 = vmul.f32 0.03125, %v472_v6  ;;  %v666_v10 = vmul.f32 0.03125, %v430_v61  ;;  %v382_v8 = vpop.xlane.xlu0 %381 }
 0x153   :  { %v650_v5 = vmul.f32 0.03125, %v382_v8  ;;  %1712 = vmatpush.msra.mxu2 %v1065_v29  ;;  %v1009_v8 = vld [vmem:[#allocation2 + $0x900] sm:$0xff] }
 0x154   :  { %v1579_v17 = vperm.slane %v680_v7, %v3343_v44  ;;  %v1552_v41 = vperm.slane %v666_v10, %v3463_v4  ;;  %v1017_v7 = vld [vmem:[#allocation2 + $0x940] sm:$0xff] }
 0x155   :  { %v1521_v18 = vperm.slane %v650_v5, %v3463_v4  ;;  %1713 = vmatpush.msra.mxu2 %v1057_v45  ;;  %v817_v45 = vld [vmem:[#allocation2 + $0x300] sm:$0xff] }
 0x156   :  { %v3631_v19 = vsel %vm1408_vm7, %v1579_v17, %v1578_v34  ;;  %v3635_v16 = vsel %vm1416_vm9, %v1552_v41, %v3556_v38  ;;  %489 = vadd.xlane.f32.xlu2 %v488_v9  ;;  %447 = vadd.xlane.f32.xlu1 %v446_v11  ;;  %v1001_v17 = vld [vmem:[#allocation2 + $0x8c0] sm:$0xff] }
 0x157   :  { %v1522_v44 = vsel %vm1416_vm9, %v1521_v18, %v3560_v20  ;;  %399 = vadd.xlane.f32.xlu0 %v398_v12  ;;  %1714 = vmatpush.msra.mxu2 %v1049_v47  ;;  %v993_v12 = vld [vmem:[#allocation2 + $0x880] sm:$0xff] }
 0x158   :  { %v985_v18 = vld [vmem:[#allocation2 + $0x840] sm:$0xff] }
 0x159   :  { %v241_v26 = vpop.xlane.xlu2 %240  ;;  %v574_v38 = vpop.xlane.xlu1 %573  ;;  %1715 = vmatpush.msra.mxu2 %v1041_v25 }
 0x15a   :  { %v603_v31 = vmul.f32 0.03125, %v241_v26  ;;  %v714_v20 = vmul.f32 0.03125, %v574_v38  ;;  %v532_v35 = vpop.xlane.xlu0 %531 }
 0x15b   :  { %v700_v37 = vmul.f32 0.03125, %v532_v35  ;;  %1716 = vmatpush.msra.mxu2 %v1033_v59  ;;  %v1217_v59 = vld [vmem:[#allocation2 + $0xf80] sm:$0xff] }
 0x15c   :  { %v1419_v33 = vperm.slane %v603_v31, %v3544_v13  ;;  %v1645_v42 = vperm.slane %v714_v20, %v3463_v4  ;;  %v1090_v20 = vld [vmem:[#allocation2 + $0xb88] sm:$0xff]  ;;  %1729 = vmatpush.msra.mxu3 %v1217_v59  ;;  %v913_v59 = vld [vmem:[#allocation2 + $0x600] sm:$0xff] }
 0x15d   :  { %v1618_v34 = vperm.slane %v700_v37, %v3589_v40  ;;  %1717 = vmatpush.msra.mxu2 %v1025_v3  ;;  %v1082_v37 = vld [vmem:[#allocation2 + $0xb48] sm:$0xff] }
 0x15e   :  { %v3655_v43 = vsel %vm1420_vm10, %v1419_v33, %v1417_v60  ;;  %v3659_v50 = vsel %vm1416_vm9, %v1645_v42, %v3580_v39  ;;  %492 = vadd.xlane.f32.xlu2 %v491_v27  ;;  %300 = vadd.xlane.f32.xlu1 %v299_v32  ;;  %v825_v33 = vld [vmem:[#allocation2 + $0x340] sm:$0xff]  ;;  %v1042_v3 = vld [vmem:[#allocation2 + $0xa08] sm:$0xff] }
 0x15f   :  { %v3663_v46 = vsel %vm1424_vm11, %v1618_v34, %v3584_v48  ;;  %591 = vadd.xlane.f32.xlu0 %v590_v30  ;;  %1718 = vmatpush.msra.mxu2 %v1017_v7  ;;  %v1074_v30 = vld [vmem:[#allocation2 + $0xb08] sm:$0xff]  ;;  %v1201_v7 = vld [vmem:[#allocation2 + $0xf00] sm:$0xff] }
 0x160   :  { %v1066_v34 = vld [vmem:[#allocation2 + $0xac8] sm:$0xff] }
 0x161   :  { %v385_v53 = vpop.xlane.xlu2 %384  ;;  %v343_v39 = vpop.xlane.xlu1 %342  ;;  %1719 = vmatpush.msra.mxu2 %v1009_v8 }
 0x162   :  { %v651_v55 = vmul.f32 0.03125, %v385_v53  ;;  %v637_v48 = vmul.f32 0.03125, %v343_v39  ;;  %v283_v58 = vpop.xlane.xlu0 %282 }
 0x163   :  { %v617_v56 = vmul.f32 0.03125, %v283_v58  ;;  %1720 = vmatpush.msra.mxu2 %v1001_v17  ;;  %v801_v58 = vld [vmem:[#allocation2 + $0x280] sm:$0xff] }
 0x164   :  { %v1523_v62 = vperm.slane %v651_v55, %v3544_v13  ;;  %v1496_v60 = vperm.slane %v637_v48, %v3666_v54  ;;  %v1058_v55 = vld [vmem:[#allocation2 + $0xa88] sm:$0xff]  ;;  %v969_v17 = vld [vmem:[#allocation2 + $0x7c0] sm:$0xff] }
 0x165   :  { %v1457_v6 = vperm.slane %v617_v56, %v3388_v14  ;;  %1721 = vmatpush.msra.mxu2 %v993_v12  ;;  %v1050_v56 = vld [vmem:[#allocation2 + $0xa48] sm:$0xff]  ;;  %1688 = vmatpush.msra.mxu1 %v969_v17 }
 0x166   :  { %v3680_v61 = vsel %vm1420_vm10, %v1523_v62, %v1522_v44  ;;  %v3684_v2 = vsel %vm1428_vm12, %v1496_v60, %v3607_v0  ;;  %495 = vadd.xlane.f32.xlu1 %v494_v52  ;;  %v977_v44 = vld [vmem:[#allocation2 + $0x800] sm:$0xff]  ;;  %v1026_v12 = vld [vmem:[#allocation2 + $0x988] sm:$0xff] }
 0x167   :  { %v1458_v10 = vsel %vm1412_vm8, %v1457_v6, %v3611_v1  ;;  %303 = vadd.xlane.f32.xlu0 %v302_v57  ;;  %1722 = vmatpush.msra.mxu2 %v985_v18  ;;  %v793_v60 = vld [vmem:[#allocation2 + $0x240] sm:$0xff]  ;;  %v826_v17 = vld [vmem:[#allocation2 + $0x348] sm:$0xff] }
 0x168   :  { %v1209_v57 = vld [vmem:[#allocation2 + $0xf40] sm:$0xff] }
 0x169   :  { %v3688_v63 = vpop.xlane.xlu2 %534  ;;  %v475_v5 = vpop.xlane.xlu1 %474  ;;  %1723 = vmatpush.msra.mxu2 %v977_v44  ;;  %1730 = vmatpush.msra.mxu3 %v1209_v57  ;;  %v785_v6 = vld [vmem:[#allocation2 + $0x200] sm:$0xff] }
 0x16a   :  { %v681_v9 = vmul.f32 0.03125, %v475_v5  ;;  %v433_v11 = vpop.xlane.xlu0 %432  ;;  %v769_v18 = vld [vmem:[#allocation2 + $0x180] sm:$0xff] }
 0x16b   :  { %v667_v41 = vmul.f32 0.03125, %v433_v11  ;;  %1788 = vmatpush.msrb.mxu2 %v1098_v23  ;;  %1731 = vmatpush.msra.mxu3 %v1201_v7  ;;  %v1185_v44 = vld [vmem:[#allocation2 + $0xe80] sm:$0xff] }
 0x16c   :  { %v1581_v0 = vperm.slane %v681_v9, %v3388_v14  ;;  %v905_v7 = vld [vmem:[#allocation2 + $0x5c0] sm:$0xff] }
 0x16d   :  { %v1554_v15 = vperm.slane %v667_v41, %v3544_v13  ;;  %1789 = vmatpush.msrb.mxu2 %v1090_v20  ;;  %v1193_v41 = vld [vmem:[#allocation2 + $0xec0] sm:$0xff] }
 0x16e   :  { %v3694_v1 = vsel %vm1412_vm8, %v1581_v0, %v3631_v19  ;;  %1732 = vmatpush.msra.mxu3 %v1193_v41  ;;  %v945_v20 = vld [vmem:[#allocation2 + $0x700] sm:$0xff] }
 0x16f   :  { %v1555_v22 = vsel %vm1420_vm10, %v1554_v15, %v3635_v16  ;;  %v833_v16 = vld [vmem:[#allocation2 + $0x380] sm:$0xff]  ;;  %1790 = vmatpush.msrb.mxu2 %v1082_v37 }
 0x170   :  { %1669 = vmatpush.msra.mxu0 %v833_v16  ;;  %1733 = vmatpush.msra.mxu3 %v1185_v44 }
 0x171   :  { %v286_v21 = vpop.xlane.xlu2 %285  ;;  %v244_v28 = vpop.xlane.xlu1 %243  ;;  %1791 = vmatpush.msrb.mxu2 %v1074_v30  ;;  %v1161_v30 = vld [vmem:[#allocation2 + $0xdc0] sm:$0xff] }
 0x172   :  { %v618_v26 = vmul.f32 0.03125, %v286_v21  ;;  %v604_v14 = vmul.f32 0.03125, %v244_v28  ;;  %v577_v38 = vpop.xlane.xlu0 %576  ;;  %1670 = vmatpush.msra.mxu0 %v825_v33  ;;  %v1018_v21 = vld [vmem:[#allocation2 + $0x948] sm:$0xff] }
 0x173   :  { %v715_v31 = vmul.f32 0.03125, %v577_v38  ;;  %1792 = vmatpush.msrb.mxu2 %v1066_v34  ;;  %v1177_v38 = vld [vmem:[#allocation2 + $0xe40] sm:$0xff] }
 0x174   :  { %v1459_v19 = vperm.slane %v618_v26, %v3463_v4  ;;  %v1423_v35 = vperm.slane %v604_v14, %v3589_v40  ;;  %1671 = vmatpush.msra.mxu0 %v817_v45  ;;  %v761_v26 = vld [vmem:[#allocation2 + $0x140] sm:$0xff]  ;;  %1734 = vmatpush.msra.mxu3 %v1177_v38  ;;  %v994_v45 = vld [vmem:[#allocation2 + $0x888] sm:$0xff] }
 0x175   :  { %v1647_v29 = vperm.slane %v715_v31, %v3544_v13  ;;  %1793 = vmatpush.msrb.mxu2 %v1058_v55  ;;  %v953_v14 = vld [vmem:[#allocation2 + $0x740] sm:$0xff]  ;;  %v1010_v31 = vld [vmem:[#allocation2 + $0x908] sm:$0xff] }
 0x176   :  { %v3702_v27 = vsel %vm1416_vm9, %v1459_v19, %v1458_v10  ;;  %v3706_v32 = vsel %vm1424_vm11, %v1423_v35, %v3655_v43  ;;  %v809_v43 = vld [vmem:[#allocation2 + $0x2c0] sm:$0xff]  ;;  %v1034_v10 = vld [vmem:[#allocation2 + $0x9c8] sm:$0xff] }
 0x177   :  { %v3710_v42 = vsel %vm1420_vm10, %v1647_v29, %v3659_v50  ;;  %1672 = vmatpush.msra.mxu0 %v809_v43  ;;  %1794 = vmatpush.msrb.mxu2 %v1050_v56  ;;  %v1169_v19 = vld [vmem:[#allocation2 + $0xe00] sm:$0xff]  ;;  %v1002_v35 = vld [vmem:[#allocation2 + $0x8c8] sm:$0xff] }
 0x178   :  { %1735 = vmatpush.msra.mxu3 %v1169_v19  ;;  %v921_v55 = vld [vmem:[#allocation2 + $0x640] sm:$0xff]  ;;  %v802_v38 = vld [vmem:[#allocation2 + $0x288] sm:$0xff] }
 0x179   :  { %v436_v47 = vpop.xlane.xlu2 %435  ;;  %v388_v25 = vpop.xlane.xlu1 %387  ;;  %1673 = vmatpush.msra.mxu0 %v801_v58  ;;  %1795 = vmatpush.msrb.mxu2 %v1042_v3  ;;  %v721_v58 = vld [vmem:[#allocation2] sm:$0xff] }
 0x17a   :  { %v668_v49 = vmul.f32 0.03125, %v436_v47  ;;  %v652_v53 = vmul.f32 0.03125, %v388_v25  ;;  %v3712_v39 = vpop.xlane.xlu0 %345  ;;  %1736 = vmatpush.msra.mxu3 %v1161_v30  ;;  %v737_v47 = vld [vmem:[#allocation2 + $0x80] sm:$0xff]  ;;  %v778_v30 = vld [vmem:[#allocation2 + $0x1c8] sm:$0xff] }
 0x17b   :  { %1674 = vmatpush.msra.mxu0 %v793_v60  ;;  %1796 = vmatpush.msrb.mxu2 %v1034_v10  ;;  %v929_v25 = vld [vmem:[#allocation2 + $0x680] sm:$0xff] }
 0x17c   :  { %v1556_v50 = vperm.slane %v668_v49, %v3589_v40  ;;  %v1525_v48 = vperm.slane %v652_v53, %v3589_v40  ;;  %v1153_v49 = vld [vmem:[#allocation2 + $0xd80] sm:$0xff]  ;;  %v986_v53 = vld [vmem:[#allocation2 + $0x848] sm:$0xff] }
 0x17d   :  { %1675 = vmatpush.msra.mxu0 %v785_v6  ;;  %1797 = vmatpush.msrb.mxu2 %v1026_v12  ;;  %v1137_v56 = vld [vmem:[#allocation2 + $0xd00] sm:$0xff] }
 0x17e   :  { %v3717_v52 = vsel %vm1424_vm11, %v1556_v50, %v1555_v22  ;;  %v3721_v62 = vsel %vm1424_vm11, %v1525_v48, %v3680_v61  ;;  %v777_v61 = vld [vmem:[#allocation2 + $0x1c0] sm:$0xff]  ;;  %1737 = vmatpush.msra.mxu3 %v1153_v49  ;;  %v978_v48 = vld [vmem:[#allocation2 + $0x808] sm:$0xff] }
 0x17f   :  { %1676 = vmatpush.msra.mxu0 %v777_v61  ;;  %v961_v22 = vld [vmem:[#allocation2 + $0x780] sm:$0xff]  ;;  %1798 = vmatpush.msrb.mxu2 %v1018_v21  ;;  %v1226_v21 = vld [vmem:[#allocation2 + $0xfc8] sm:$0xff] }
 0x180   :  { %1689 = vmatpush.msra.mxu1 %v961_v22  ;;  %v1145_v50 = vld [vmem:[#allocation2 + $0xd40] sm:$0xff]  ;;  %v770_v49 = vld [vmem:[#allocation2 + $0x188] sm:$0xff] }
 0x181   :  { %v580_v8 = vpop.xlane.xlu2 %579  ;;  %v3723_v5 = vpop.xlane.xlu1 %537  ;;  %1677 = vmatpush.msra.mxu0 %v769_v18  ;;  %1799 = vmatpush.msrb.mxu2 %v1010_v31  ;;  %v1129_v10 = vld [vmem:[#allocation2 + $0xcc0] sm:$0xff] }
 0x182   :  { %v716_v9 = vmul.f32 0.03125, %v580_v8  ;;  %v478_v11 = vpop.xlane.xlu0 %477  ;;  %1690 = vmatpush.msra.mxu1 %v953_v14  ;;  %1738 = vmatpush.msra.mxu3 %v1145_v50  ;;  %v834_v8 = vld [vmem:[#allocation2 + $0x388] sm:$0xff]  ;;  %v1121_v61 = vld [vmem:[#allocation2 + $0xc80] sm:$0xff]  ;;  %v638_v50 = vmul.f32 0.03125, %v3712_v39 }
 0x183   :  { %v682_v0 = vmul.f32 0.03125, %v478_v11  ;;  %1678 = vmatpush.msra.mxu0 %v761_v26  ;;  %1800 = vmatpush.msrb.mxu2 %v1002_v35  ;;  %v897_v11 = vld [vmem:[#allocation2 + $0x580] sm:$0xff]  ;;  %v786_v35 = vld [vmem:[#allocation2 + $0x208] sm:$0xff] }
 0x184   :  { %v1649_v15 = vperm.slane %v716_v9, %v3589_v40  ;;  %1691 = vmatpush.msra.mxu1 %v945_v20  ;;  %1739 = vmatpush.msra.mxu3 %v1137_v56  ;;  %v1113_v12 = vld [vmem:[#allocation2 + $0xc40] sm:$0xff]  ;;  %v1210_v20 = vld [vmem:[#allocation2 + $0xf48] sm:$0xff] }
 0x185   :  { %v1583_v23 = vperm.slane %v682_v0, %v3463_v4  ;;  %v753_v4 = vld [vmem:[#allocation2 + $0x100] sm:$0xff]  ;;  %1801 = vmatpush.msrb.mxu2 %v994_v45  ;;  %v970_v45 = vld [vmem:[#allocation2 + $0x7c8] sm:$0xff] }
 0x186   :  { %v3729_v28 = vsel %vm1424_vm11, %v1649_v15, %v3710_v42  ;;  %1679 = vmatpush.msra.mxu0 %v753_v4  ;;  %v937_v42 = vld [vmem:[#allocation2 + $0x6c0] sm:$0xff]  ;;  %1740 = vmatpush.msra.mxu3 %v1129_v10  ;;  %v818_v15 = vld [vmem:[#allocation2 + $0x308] sm:$0xff] }
 0x187   :  { %v3733_v24 = vsel %vm1416_vm9, %v1583_v23, %v3694_v1  ;;  %v745_v1 = vld [vmem:[#allocation2 + $0xc0] sm:$0xff]  ;;  %1692 = vmatpush.msra.mxu1 %v937_v42  ;;  %1802 = vmatpush.msrb.mxu2 %v986_v53  ;;  %v810_v23 = vld [vmem:[#allocation2 + $0x2c8] sm:$0xff] }
 0x188   :  { %1680 = vmatpush.msra.mxu0 %v745_v1  ;;  %1741 = vmatpush.msra.mxu3 %v1121_v61  ;;  %v889_v0 = vld [vmem:[#allocation2 + $0x540] sm:$0xff]  ;;  %v794_v4 = vld [vmem:[#allocation2 + $0x248] sm:$0xff] }
 0x189   :  { %v3735_v16 = vpop.xlane.xlu2 %348  ;;  %v289_v29 = vpop.xlane.xlu1 %288  ;;  %1693 = vmatpush.msra.mxu1 %v929_v25  ;;  %1803 = vmatpush.msrb.mxu2 %v978_v48  ;;  %v881_v18 = vld [vmem:[#allocation2 + $0x500] sm:$0xff]  ;;  %v701_v25 = vmul.f32 0.03125, %v3688_v63  ;;  %v962_v53 = vld [vmem:[#allocation2 + $0x788] sm:$0xff]  ;;  %v702_v48 = vmul.f32 0.03125, %v3723_v5 }
 0x18a   :  { %v619_v37 = vmul.f32 0.03125, %v289_v29  ;;  %v3737_v33 = vpop.xlane.xlu0 %246  ;;  %1681 = vmatpush.msra.mxu0 %v737_v47  ;;  %v1105_v22 = vld [vmem:[#allocation2 + $0xc00] sm:$0xff]  ;;  %1742 = vmatpush.msra.mxu3 %v1113_v12  ;;  %v1202_v29 = vld [vmem:[#allocation2 + $0xf08] sm:$0xff] }
 0x18b   :  { %1694 = vmatpush.msra.mxu1 %v921_v55  ;;  %v873_v14 = vld [vmem:[#allocation2 + $0x4c0] sm:$0xff]  ;;  %v3763_v55 = vadd.s32 4294967192, %v3033_v36  ;;  %v762_v63 = vld [vmem:[#allocation2 + $0x148] sm:$0xff]  ;;  %v1620_v39 = vperm.slane %v701_v25, %v3666_v54 }
 0x18c   :  { %v1461_v34 = vperm.slane %v619_v37, %v3544_v13  ;;  %1682 = vmatpush.msra.mxu0 %v729_v51  ;;  %1743 = vmatpush.msra.mxu3 %v1105_v22  ;;  %v865_v31 = vld [vmem:[#allocation2 + $0x480] sm:$0xff]  ;;  %v1186_v51 = vld [vmem:[#allocation2 + $0xe88] sm:$0xff] }
 0x18d   :  { %1695 = vmatpush.msra.mxu1 %v913_v59  ;;  %v857_v19 = vld [vmem:[#allocation2 + $0x440] sm:$0xff]  ;;  %v639_v59 = vmul.f32 0.03125, %v3735_v16  ;;  %v754_v5 = vld [vmem:[#allocation2 + $0x108] sm:$0xff]  ;;  %v1622_v16 = vperm.slane %v702_v48, %v3763_v55 }
 0x18e   :  { %v3742_v43 = vsel %vm1420_vm10, %v1461_v34, %v3702_v27  ;;  %1683 = vmatpush.msra.mxu0 %v721_v58  ;;  %v842_v27 = vld [vmem:[#allocation2 + $0x3c8] sm:$0xff]  ;;  %1808 = vmatpush.msrb.mxu3 %v1226_v21  ;;  %v849_v37 = vld [vmem:[#allocation2 + $0x400] sm:$0xff]  ;;  %v3768_v58 = vadd.s32 4294967184, %v3033_v36  ;;  %v1621_v21 = vsel %vm1428_vm12, %v1620_v39, %v3663_v46 }
 0x18f   :  { %1696 = vmatpush.msra.mxu1 %v905_v7  ;;  %v1194_v34 = vld [vmem:[#allocation2 + $0xec8] sm:$0xff] }
 0x190   :  { %1748 = vmatpush.msrb.mxu0 %v842_v27  ;;  %v1178_v27 = vld [vmem:[#allocation2 + $0xe48] sm:$0xff] }
 0x191   :  { %v481_v60 = vpop.xlane.xlu2 %480  ;;  %v3744_v57 = vpop.xlane.xlu1 %438  ;;  %1697 = vmatpush.msra.mxu1 %v897_v11  ;;  %v946_v10 = vld [vmem:[#allocation2 + $0x708] sm:$0xff]  ;;  %v1500_v11 = vperm.slane %v639_v59, %v3768_v58 }
 0x192   :  { %v683_v3 = vmul.f32 0.03125, %v481_v60  ;;  %v3746_v6 = vpop.xlane.xlu0 %390  ;;  %1749 = vmatpush.msrb.mxu0 %v834_v8  ;;  %v954_v60 = vld [vmem:[#allocation2 + $0x748] sm:$0xff] }
 0x193   :  { %1698 = vmatpush.msra.mxu1 %v889_v0  ;;  %v1170_v8 = vld [vmem:[#allocation2 + $0xe08] sm:$0xff] }
 0x194   :  { %v1585_v9 = vperm.slane %v683_v3, %v3544_v13  ;;  %1750 = vmatpush.msrb.mxu0 %v826_v17  ;;  %v3772_v3 = vadd.s32 4294967176, %v3033_v36  ;;  %v746_v0 = vld [vmem:[#allocation2 + $0xc8] sm:$0xff] }
 0x195   :  { %1699 = vmatpush.msra.mxu1 %v881_v18  ;;  %v938_v12 = vld [vmem:[#allocation2 + $0x6c8] sm:$0xff] }
 0x196   :  { %v3751_v41 = vsel %vm1420_vm10, %v1585_v9, %v3733_v24  ;;  %1751 = vmatpush.msrb.mxu0 %v818_v15  ;;  %v1218_v24 = vld [vmem:[#allocation2 + $0xf88] sm:$0xff]  ;;  %v1498_v9 = vperm.slane %v638_v50, %v3763_v55 }
 0x197   :  { %1700 = vmatpush.msra.mxu1 %v873_v14  ;;  %1809 = vmatpush.msrb.mxu3 %v1218_v24  ;;  %v1162_v15 = vld [vmem:[#allocation2 + $0xdc8] sm:$0xff] }
 0x198   :  { %1752 = vmatpush.msrb.mxu0 %v810_v23  ;;  %v930_v14 = vld [vmem:[#allocation2 + $0x688] sm:$0xff]  ;;  %v1499_v24 = vsel %vm1432_vm13, %v1498_v9, %v3684_v2  ;;  %v1099_v2 = vld [vmem:[#allocation2 + $0xbd0] sm:$0xff] }
 0x199   :  { %v3753_v13 = vpop.xlane.xlu2 %249  ;;  %v3755_v44 = vpop.xlane.xlu1 %582  ;;  %1701 = vmatpush.msra.mxu1 %v865_v31  ;;  %1810 = vmatpush.msrb.mxu3 %v1210_v20  ;;  %v1623_v31 = vsel %vm1432_vm13, %v1622_v16, %v1621_v21  ;;  %v1501_v20 = vsel %vm1436_vm14, %v1500_v11, %v1499_v24  ;;  %v730_v46 = vld [vmem:[#allocation2 + $0x48] sm:$0xff]  ;;  %v1027_v21 = vld [vmem:[#allocation2 + $0x990] sm:$0xff] }
 0x19a   :  { %v541_v26 = vpop.xlane.xlu0 %540  ;;  %1753 = vmatpush.msrb.mxu0 %v802_v38  ;;  %v1154_v38 = vld [vmem:[#allocation2 + $0xd88] sm:$0xff] }
 0x19b   :  { %1702 = vmatpush.msra.mxu1 %v857_v19  ;;  %1811 = vmatpush.msrb.mxu3 %v1202_v29  ;;  %v703_v56 = vmul.f32 0.03125, %v541_v26  ;;  %v738_v26 = vld [vmem:[#allocation2 + $0x88] sm:$0xff] }
 0x19c   :  { %1754 = vmatpush.msrb.mxu0 %v794_v4  ;;  %v1146_v29 = vld [vmem:[#allocation2 + $0xd48] sm:$0xff] }
 0x19d   :  { %1703 = vmatpush.msra.mxu1 %v849_v37  ;;  %1812 = vmatpush.msrb.mxu3 %v1194_v34  ;;  %v1624_v36 = vperm.slane %v703_v56, %v3768_v58  ;;  %v914_v34 = vld [vmem:[#allocation2 + $0x608] sm:$0xff]  ;;  %v1083_v56 = vld [vmem:[#allocation2 + $0xb50] sm:$0xff] }
 0x19e   :  { %1755 = vmatpush.msrb.mxu0 %v786_v35  ;;  %v922_v35 = vld [vmem:[#allocation2 + $0x648] sm:$0xff] }
 0x19f   :  { %1768 = vmatpush.msrb.mxu1 %v970_v45  ;;  %1813 = vmatpush.msrb.mxu3 %v1186_v51  ;;  %v1625_v19 = vsel %vm1436_vm14, %v1624_v36, %v1623_v31  ;;  %v722_v45 = vld [vmem:[#allocation2 + $0x8] sm:$0xff]  ;;  %v1019_v31 = vld [vmem:[#allocation2 + $0x950] sm:$0xff] }
 0x1a0   :  { %1756 = vmatpush.msrb.mxu0 %v778_v30  ;;  %v1138_v25 = vld [vmem:[#allocation2 + $0xd08] sm:$0xff] }
 0x1a1   :  { %v3757_v1 = vpop.xlane.xlu2 %393  ;;  %v352_v42 = vpop.xlane.xlu1 %351  ;;  %1769 = vmatpush.msrb.mxu1 %v962_v53  ;;  %1814 = vmatpush.msrb.mxu3 %v1178_v27  ;;  %v906_v50 = vld [vmem:[#allocation2 + $0x5c8] sm:$0xff] }
 0x1a2   :  { %v3759_v47 = vpop.xlane.xlu0 %291  ;;  %1757 = vmatpush.msrb.mxu0 %v770_v49  ;;  %v640_v7 = vmul.f32 0.03125, %v352_v42  ;;  %v1091_v49 = vld [vmem:[#allocation2 + $0xb90] sm:$0xff]  ;;  %v1130_v48 = vld [vmem:[#allocation2 + $0xcc8] sm:$0xff] }
 0x1a3   :  { %1770 = vmatpush.msrb.mxu1 %v954_v60  ;;  %1815 = vmatpush.msrb.mxu3 %v1170_v8  ;;  %v898_v60 = vld [vmem:[#allocation2 + $0x588] sm:$0xff] }
 0x1a4   :  { %1758 = vmatpush.msrb.mxu0 %v762_v63  ;;  %v1502_v18 = vperm.slane %v640_v7, %v3772_v3  ;;  %v1075_v63 = vld [vmem:[#allocation2 + $0xb10] sm:$0xff]  ;;  %v1122_v27 = vld [vmem:[#allocation2 + $0xc88] sm:$0xff] }
 0x1a5   :  { %1771 = vmatpush.msrb.mxu1 %v946_v10  ;;  %1816 = vmatpush.msrb.mxu3 %v1162_v15  ;;  %v1067_v7 = vld [vmem:[#allocation2 + $0xad0] sm:$0xff]  ;;  %v890_v39 = vld [vmem:[#allocation2 + $0x548] sm:$0xff] }
 0x1a6   :  { %1759 = vmatpush.msrb.mxu0 %v754_v5  ;;  %v1503_v37 = vsel %vm1440_vm15, %v1502_v18, %v1501_v20  ;;  %v1114_v5 = vld [vmem:[#allocation2 + $0xc48] sm:$0xff]  ;;  %v1059_v10 = vld [vmem:[#allocation2 + $0xa90] sm:$0xff]  ;;  %v669_v20 = vmul.f32 0.03125, %v3744_v57 }
 0x1a7   :  { %1772 = vmatpush.msrb.mxu1 %v938_v12  ;;  %1817 = vmatpush.msrb.mxu3 %v1154_v38  ;;  %v882_v8 = vld [vmem:[#allocation2 + $0x508] sm:$0xff]  ;;  %v1043_v12 = vld [vmem:[#allocation2 + $0xa10] sm:$0xff] }
 0x1a8   :  { %1760 = vmatpush.msrb.mxu0 %v746_v0  ;;  %v1106_v9 = vld [vmem:[#allocation2 + $0xc08] sm:$0xff]  ;;  %v1035_v18 = vld [vmem:[#allocation2 + $0x9d0] sm:$0xff] }
 0x1a9   :  { %v544_v61 = vpop.xlane.xlu2 %543  ;;  %v3779_v17 = vpop.xlane.xlu1 %483  ;;  %1773 = vmatpush.msrb.mxu1 %v930_v14  ;;  %1818 = vmatpush.msrb.mxu3 %v1146_v29  ;;  %v874_v0 = vld [vmem:[#allocation2 + $0x4c8] sm:$0xff] }
 0x1aa   :  { %v704_v22 = vmul.f32 0.03125, %v544_v61  ;;  %v3782_v23 = vpop.xlane.xlu0 %441  ;;  %1761 = vmatpush.msrb.mxu0 %v738_v26  ;;  %v1051_v61 = vld [vmem:[#allocation2 + $0xa50] sm:$0xff]  ;;  %v866_v15 = vld [vmem:[#allocation2 + $0x488] sm:$0xff] }
 0x1ab   :  { %1774 = vmatpush.msrb.mxu1 %v922_v35  ;;  %1819 = vmatpush.msrb.mxu3 %v1138_v25  ;;  %v850_v26 = vld [vmem:[#allocation2 + $0x408] sm:$0xff]  ;;  %v1011_v35 = vld [vmem:[#allocation2 + $0x910] sm:$0xff] }
 0x1ac   :  { %v1626_v4 = vperm.slane %v704_v22, %v3772_v3  ;;  %1762 = vmatpush.msrb.mxu0 %v730_v46  ;;  %v858_v22 = vld [vmem:[#allocation2 + $0x448] sm:$0xff]  ;;  %v670_v46 = vmul.f32 0.03125, %v3782_v23  ;;  %v995_v25 = vld [vmem:[#allocation2 + $0x890] sm:$0xff] }
 0x1ad   :  { %1775 = vmatpush.msrb.mxu1 %v914_v34  ;;  %1820 = vmatpush.msrb.mxu3 %v1130_v48  ;;  %v1558_v34 = vperm.slane %v669_v20, %v3666_v54 }
 0x1ae   :  { %v1627_v42 = vsel %vm1440_vm15, %v1626_v4, %v1625_v19  ;;  %1763 = vmatpush.msrb.mxu0 %v722_v45  ;;  %v605_v4 = vmul.f32 0.03125, %v3737_v33  ;;  %v606_v19 = vmul.f32 0.03125, %v3753_v13  ;;  %v1560_v57 = vperm.slane %v670_v46, %v3763_v55 }
 0x1af   :  { %v3795_v30 = vsel %vm1659_vm0, %v1627_v42, %v1503_v37  ;;  %1776 = vmatpush.msrb.mxu1 %v906_v50  ;;  %1821 = vmatpush.msrb.mxu3 %v1122_v27  ;;  %v653_v13 = vmul.f32 0.03125, %v3746_v6  ;;  %v717_v6 = vmul.f32 0.03125, %v3755_v44 }
 0x1b0   :  { %1724 = vmatmul.f32.vlgmr.msra.gmra.mxu2 %v3795_v30  ;;  %v1427_v45 = vperm.slane %v605_v4, %v3666_v54  ;;  %v1431_v33 = vperm.slane %v606_v19, %v3763_v55  ;;  %v684_v19 = vmul.f32 0.03125, %v3779_v17 }
 0x1b1   :  { %1868 = vmatpush.msra.mxu2 %v1099_v2  ;;  %v3798_v53 = vpop.xlane.xlu2 %294  ;;  %v253_v51 = vpop.xlane.xlu1 %252  ;;  %1777 = vmatpush.msrb.mxu1 %v898_v60  ;;  %v1003_v2 = vld [vmem:[#allocation2 + $0x8d0] sm:$0xff] }
 0x1b2   :  { %v3800_v59 = vpop.xlane.xlu0 %585  ;;  %1822 = vmatpush.msrb.mxu3 %v1114_v5  ;;  %v607_v29 = vmul.f32 0.03125, %v253_v51  ;;  %v987_v60 = vld [vmem:[#allocation2 + $0x850] sm:$0xff]  ;;  %v1429_v27 = vsel %vm1428_vm12, %v1427_v45, %v3706_v32  ;;  %v654_v5 = vmul.f32 0.03125, %v3757_v1 }
 0x1b3   :  { %1869 = vmatpush.msra.mxu2 %v1091_v49  ;;  %1778 = vmatpush.msrb.mxu1 %v890_v39  ;;  %v1433_v39 = vsel %vm1432_vm13, %v1431_v33, %v1429_v27  ;;  %v718_v32 = vmul.f32 0.03125, %v3800_v59 }
 0x1b4   :  { %1823 = vmatpush.msrb.mxu3 %v1106_v9  ;;  %v1435_v23 = vperm.slane %v607_v29, %v3768_v58  ;;  %v979_v9 = vld [vmem:[#allocation2 + $0x810] sm:$0xff]  ;;  %v1529_v59 = vperm.slane %v654_v5, %v3763_v55 }
 0x1b5   :  { %1870 = vmatpush.msra.mxu2 %v1083_v56  ;;  %1779 = vmatpush.msrb.mxu1 %v882_v8 }
 0x1b7   :  { %1871 = vmatpush.msra.mxu2 %v1075_v63  ;;  %1780 = vmatpush.msrb.mxu1 %v874_v0 }
 0x1b8   :  { %1804 = vmatmul.f32.vlgmr.msrb.gmra.mxu2 %v3795_v30 }
 0x1b9   :  { %1872 = vmatpush.msra.mxu2 %v1067_v7  ;;  %v3803_v16 = vpop.xlane.xlu2 %486  ;;  %v445_v11 = vpop.xlane.xlu1 %444  ;;  %1781 = vmatpush.msrb.mxu1 %v866_v15  ;;  %v1559_v7 = vsel %vm1428_vm12, %v1558_v34, %v3717_v52  ;;  %v1100_v15 = vld [vmem:[#allocation2 + $0xbd8] sm:$0xff] }
 0x1ba   :  { %v3805_v36 = vpop.xlane.xlu0 %396  ;;  %v671_v37 = vmul.f32 0.03125, %v445_v11  ;;  %v1527_v11 = vperm.slane %v653_v13, %v3666_v54  ;;  %v685_v45 = vmul.f32 0.03125, %v3803_v16  ;;  %v1076_v13 = vld [vmem:[#allocation2 + $0xb18] sm:$0xff] }
 0x1bb   :  { %1873 = vmatpush.msra.mxu2 %v1059_v10  ;;  %1782 = vmatpush.msrb.mxu1 %v858_v22  ;;  %v1561_v10 = vsel %vm1432_vm13, %v1560_v57, %v1559_v7  ;;  %v655_v44 = vmul.f32 0.03125, %v3805_v36  ;;  %v1651_v22 = vperm.slane %v717_v6, %v3666_v54  ;;  %v1092_v36 = vld [vmem:[#allocation2 + $0xb98] sm:$0xff]  ;;  %v621_v57 = vmul.f32 0.03125, %v3798_v53  ;;  %v1227_v6 = vld [vmem:[#allocation2 + $0xfd0] sm:$0xff] }
 0x1bc   :  { %v1562_v49 = vperm.slane %v671_v37, %v3768_v58  ;;  %v1528_v20 = vsel %vm1428_vm12, %v1527_v11, %v3721_v62  ;;  %v1084_v37 = vld [vmem:[#allocation2 + $0xb58] sm:$0xff] }
 0x1bd   :  { %1874 = vmatpush.msra.mxu2 %v1051_v61  ;;  %1783 = vmatpush.msrb.mxu1 %v850_v26  ;;  %v1437_v61 = vsel %vm1436_vm14, %v1435_v23, %v1433_v39  ;;  %v1531_v46 = vperm.slane %v655_v44, %v3768_v58  ;;  %v1530_v62 = vsel %vm1432_vm13, %v1529_v59, %v1528_v20  ;;  %v819_v23 = vld [vmem:[#allocation2 + $0x310] sm:$0xff]  ;;  %v1068_v53 = vld [vmem:[#allocation2 + $0xad8] sm:$0xff] }
 0x1be   :  { %v1563_v52 = vsel %vm1436_vm14, %v1562_v49, %v1561_v10  ;;  %v1465_v39 = vperm.slane %v621_v57, %v3666_v54  ;;  %v1060_v10 = vld [vmem:[#allocation2 + $0xa98] sm:$0xff] }
 0x1bf   :  { %1875 = vmatpush.msra.mxu2 %v1043_v12  ;;  %v1044_v59 = vld [vmem:[#allocation2 + $0xa18] sm:$0xff] }
 0x1c0   :  { %v1012_v57 = vld [vmem:[#allocation2 + $0x918] sm:$0xff] }
 0x1c1   :  { %1876 = vmatpush.msra.mxu2 %v1035_v18  ;;  %v3807_v14 = vpop.xlane.xlu2 %297  ;;  %v256_v38 = vpop.xlane.xlu1 %255  ;;  %v843_v18 = vld [vmem:[#allocation2 + $0x3d0] sm:$0xff] }
 0x1c2   :  { %v589_v24 = vpop.xlane.xlu0 %588  ;;  %v608_v42 = vmul.f32 0.03125, %v256_v38  ;;  %v3843_v38 = vmul.f32 0.03125, %v3759_v47 }
 0x1c3   :  { %1877 = vmatpush.msra.mxu2 %v1027_v21  ;;  %v719_v12 = vmul.f32 0.03125, %v589_v24  ;;  %v835_v24 = vld [vmem:[#allocation2 + $0x390] sm:$0xff] }
 0x1c4   :  { %v1439_v48 = vperm.slane %v608_v42, %v3772_v3  ;;  %v827_v42 = vld [vmem:[#allocation2 + $0x350] sm:$0xff]  ;;  %v1463_v17 = vperm.slane %v3843_v38, %v3589_v40 }
 0x1c5   :  { %1878 = vmatpush.msra.mxu2 %v1019_v31  ;;  %v1653_v31 = vperm.slane %v718_v32, %v3763_v55  ;;  %v1655_v47 = vperm.slane %v719_v12, %v3768_v58  ;;  %v1219_v32 = vld [vmem:[#allocation2 + $0xf90] sm:$0xff]  ;;  %v1052_v12 = vld [vmem:[#allocation2 + $0xa58] sm:$0xff] }
 0x1c6   :  { %v1441_v0 = vsel %vm1440_vm15, %v1439_v48, %v1437_v61  ;;  %v1587_v48 = vperm.slane %v684_v19, %v3589_v40  ;;  %v803_v61 = vld [vmem:[#allocation2 + $0x290] sm:$0xff]  ;;  %v1036_v19 = vld [vmem:[#allocation2 + $0x9d8] sm:$0xff] }
 0x1c7   :  { %1879 = vmatpush.msra.mxu2 %v1011_v35 }
 0x1c9   :  { %1880 = vmatpush.msra.mxu2 %v1003_v2  ;;  %v490_v51 = vpop.xlane.xlu2 %489  ;;  %v448_v50 = vpop.xlane.xlu1 %447  ;;  %v1652_v2 = vsel %vm1428_vm12, %v1651_v22, %v3729_v28  ;;  %v622_v28 = vmul.f32 0.03125, %v3807_v14  ;;  %v811_v14 = vld [vmem:[#allocation2 + $0x2d0] sm:$0xff] }
 0x1ca   :  { %v672_v56 = vmul.f32 0.03125, %v448_v50  ;;  %v400_v63 = vpop.xlane.xlu0 %399  ;;  %v1654_v49 = vsel %vm1432_vm13, %v1653_v31, %v1652_v2  ;;  %v1211_v22 = vld [vmem:[#allocation2 + $0xf50] sm:$0xff] }
 0x1cb   :  { %1881 = vmatpush.msra.mxu2 %v995_v25  ;;  %v656_v26 = vmul.f32 0.03125, %v400_v63  ;;  %v686_v25 = vmul.f32 0.03125, %v490_v51  ;;  %v1656_v63 = vsel %vm1436_vm14, %v1655_v47, %v1654_v49  ;;  %v1589_v51 = vperm.slane %v685_v45, %v3666_v54  ;;  %v1203_v31 = vld [vmem:[#allocation2 + $0xf10] sm:$0xff]  ;;  %v1004_v49 = vld [vmem:[#allocation2 + $0x8d8] sm:$0xff] }
 0x1cc   :  { %v1564_v8 = vperm.slane %v672_v56, %v3772_v3  ;;  %v1532_v56 = vsel %vm1436_vm14, %v1531_v46, %v1530_v62  ;;  %v1588_v54 = vsel %vm1424_vm11, %v1587_v48, %v3751_v41  ;;  %v779_v47 = vld [vmem:[#allocation2 + $0x1d0] sm:$0xff]  ;;  %v996_v48 = vld [vmem:[#allocation2 + $0x898] sm:$0xff] }
 0x1cd   :  { %1882 = vmatpush.msra.mxu2 %v987_v60  ;;  %v1533_v34 = vperm.slane %v656_v26, %v3772_v3  ;;  %v1591_v40 = vperm.slane %v686_v25, %v3763_v55  ;;  %v963_v2 = vld [vmem:[#allocation2 + $0x790] sm:$0xff] }
 0x1ce   :  { %v1565_v1 = vsel %vm1440_vm15, %v1564_v8, %v1563_v52  ;;  %v1467_v8 = vperm.slane %v622_v28, %v3763_v55  ;;  %v1464_v55 = vsel %vm1424_vm11, %v1463_v17, %v3742_v43  ;;  %v1187_v45 = vld [vmem:[#allocation2 + $0xe90] sm:$0xff] }
 0x1cf   :  { %v3839_v21 = vsel %vm1659_vm0, %v1565_v1, %v1441_v0  ;;  %1883 = vmatpush.msra.mxu2 %v979_v9  ;;  %v1534_v27 = vsel %vm1440_vm15, %v1533_v34, %v1532_v56  ;;  %v1590_v1 = vsel %vm1428_vm12, %v1589_v51, %v1588_v54  ;;  %v1466_v26 = vsel %vm1428_vm12, %v1465_v39, %v1464_v55  ;;  %v1020_v34 = vld [vmem:[#allocation2 + $0x958] sm:$0xff]  ;;  %v955_v62 = vld [vmem:[#allocation2 + $0x750] sm:$0xff] }
 0x1d0   :  { %1884 = vmatmul.f32.vlgmr.msra.gmra.mxu2 %v3795_v30  ;;  %1684 = vmatmul.f32.vlgmr.msra.gmra.mxu0 %v3839_v21  ;;  %v1592_v41 = vsel %vm1432_vm13, %v1591_v40, %v1590_v1  ;;  %v1468_v38 = vsel %vm1432_vm13, %v1467_v8, %v1466_v26  ;;  %v1179_v17 = vld [vmem:[#allocation2 + $0xe50] sm:$0xff]  ;;  %v844_v8 = vld [vmem:[#allocation2 + $0x3d8] sm:$0xff]  ;;  %v1077_v1 = vld [vmem:[#allocation2 + $0xb20] sm:$0xff] }
 0x1d1   :  { %1948 = vmatpush.msrb.mxu2 %v1100_v15  ;;  %1828 = vmatpush.msra.mxu0 %v843_v18  ;;  %v301_v4 = vpop.xlane.xlu1 %300  ;;  %v493_v35 = vpop.xlane.xlu2 %492  ;;  %v795_v18 = vld [vmem:[#allocation2 + $0x250] sm:$0xff]  ;;  %v1069_v26 = vld [vmem:[#allocation2 + $0xae0] sm:$0xff] }
 0x1d2   :  { %v592_v29 = vpop.xlane.xlu0 %591  ;;  %v687_v16 = vmul.f32 0.03125, %v493_v35  ;;  %v623_v60 = vmul.f32 0.03125, %v301_v4  ;;  %v755_v25 = vld [vmem:[#allocation2 + $0x110] sm:$0xff] }
 0x1d3   :  { %1949 = vmatpush.msrb.mxu2 %v1092_v36  ;;  %v720_v33 = vmul.f32 0.03125, %v592_v29  ;;  %1829 = vmatpush.msra.mxu0 %v835_v24  ;;  %v787_v24 = vld [vmem:[#allocation2 + $0x210] sm:$0xff] }
 0x1d4   :  { %v1593_v9 = vperm.slane %v687_v16, %v3768_v58  ;;  %v1469_v52 = vperm.slane %v623_v60, %v3768_v58  ;;  %v1195_v29 = vld [vmem:[#allocation2 + $0xed0] sm:$0xff] }
 0x1d5   :  { %v1657_v50 = vperm.slane %v720_v33, %v3772_v3  ;;  %1950 = vmatpush.msrb.mxu2 %v1084_v37  ;;  %1830 = vmatpush.msra.mxu0 %v827_v42  ;;  %v1028_v37 = vld [vmem:[#allocation2 + $0x998] sm:$0xff]  ;;  %v771_v42 = vld [vmem:[#allocation2 + $0x190] sm:$0xff] }
 0x1d6   :  { %v1594_v36 = vsel %vm1436_vm14, %v1593_v9, %v1592_v41  ;;  %v1470_v4 = vsel %vm1436_vm14, %v1469_v52, %v1468_v38  ;;  %v763_v33 = vld [vmem:[#allocation2 + $0x150] sm:$0xff]  ;;  %v812_v41 = vld [vmem:[#allocation2 + $0x2d8] sm:$0xff]  ;;  %v1061_v38 = vld [vmem:[#allocation2 + $0xaa0] sm:$0xff] }
 0x1d7   :  { %v1658_v7 = vsel %vm1440_vm15, %v1657_v50, %v1656_v63  ;;  %1951 = vmatpush.msrb.mxu2 %v1076_v13  ;;  %1831 = vmatpush.msra.mxu0 %v819_v23  ;;  %v947_v13 = vld [vmem:[#allocation2 + $0x710] sm:$0xff] }
 0x1d8   :  { %v3873_v5 = vsel %vm1659_vm0, %v1658_v7, %v1534_v27  ;;  %1764 = vmatmul.f32.vlgmr.msrb.gmra.mxu0 %v3839_v21  ;;  %v1171_v23 = vld [vmem:[#allocation2 + $0xe10] sm:$0xff] }
 0x1d9   :  { %1952 = vmatpush.msrb.mxu2 %v1068_v53  ;;  %1744 = vmatmul.f32.vlgmr.msra.gmra.mxu3 %v3873_v5  ;;  %v496_v11 = vpop.xlane.xlu1 %495  ;;  %v747_v28 = vld [vmem:[#allocation2 + $0xd0] sm:$0xff]  ;;  %v988_v53 = vld [vmem:[#allocation2 + $0x858] sm:$0xff] }
 0x1da   :  { %1832 = vmatpush.msra.mxu0 %v811_v14  ;;  %1888 = vmatpush.msra.mxu3 %v1227_v6  ;;  %v688_v44 = vmul.f32 0.03125, %v496_v11  ;;  %v304_v0 = vpop.xlane.xlu0 %303  ;;  %v939_v16 = vld [vmem:[#allocation2 + $0x6d0] sm:$0xff]  ;;  %v980_v14 = vld [vmem:[#allocation2 + $0x818] sm:$0xff] }
 0x1db   :  { %1953 = vmatpush.msrb.mxu2 %v1060_v10  ;;  %v624_v15 = vmul.f32 0.03125, %v304_v0  ;;  %v1163_v50 = vld [vmem:[#allocation2 + $0xdd0] sm:$0xff]  ;;  %v1101_v10 = vld [vmem:[#allocation2 + $0xbe0] sm:$0xff]  ;;  %v828_v0 = vld [vmem:[#allocation2 + $0x358] sm:$0xff] }
 0x1dc   :  { %v1595_v58 = vperm.slane %v688_v44, %v3772_v3  ;;  %1833 = vmatpush.msra.mxu0 %v803_v61  ;;  %1889 = vmatpush.msra.mxu3 %v1219_v32  ;;  %v739_v56 = vld [vmem:[#allocation2 + $0x90] sm:$0xff]  ;;  %v1093_v61 = vld [vmem:[#allocation2 + $0xba0] sm:$0xff]  ;;  %v836_v32 = vld [vmem:[#allocation2 + $0x398] sm:$0xff] }
 0x1dd   :  { %v1471_v43 = vperm.slane %v624_v15, %v3772_v3  ;;  %1954 = vmatpush.msrb.mxu2 %v1052_v12  ;;  %v971_v3 = vld [vmem:[#allocation2 + $0x7d0] sm:$0xff]  ;;  %v1085_v44 = vld [vmem:[#allocation2 + $0xb60] sm:$0xff]  ;;  %v820_v15 = vld [vmem:[#allocation2 + $0x318] sm:$0xff] }
 0x1de   :  { %v1596_v20 = vsel %vm1440_vm15, %v1595_v58, %v1594_v36  ;;  %1834 = vmatpush.msra.mxu0 %v795_v18  ;;  %1890 = vmatpush.msra.mxu3 %v1211_v22  ;;  %v931_v63 = vld [vmem:[#allocation2 + $0x690] sm:$0xff]  ;;  %v1228_v58 = vld [vmem:[#allocation2 + $0xfd8] sm:$0xff] }
 0x1df   :  { %v1472_v46 = vsel %vm1440_vm15, %v1471_v43, %v1470_v4  ;;  %1955 = vmatpush.msrb.mxu2 %v1044_v59  ;;  %v1155_v60 = vld [vmem:[#allocation2 + $0xd90] sm:$0xff]  ;;  %v804_v36 = vld [vmem:[#allocation2 + $0x298] sm:$0xff] }
 0x1e0   :  { %v3895_v35 = vsel %vm1659_vm0, %v1596_v20, %v1472_v46  ;;  %1835 = vmatpush.msra.mxu0 %v787_v24  ;;  %1891 = vmatpush.msra.mxu3 %v1203_v31  ;;  %v731_v51 = vld [vmem:[#allocation2 + $0x50] sm:$0xff]  ;;  %v1220_v43 = vld [vmem:[#allocation2 + $0xf98] sm:$0xff]  ;;  %v1053_v31 = vld [vmem:[#allocation2 + $0xa60] sm:$0xff] }
 0x1e1   :  { %1956 = vmatpush.msrb.mxu2 %v1036_v19  ;;  %1704 = vmatmul.f32.vlgmr.msra.gmra.mxu1 %v3895_v35  ;;  %v923_v27 = vld [vmem:[#allocation2 + $0x650] sm:$0xff]  ;;  %v796_v4 = vld [vmem:[#allocation2 + $0x258] sm:$0xff]  ;;  %v1045_v46 = vld [vmem:[#allocation2 + $0xa20] sm:$0xff] }
 0x1e2   :  { %1824 = vmatmul.f32.vlgmr.msrb.gmra.mxu3 %v3873_v5  ;;  %1836 = vmatpush.msra.mxu0 %v779_v47  ;;  %v1147_v7 = vld [vmem:[#allocation2 + $0xd50] sm:$0xff]  ;;  %v1212_v20 = vld [vmem:[#allocation2 + $0xf58] sm:$0xff] }
 0x1e3   :  { %1848 = vmatpush.msra.mxu1 %v971_v3  ;;  %1892 = vmatpush.msra.mxu3 %v1195_v29  ;;  %v723_v6 = vld [vmem:[#allocation2 + $0x10] sm:$0xff]  ;;  %v788_v47 = vld [vmem:[#allocation2 + $0x218] sm:$0xff] }
 0x1e4   :  { %1957 = vmatpush.msrb.mxu2 %v1028_v37  ;;  %1837 = vmatpush.msra.mxu0 %v771_v42  ;;  %v915_v39 = vld [vmem:[#allocation2 + $0x610] sm:$0xff]  ;;  %v1204_v3 = vld [vmem:[#allocation2 + $0xf18] sm:$0xff]  ;;  %v1037_v37 = vld [vmem:[#allocation2 + $0x9e0] sm:$0xff] }
 0x1e5   :  { %1849 = vmatpush.msra.mxu1 %v963_v2  ;;  %1893 = vmatpush.msra.mxu3 %v1187_v45  ;;  %v1139_v40 = vld [vmem:[#allocation2 + $0xd10] sm:$0xff]  ;;  %v780_v42 = vld [vmem:[#allocation2 + $0x1d8] sm:$0xff] }
 0x1e6   :  { %1958 = vmatpush.msrb.mxu2 %v1020_v34  ;;  %1838 = vmatpush.msra.mxu0 %v763_v33  ;;  %v907_v9 = vld [vmem:[#allocation2 + $0x5d0] sm:$0xff]  ;;  %v972_v2 = vld [vmem:[#allocation2 + $0x7d8] sm:$0xff]  ;;  %v1029_v34 = vld [vmem:[#allocation2 + $0x9a0] sm:$0xff] }
 0x1e7   :  { %1850 = vmatpush.msra.mxu1 %v955_v62  ;;  %1894 = vmatpush.msra.mxu3 %v1179_v17  ;;  %v1131_v11 = vld [vmem:[#allocation2 + $0xcd0] sm:$0xff]  ;;  %v1196_v45 = vld [vmem:[#allocation2 + $0xed8] sm:$0xff] }
 0x1e8   :  { %1959 = vmatpush.msrb.mxu2 %v1012_v57  ;;  %1839 = vmatpush.msra.mxu0 %v755_v25  ;;  %v899_v54 = vld [vmem:[#allocation2 + $0x590] sm:$0xff]  ;;  %v772_v33 = vld [vmem:[#allocation2 + $0x198] sm:$0xff]  ;;  %v1021_v57 = vld [vmem:[#allocation2 + $0x960] sm:$0xff] }
 0x1e9   :  { %1851 = vmatpush.msra.mxu1 %v947_v13  ;;  %1895 = vmatpush.msra.mxu3 %v1171_v23  ;;  %v1123_v52 = vld [vmem:[#allocation2 + $0xc90] sm:$0xff]  ;;  %v964_v62 = vld [vmem:[#allocation2 + $0x798] sm:$0xff] }
 0x1ea   :  { %1960 = vmatpush.msrb.mxu2 %v1004_v49  ;;  %1784 = vmatmul.f32.vlgmr.msrb.gmra.mxu1 %v3895_v35  ;;  %v891_v12 = vld [vmem:[#allocation2 + $0x550] sm:$0xff]  ;;  %v1188_v17 = vld [vmem:[#allocation2 + $0xe98] sm:$0xff]  ;;  %v1013_v49 = vld [vmem:[#allocation2 + $0x920] sm:$0xff] }
 0x1eb   :  { %1840 = vmatpush.msra.mxu0 %v747_v28  ;;  %1852 = vmatpush.msra.mxu1 %v939_v16  ;;  %v1115_v55 = vld [vmem:[#allocation2 + $0xc50] sm:$0xff]  ;;  %v764_v25 = vld [vmem:[#allocation2 + $0x158] sm:$0xff] }
 0x1ec   :  { %1896 = vmatpush.msra.mxu3 %v1163_v50  ;;  %1961 = vmatpush.msrb.mxu2 %v996_v48  ;;  %v883_v18 = vld [vmem:[#allocation2 + $0x510] sm:$0xff]  ;;  %v956_v13 = vld [vmem:[#allocation2 + $0x758] sm:$0xff]  ;;  %v1005_v48 = vld [vmem:[#allocation2 + $0x8e0] sm:$0xff] }
 0x1ed   :  { %1841 = vmatpush.msra.mxu0 %v739_v56  ;;  %1853 = vmatpush.msra.mxu1 %v931_v63  ;;  %v1107_v22 = vld [vmem:[#allocation2 + $0xc10] sm:$0xff]  ;;  %v1180_v23 = vld [vmem:[#allocation2 + $0xe58] sm:$0xff] }
 0x1ee   :  { %1897 = vmatpush.msra.mxu3 %v1155_v60  ;;  %1962 = vmatpush.msrb.mxu2 %v988_v53  ;;  %v875_v59 = vld [vmem:[#allocation2 + $0x4d0] sm:$0xff]  ;;  %v756_v28 = vld [vmem:[#allocation2 + $0x118] sm:$0xff]  ;;  %v997_v53 = vld [vmem:[#allocation2 + $0x8a0] sm:$0xff] }
 0x1ef   :  { %1842 = vmatpush.msra.mxu0 %v731_v51  ;;  %1854 = vmatpush.msra.mxu1 %v923_v27  ;;  %v867_v24 = vld [vmem:[#allocation2 + $0x490] sm:$0xff]  ;;  %v948_v16 = vld [vmem:[#allocation2 + $0x718] sm:$0xff] }
 0x1f0   :  { %1898 = vmatpush.msra.mxu3 %v1147_v7  ;;  %1963 = vmatpush.msrb.mxu2 %v980_v14  ;;  %v859_v19 = vld [vmem:[#allocation2 + $0x450] sm:$0xff]  ;;  %v1172_v50 = vld [vmem:[#allocation2 + $0xe18] sm:$0xff]  ;;  %v989_v14 = vld [vmem:[#allocation2 + $0x860] sm:$0xff] }
 0x1f1   :  { %1843 = vmatpush.msra.mxu0 %v723_v6  ;;  %1855 = vmatpush.msra.mxu1 %v915_v39  ;;  %v851_v29 = vld [vmem:[#allocation2 + $0x410] sm:$0xff]  ;;  %v748_v56 = vld [vmem:[#allocation2 + $0xd8] sm:$0xff] }
 0x1f2   :  { %1899 = vmatpush.msra.mxu3 %v1139_v40  ;;  %1964 = vmatmul.f32.vlgmr.msrb.gmra.mxu2 %v3795_v30  ;;  %v940_v63 = vld [vmem:[#allocation2 + $0x6d8] sm:$0xff] }
 0x1f3   :  { %2028 = vmatpush.msra.mxu2 %v1101_v10  ;;  %1844 = vmatmul.f32.vlgmr.msra.gmra.mxu0 %v3839_v21  ;;  %v1164_v60 = vld [vmem:[#allocation2 + $0xdd8] sm:$0xff]  ;;  %v981_v10 = vld [vmem:[#allocation2 + $0x820] sm:$0xff] }
 0x1f4   :  { %1908 = vmatpush.msrb.mxu0 %v844_v8  ;;  %1856 = vmatpush.msra.mxu1 %v907_v9  ;;  %v740_v51 = vld [vmem:[#allocation2 + $0x98] sm:$0xff] }
 0x1f5   :  { %1900 = vmatpush.msra.mxu3 %v1131_v11  ;;  %2029 = vmatpush.msra.mxu2 %v1093_v61  ;;  %v932_v27 = vld [vmem:[#allocation2 + $0x698] sm:$0xff]  ;;  %v1102_v61 = vld [vmem:[#allocation2 + $0xbe8] sm:$0xff] }
 0x1f6   :  { %1909 = vmatpush.msrb.mxu0 %v836_v32  ;;  %1857 = vmatpush.msra.mxu1 %v899_v54  ;;  %v1156_v7 = vld [vmem:[#allocation2 + $0xd98] sm:$0xff]  ;;  %v845_v32 = vld [vmem:[#allocation2 + $0x3e0] sm:$0xff] }
 0x1f7   :  { %1901 = vmatpush.msra.mxu3 %v1123_v52  ;;  %2030 = vmatpush.msra.mxu2 %v1085_v44  ;;  %v732_v6 = vld [vmem:[#allocation2 + $0x58] sm:$0xff]  ;;  %v1094_v44 = vld [vmem:[#allocation2 + $0xba8] sm:$0xff] }
 0x1f8   :  { %1910 = vmatpush.msrb.mxu0 %v828_v0  ;;  %1858 = vmatpush.msra.mxu1 %v891_v12  ;;  %v924_v39 = vld [vmem:[#allocation2 + $0x658] sm:$0xff]  ;;  %v837_v0 = vld [vmem:[#allocation2 + $0x3a0] sm:$0xff] }
 0x1f9   :  { %1902 = vmatpush.msra.mxu3 %v1115_v55  ;;  %2031 = vmatpush.msra.mxu2 %v1077_v1  ;;  %v1148_v40 = vld [vmem:[#allocation2 + $0xd58] sm:$0xff]  ;;  %v1086_v1 = vld [vmem:[#allocation2 + $0xb68] sm:$0xff] }
 0x1fa   :  { %1911 = vmatpush.msrb.mxu0 %v820_v15  ;;  %1859 = vmatpush.msra.mxu1 %v883_v18  ;;  %v724_v8 = vld [vmem:[#allocation2 + $0x18] sm:$0xff]  ;;  %v829_v15 = vld [vmem:[#allocation2 + $0x360] sm:$0xff] }
 0x1fb   :  { %1903 = vmatpush.msra.mxu3 %v1107_v22  ;;  %2032 = vmatpush.msra.mxu2 %v1069_v26  ;;  %v916_v9 = vld [vmem:[#allocation2 + $0x618] sm:$0xff]  ;;  %v1078_v26 = vld [vmem:[#allocation2 + $0xb28] sm:$0xff] }
 0x1fc   :  { %1904 = vmatmul.f32.vlgmr.msra.gmra.mxu3 %v3873_v5  ;;  %1912 = vmatpush.msrb.mxu0 %v812_v41  ;;  %v1140_v11 = vld [vmem:[#allocation2 + $0xd18] sm:$0xff]  ;;  %v821_v41 = vld [vmem:[#allocation2 + $0x320] sm:$0xff] }
 0x1fd   :  { %1968 = vmatpush.msrb.mxu3 %v1228_v58  ;;  %1860 = vmatpush.msra.mxu1 %v875_v59  ;;  %v908_v54 = vld [vmem:[#allocation2 + $0x5d8] sm:$0xff] }
 0x1fe   :  { %2033 = vmatpush.msra.mxu2 %v1061_v38  ;;  %1913 = vmatpush.msrb.mxu0 %v804_v36  ;;  %v1132_v52 = vld [vmem:[#allocation2 + $0xcd8] sm:$0xff]  ;;  %v1070_v38 = vld [vmem:[#allocation2 + $0xae8] sm:$0xff]  ;;  %v813_v36 = vld [vmem:[#allocation2 + $0x2e0] sm:$0xff] }
 0x1ff   :  { %1969 = vmatpush.msrb.mxu3 %v1220_v43  ;;  %1861 = vmatpush.msra.mxu1 %v867_v24  ;;  %v900_v12 = vld [vmem:[#allocation2 + $0x598] sm:$0xff]  ;;  %v1229_v43 = vld [vmem:[#allocation2 + $0xfe0] sm:$0xff] }
 0x200   :  { %2034 = vmatpush.msra.mxu2 %v1053_v31  ;;  %1914 = vmatpush.msrb.mxu0 %v796_v4  ;;  %v1124_v55 = vld [vmem:[#allocation2 + $0xc98] sm:$0xff]  ;;  %v1062_v31 = vld [vmem:[#allocation2 + $0xaa8] sm:$0xff]  ;;  %v805_v4 = vld [vmem:[#allocation2 + $0x2a0] sm:$0xff] }
 0x201   :  { %1970 = vmatpush.msrb.mxu3 %v1212_v20  ;;  %1862 = vmatpush.msra.mxu1 %v859_v19  ;;  %v892_v18 = vld [vmem:[#allocation2 + $0x558] sm:$0xff]  ;;  %v1221_v20 = vld [vmem:[#allocation2 + $0xfa0] sm:$0xff] }
 0x202   :  { %2035 = vmatpush.msra.mxu2 %v1045_v46  ;;  %1915 = vmatpush.msrb.mxu0 %v788_v47  ;;  %v1116_v22 = vld [vmem:[#allocation2 + $0xc58] sm:$0xff]  ;;  %v1054_v46 = vld [vmem:[#allocation2 + $0xa68] sm:$0xff]  ;;  %v797_v47 = vld [vmem:[#allocation2 + $0x260] sm:$0xff] }
 0x203   :  { %1971 = vmatpush.msrb.mxu3 %v1204_v3  ;;  %1863 = vmatpush.msra.mxu1 %v851_v29  ;;  %v884_v58 = vld [vmem:[#allocation2 + $0x518] sm:$0xff]  ;;  %v1213_v3 = vld [vmem:[#allocation2 + $0xf60] sm:$0xff] }
 0x204   :  { %2036 = vmatpush.msra.mxu2 %v1037_v37  ;;  %1864 = vmatmul.f32.vlgmr.msra.gmra.mxu1 %v3895_v35  ;;  %v1108_v59 = vld [vmem:[#allocation2 + $0xc18] sm:$0xff]  ;;  %v1046_v37 = vld [vmem:[#allocation2 + $0xa28] sm:$0xff] }
 0x205   :  { %1916 = vmatpush.msrb.mxu0 %v780_v42  ;;  %1928 = vmatpush.msrb.mxu1 %v972_v2  ;;  %v876_v24 = vld [vmem:[#allocation2 + $0x4d8] sm:$0xff]  ;;  %v789_v42 = vld [vmem:[#allocation2 + $0x220] sm:$0xff] }
 0x206   :  { %1972 = vmatpush.msrb.mxu3 %v1196_v45  ;;  %2037 = vmatpush.msra.mxu2 %v1029_v34  ;;  %v868_v19 = vld [vmem:[#allocation2 + $0x498] sm:$0xff]  ;;  %v1205_v2 = vld [vmem:[#allocation2 + $0xf20] sm:$0xff]  ;;  %v1038_v34 = vld [vmem:[#allocation2 + $0x9e8] sm:$0xff] }
 0x207   :  { %1917 = vmatpush.msrb.mxu0 %v772_v33  ;;  %1929 = vmatpush.msrb.mxu1 %v964_v62  ;;  %v860_v29 = vld [vmem:[#allocation2 + $0x458] sm:$0xff]  ;;  %v781_v33 = vld [vmem:[#allocation2 + $0x1e0] sm:$0xff] }
 0x208   :  { %1973 = vmatpush.msrb.mxu3 %v1188_v17  ;;  %2038 = vmatpush.msra.mxu2 %v1021_v57  ;;  %v852_v45 = vld [vmem:[#allocation2 + $0x418] sm:$0xff]  ;;  %v973_v62 = vld [vmem:[#allocation2 + $0x7e0] sm:$0xff]  ;;  %v1030_v57 = vld [vmem:[#allocation2 + $0x9a8] sm:$0xff] }
 0x209   :  { %1918 = vmatpush.msrb.mxu0 %v764_v25  ;;  %1930 = vmatpush.msrb.mxu1 %v956_v13  ;;  %v1197_v17 = vld [vmem:[#allocation2 + $0xee0] sm:$0xff] }
 0x20a   :  { %1974 = vmatpush.msrb.mxu3 %v1180_v23  ;;  %2039 = vmatpush.msra.mxu2 %v1013_v49  ;;  %v773_v25 = vld [vmem:[#allocation2 + $0x1a0] sm:$0xff]  ;;  %v1022_v49 = vld [vmem:[#allocation2 + $0x968] sm:$0xff] }
 0x20b   :  { %1919 = vmatpush.msrb.mxu0 %v756_v28  ;;  %1931 = vmatpush.msrb.mxu1 %v948_v16  ;;  %v965_v13 = vld [vmem:[#allocation2 + $0x7a0] sm:$0xff] }
 0x20c   :  { %1975 = vmatpush.msrb.mxu3 %v1172_v50  ;;  %2040 = vmatpush.msra.mxu2 %v1005_v48  ;;  %v1189_v23 = vld [vmem:[#allocation2 + $0xea0] sm:$0xff]  ;;  %v1014_v48 = vld [vmem:[#allocation2 + $0x928] sm:$0xff] }
 0x20d   :  { %1920 = vmatpush.msrb.mxu0 %v748_v56  ;;  %1932 = vmatpush.msrb.mxu1 %v940_v63  ;;  %v765_v28 = vld [vmem:[#allocation2 + $0x160] sm:$0xff] }
 0x20e   :  { %1976 = vmatpush.msrb.mxu3 %v1164_v60  ;;  %2041 = vmatpush.msra.mxu2 %v997_v53  ;;  %v957_v16 = vld [vmem:[#allocation2 + $0x760] sm:$0xff]  ;;  %v1006_v53 = vld [vmem:[#allocation2 + $0x8e8] sm:$0xff] }
 0x20f   :  { %1921 = vmatpush.msrb.mxu0 %v740_v51  ;;  %1933 = vmatpush.msrb.mxu1 %v932_v27  ;;  %v1181_v50 = vld [vmem:[#allocation2 + $0xe60] sm:$0xff] }
 0x210   :  { %1977 = vmatpush.msrb.mxu3 %v1156_v7  ;;  %2042 = vmatpush.msra.mxu2 %v989_v14  ;;  %v757_v56 = vld [vmem:[#allocation2 + $0x120] sm:$0xff]  ;;  %v998_v14 = vld [vmem:[#allocation2 + $0x8a8] sm:$0xff] }
 0x211   :  { %1922 = vmatpush.msrb.mxu0 %v732_v6  ;;  %1934 = vmatpush.msrb.mxu1 %v924_v39  ;;  %v949_v63 = vld [vmem:[#allocation2 + $0x720] sm:$0xff] }
 0x212   :  { %1978 = vmatpush.msrb.mxu3 %v1148_v40  ;;  %2043 = vmatpush.msra.mxu2 %v981_v10  ;;  %v1173_v60 = vld [vmem:[#allocation2 + $0xe20] sm:$0xff]  ;;  %v990_v10 = vld [vmem:[#allocation2 + $0x868] sm:$0xff] }
 0x213   :  { %1923 = vmatpush.msrb.mxu0 %v724_v8  ;;  %1935 = vmatpush.msrb.mxu1 %v916_v9  ;;  %v749_v51 = vld [vmem:[#allocation2 + $0xe0] sm:$0xff] }
 0x214   :  { %1979 = vmatpush.msrb.mxu3 %v1140_v11  ;;  %2044 = vmatmul.f32.vlgmr.msra.gmra.mxu2 %v3795_v30  ;;  %v941_v27 = vld [vmem:[#allocation2 + $0x6e0] sm:$0xff] }
 0x215   :  { %2108 = vmatpush.msrb.mxu2 %v1102_v61  ;;  %1924 = vmatmul.f32.vlgmr.msrb.gmra.mxu0 %v3839_v21  ;;  %v1165_v7 = vld [vmem:[#allocation2 + $0xde0] sm:$0xff]  ;;  %v982_v61 = vld [vmem:[#allocation2 + $0x828] sm:$0xff] }
 0x216   :  { %1988 = vmatpush.msra.mxu0 %v845_v32  ;;  %1936 = vmatpush.msrb.mxu1 %v908_v54  ;;  %v741_v6 = vld [vmem:[#allocation2 + $0xa0] sm:$0xff] }
 0x217   :  { %1980 = vmatpush.msrb.mxu3 %v1132_v52  ;;  %2109 = vmatpush.msrb.mxu2 %v1094_v44  ;;  %v933_v39 = vld [vmem:[#allocation2 + $0x6a0] sm:$0xff]  ;;  %v1103_v44 = vld [vmem:[#allocation2 + $0xbf0] sm:$0xff] }
 0x218   :  { %1989 = vmatpush.msra.mxu0 %v837_v0  ;;  %1937 = vmatpush.msrb.mxu1 %v900_v12  ;;  %v1157_v40 = vld [vmem:[#allocation2 + $0xda0] sm:$0xff]  ;;  %v846_v0 = vld [vmem:[#allocation2 + $0x3e8] sm:$0xff] }
 0x219   :  { %1981 = vmatpush.msrb.mxu3 %v1124_v55  ;;  %2110 = vmatpush.msrb.mxu2 %v1086_v1  ;;  %v733_v8 = vld [vmem:[#allocation2 + $0x60] sm:$0xff]  ;;  %v1095_v1 = vld [vmem:[#allocation2 + $0xbb0] sm:$0xff] }
 0x21a   :  { %1990 = vmatpush.msra.mxu0 %v829_v15  ;;  %1938 = vmatpush.msrb.mxu1 %v892_v18  ;;  %v925_v9 = vld [vmem:[#allocation2 + $0x660] sm:$0xff]  ;;  %v838_v15 = vld [vmem:[#allocation2 + $0x3a8] sm:$0xff] }
 0x21b   :  { %1982 = vmatpush.msrb.mxu3 %v1116_v22  ;;  %2111 = vmatpush.msrb.mxu2 %v1078_v26  ;;  %v1149_v11 = vld [vmem:[#allocation2 + $0xd60] sm:$0xff]  ;;  %v1087_v26 = vld [vmem:[#allocation2 + $0xb70] sm:$0xff] }
 0x21c   :  { %1991 = vmatpush.msra.mxu0 %v821_v41  ;;  %1939 = vmatpush.msrb.mxu1 %v884_v58  ;;  %v725_v32 = vld [vmem:[#allocation2 + $0x20] sm:$0xff]  ;;  %v830_v41 = vld [vmem:[#allocation2 + $0x368] sm:$0xff] }
 0x21d   :  { %1983 = vmatpush.msrb.mxu3 %v1108_v59  ;;  %2112 = vmatpush.msrb.mxu2 %v1070_v38  ;;  %v917_v54 = vld [vmem:[#allocation2 + $0x620] sm:$0xff]  ;;  %v1079_v38 = vld [vmem:[#allocation2 + $0xb30] sm:$0xff] }
 0x21e   :  { %1984 = vmatmul.f32.vlgmr.msrb.gmra.mxu3 %v3873_v5  ;;  %1992 = vmatpush.msra.mxu0 %v813_v36  ;;  %v1141_v52 = vld [vmem:[#allocation2 + $0xd20] sm:$0xff]  ;;  %v822_v36 = vld [vmem:[#allocation2 + $0x328] sm:$0xff] }
 0x21f   :  { %2048 = vmatpush.msra.mxu3 %v1229_v43  ;;  %1940 = vmatpush.msrb.mxu1 %v876_v24  ;;  %v909_v12 = vld [vmem:[#allocation2 + $0x5e0] sm:$0xff] }
 0x220   :  { %2113 = vmatpush.msrb.mxu2 %v1062_v31  ;;  %1993 = vmatpush.msra.mxu0 %v805_v4  ;;  %v1133_v55 = vld [vmem:[#allocation2 + $0xce0] sm:$0xff]  ;;  %v1071_v31 = vld [vmem:[#allocation2 + $0xaf0] sm:$0xff]  ;;  %v814_v4 = vld [vmem:[#allocation2 + $0x2e8] sm:$0xff] }
 0x221   :  { %2049 = vmatpush.msra.mxu3 %v1221_v20  ;;  %1941 = vmatpush.msrb.mxu1 %v868_v19  ;;  %v901_v18 = vld [vmem:[#allocation2 + $0x5a0] sm:$0xff]  ;;  %v1230_v20 = vld [vmem:[#allocation2 + $0xfe8] sm:$0xff] }
 0x222   :  { %2114 = vmatpush.msrb.mxu2 %v1054_v46  ;;  %1994 = vmatpush.msra.mxu0 %v797_v47  ;;  %v1125_v22 = vld [vmem:[#allocation2 + $0xca0] sm:$0xff]  ;;  %v1063_v46 = vld [vmem:[#allocation2 + $0xab0] sm:$0xff]  ;;  %v806_v47 = vld [vmem:[#allocation2 + $0x2a8] sm:$0xff] }
 0x223   :  { %2050 = vmatpush.msra.mxu3 %v1213_v3  ;;  %1942 = vmatpush.msrb.mxu1 %v860_v29  ;;  %v893_v58 = vld [vmem:[#allocation2 + $0x560] sm:$0xff]  ;;  %v1222_v3 = vld [vmem:[#allocation2 + $0xfa8] sm:$0xff] }
 0x224   :  { %2115 = vmatpush.msrb.mxu2 %v1046_v37  ;;  %1995 = vmatpush.msra.mxu0 %v789_v42  ;;  %v1117_v59 = vld [vmem:[#allocation2 + $0xc60] sm:$0xff]  ;;  %v1055_v37 = vld [vmem:[#allocation2 + $0xa70] sm:$0xff]  ;;  %v798_v42 = vld [vmem:[#allocation2 + $0x268] sm:$0xff] }
 0x225   :  { %2051 = vmatpush.msra.mxu3 %v1205_v2  ;;  %1943 = vmatpush.msrb.mxu1 %v852_v45  ;;  %v885_v43 = vld [vmem:[#allocation2 + $0x520] sm:$0xff]  ;;  %v1214_v2 = vld [vmem:[#allocation2 + $0xf68] sm:$0xff] }
 0x226   :  { %2116 = vmatpush.msrb.mxu2 %v1038_v34  ;;  %1944 = vmatmul.f32.vlgmr.msrb.gmra.mxu1 %v3895_v35  ;;  %v1109_v24 = vld [vmem:[#allocation2 + $0xc20] sm:$0xff]  ;;  %v1047_v34 = vld [vmem:[#allocation2 + $0xa30] sm:$0xff] }
 0x227   :  { %1996 = vmatpush.msra.mxu0 %v781_v33  ;;  %2008 = vmatpush.msra.mxu1 %v973_v62  ;;  %v877_v19 = vld [vmem:[#allocation2 + $0x4e0] sm:$0xff]  ;;  %v790_v33 = vld [vmem:[#allocation2 + $0x228] sm:$0xff] }
 0x228   :  { %2052 = vmatpush.msra.mxu3 %v1197_v17  ;;  %2117 = vmatpush.msrb.mxu2 %v1030_v57  ;;  %v869_v29 = vld [vmem:[#allocation2 + $0x4a0] sm:$0xff]  ;;  %v1206_v62 = vld [vmem:[#allocation2 + $0xf28] sm:$0xff]  ;;  %v1039_v57 = vld [vmem:[#allocation2 + $0x9f0] sm:$0xff] }
 0x229   :  { %1997 = vmatpush.msra.mxu0 %v773_v25  ;;  %2009 = vmatpush.msra.mxu1 %v965_v13  ;;  %v861_v45 = vld [vmem:[#allocation2 + $0x460] sm:$0xff]  ;;  %v782_v25 = vld [vmem:[#allocation2 + $0x1e8] sm:$0xff] }
 0x22a   :  { %2053 = vmatpush.msra.mxu3 %v1189_v23  ;;  %2118 = vmatpush.msrb.mxu2 %v1022_v49  ;;  %v853_v17 = vld [vmem:[#allocation2 + $0x420] sm:$0xff]  ;;  %v974_v13 = vld [vmem:[#allocation2 + $0x7e8] sm:$0xff]  ;;  %v1031_v49 = vld [vmem:[#allocation2 + $0x9b0] sm:$0xff] }
 0x22b   :  { %1998 = vmatpush.msra.mxu0 %v765_v28  ;;  %2010 = vmatpush.msra.mxu1 %v957_v16  ;;  %v1198_v23 = vld [vmem:[#allocation2 + $0xee8] sm:$0xff] }
 0x22c   :  { %2054 = vmatpush.msra.mxu3 %v1181_v50  ;;  %2119 = vmatpush.msrb.mxu2 %v1014_v48  ;;  %v774_v28 = vld [vmem:[#allocation2 + $0x1a8] sm:$0xff]  ;;  %v1023_v48 = vld [vmem:[#allocation2 + $0x970] sm:$0xff] }
 0x22d   :  { %1999 = vmatpush.msra.mxu0 %v757_v56  ;;  %2011 = vmatpush.msra.mxu1 %v949_v63  ;;  %v966_v16 = vld [vmem:[#allocation2 + $0x7a8] sm:$0xff] }
 0x22e   :  { %2055 = vmatpush.msra.mxu3 %v1173_v60  ;;  %2120 = vmatpush.msrb.mxu2 %v1006_v53  ;;  %v1190_v50 = vld [vmem:[#allocation2 + $0xea8] sm:$0xff]  ;;  %v1015_v53 = vld [vmem:[#allocation2 + $0x930] sm:$0xff] }
 0x22f   :  { %2000 = vmatpush.msra.mxu0 %v749_v51  ;;  %2012 = vmatpush.msra.mxu1 %v941_v27  ;;  %v766_v56 = vld [vmem:[#allocation2 + $0x168] sm:$0xff] }
 0x230   :  { %2056 = vmatpush.msra.mxu3 %v1165_v7  ;;  %2121 = vmatpush.msrb.mxu2 %v998_v14  ;;  %v958_v63 = vld [vmem:[#allocation2 + $0x768] sm:$0xff]  ;;  %v1007_v14 = vld [vmem:[#allocation2 + $0x8f0] sm:$0xff] }
 0x231   :  { %2001 = vmatpush.msra.mxu0 %v741_v6  ;;  %2013 = vmatpush.msra.mxu1 %v933_v39  ;;  %v1182_v60 = vld [vmem:[#allocation2 + $0xe68] sm:$0xff] }
 0x232   :  { %2057 = vmatpush.msra.mxu3 %v1157_v40  ;;  %2122 = vmatpush.msrb.mxu2 %v990_v10  ;;  %v758_v51 = vld [vmem:[#allocation2 + $0x128] sm:$0xff]  ;;  %v999_v10 = vld [vmem:[#allocation2 + $0x8b0] sm:$0xff] }
 0x233   :  { %2002 = vmatpush.msra.mxu0 %v733_v8  ;;  %2014 = vmatpush.msra.mxu1 %v925_v9  ;;  %v950_v27 = vld [vmem:[#allocation2 + $0x728] sm:$0xff] }
 0x234   :  { %2058 = vmatpush.msra.mxu3 %v1149_v11  ;;  %2123 = vmatpush.msrb.mxu2 %v982_v61  ;;  %v1174_v7 = vld [vmem:[#allocation2 + $0xe28] sm:$0xff]  ;;  %v991_v61 = vld [vmem:[#allocation2 + $0x870] sm:$0xff] }
 0x235   :  { %2003 = vmatpush.msra.mxu0 %v725_v32  ;;  %2015 = vmatpush.msra.mxu1 %v917_v54  ;;  %v750_v6 = vld [vmem:[#allocation2 + $0xe8] sm:$0xff] }
 0x236   :  { %2059 = vmatpush.msra.mxu3 %v1141_v52  ;;  %2124 = vmatmul.f32.vlgmr.msrb.gmra.mxu2 %v3795_v30  ;;  %v942_v39 = vld [vmem:[#allocation2 + $0x6e8] sm:$0xff] }
 0x237   :  { %2188 = vmatpush.msra.mxu2 %v1103_v44  ;;  %2004 = vmatmul.f32.vlgmr.msra.gmra.mxu0 %v3839_v21  ;;  %v1166_v40 = vld [vmem:[#allocation2 + $0xde8] sm:$0xff]  ;;  %v983_v44 = vld [vmem:[#allocation2 + $0x830] sm:$0xff] }
 0x238   :  { %2068 = vmatpush.msrb.mxu0 %v846_v0  ;;  %2016 = vmatpush.msra.mxu1 %v909_v12  ;;  %v742_v8 = vld [vmem:[#allocation2 + $0xa8] sm:$0xff] }
 0x239   :  { %2060 = vmatpush.msra.mxu3 %v1133_v55  ;;  %2189 = vmatpush.msra.mxu2 %v1095_v1  ;;  %v934_v9 = vld [vmem:[#allocation2 + $0x6a8] sm:$0xff]  ;;  %v1104_v1 = vld [vmem:[#allocation2 + $0xbf8] sm:$0xff] }
 0x23a   :  { %2069 = vmatpush.msrb.mxu0 %v838_v15  ;;  %2017 = vmatpush.msra.mxu1 %v901_v18  ;;  %v1158_v11 = vld [vmem:[#allocation2 + $0xda8] sm:$0xff]  ;;  %v847_v15 = vld [vmem:[#allocation2 + $0x3f0] sm:$0xff] }
 0x23b   :  { %2061 = vmatpush.msra.mxu3 %v1125_v22  ;;  %2190 = vmatpush.msra.mxu2 %v1087_v26  ;;  %v734_v32 = vld [vmem:[#allocation2 + $0x68] sm:$0xff]  ;;  %v1096_v26 = vld [vmem:[#allocation2 + $0xbb8] sm:$0xff] }
 0x23c   :  { %2070 = vmatpush.msrb.mxu0 %v830_v41  ;;  %2018 = vmatpush.msra.mxu1 %v893_v58  ;;  %v926_v54 = vld [vmem:[#allocation2 + $0x668] sm:$0xff]  ;;  %v839_v41 = vld [vmem:[#allocation2 + $0x3b0] sm:$0xff] }
 0x23d   :  { %2062 = vmatpush.msra.mxu3 %v1117_v59  ;;  %2191 = vmatpush.msra.mxu2 %v1079_v38  ;;  %v1150_v52 = vld [vmem:[#allocation2 + $0xd68] sm:$0xff]  ;;  %v1088_v38 = vld [vmem:[#allocation2 + $0xb78] sm:$0xff] }
 0x23e   :  { %2071 = vmatpush.msrb.mxu0 %v822_v36  ;;  %2019 = vmatpush.msra.mxu1 %v885_v43  ;;  %v726_v0 = vld [vmem:[#allocation2 + $0x28] sm:$0xff]  ;;  %v831_v36 = vld [vmem:[#allocation2 + $0x370] sm:$0xff] }
 0x23f   :  { %2063 = vmatpush.msra.mxu3 %v1109_v24  ;;  %2192 = vmatpush.msra.mxu2 %v1071_v31  ;;  %v918_v12 = vld [vmem:[#allocation2 + $0x628] sm:$0xff]  ;;  %v1080_v31 = vld [vmem:[#allocation2 + $0xb38] sm:$0xff] }
 0x240   :  { %2064 = vmatmul.f32.vlgmr.msra.gmra.mxu3 %v3873_v5  ;;  %2072 = vmatpush.msrb.mxu0 %v814_v4  ;;  %v1142_v55 = vld [vmem:[#allocation2 + $0xd28] sm:$0xff]  ;;  %v823_v4 = vld [vmem:[#allocation2 + $0x330] sm:$0xff] }
 0x241   :  { %2128 = vmatpush.msrb.mxu3 %v1230_v20  ;;  %2020 = vmatpush.msra.mxu1 %v877_v19  ;;  %v910_v18 = vld [vmem:[#allocation2 + $0x5e8] sm:$0xff] }
 0x242   :  { %2193 = vmatpush.msra.mxu2 %v1063_v46  ;;  %2073 = vmatpush.msrb.mxu0 %v806_v47  ;;  %v1134_v22 = vld [vmem:[#allocation2 + $0xce8] sm:$0xff]  ;;  %v1072_v46 = vld [vmem:[#allocation2 + $0xaf8] sm:$0xff]  ;;  %v815_v47 = vld [vmem:[#allocation2 + $0x2f0] sm:$0xff] }
 0x243   :  { %2129 = vmatpush.msrb.mxu3 %v1222_v3  ;;  %2021 = vmatpush.msra.mxu1 %v869_v29  ;;  %v902_v58 = vld [vmem:[#allocation2 + $0x5a8] sm:$0xff]  ;;  %v1231_v3 = vld [vmem:[#allocation2 + $0xff0] sm:$0xff] }
 0x244   :  { %2194 = vmatpush.msra.mxu2 %v1055_v37  ;;  %2074 = vmatpush.msrb.mxu0 %v798_v42  ;;  %v1126_v59 = vld [vmem:[#allocation2 + $0xca8] sm:$0xff]  ;;  %v1064_v37 = vld [vmem:[#allocation2 + $0xab8] sm:$0xff]  ;;  %v807_v42 = vld [vmem:[#allocation2 + $0x2b0] sm:$0xff] }
 0x245   :  { %2130 = vmatpush.msrb.mxu3 %v1214_v2  ;;  %2022 = vmatpush.msra.mxu1 %v861_v45  ;;  %v894_v43 = vld [vmem:[#allocation2 + $0x568] sm:$0xff]  ;;  %v1223_v2 = vld [vmem:[#allocation2 + $0xfb0] sm:$0xff] }
 0x246   :  { %2195 = vmatpush.msra.mxu2 %v1047_v34  ;;  %2075 = vmatpush.msrb.mxu0 %v790_v33  ;;  %v1118_v24 = vld [vmem:[#allocation2 + $0xc68] sm:$0xff]  ;;  %v1056_v34 = vld [vmem:[#allocation2 + $0xa78] sm:$0xff]  ;;  %v799_v33 = vld [vmem:[#allocation2 + $0x270] sm:$0xff] }
 0x247   :  { %2131 = vmatpush.msrb.mxu3 %v1206_v62  ;;  %2023 = vmatpush.msra.mxu1 %v853_v17  ;;  %v886_v20 = vld [vmem:[#allocation2 + $0x528] sm:$0xff]  ;;  %v1215_v62 = vld [vmem:[#allocation2 + $0xf70] sm:$0xff] }
 0x248   :  { %2196 = vmatpush.msra.mxu2 %v1039_v57  ;;  %2024 = vmatmul.f32.vlgmr.msra.gmra.mxu1 %v3895_v35  ;;  %v1110_v19 = vld [vmem:[#allocation2 + $0xc28] sm:$0xff]  ;;  %v1048_v57 = vld [vmem:[#allocation2 + $0xa38] sm:$0xff] }
 0x249   :  { %2076 = vmatpush.msrb.mxu0 %v782_v25  ;;  %2088 = vmatpush.msrb.mxu1 %v974_v13  ;;  %v878_v29 = vld [vmem:[#allocation2 + $0x4e8] sm:$0xff]  ;;  %v791_v25 = vld [vmem:[#allocation2 + $0x230] sm:$0xff] }
 0x24a   :  { %2132 = vmatpush.msrb.mxu3 %v1198_v23  ;;  %2197 = vmatpush.msra.mxu2 %v1031_v49  ;;  %v870_v45 = vld [vmem:[#allocation2 + $0x4a8] sm:$0xff]  ;;  %v1207_v13 = vld [vmem:[#allocation2 + $0xf30] sm:$0xff]  ;;  %v1040_v49 = vld [vmem:[#allocation2 + $0x9f8] sm:$0xff] }
 0x24b   :  { %2077 = vmatpush.msrb.mxu0 %v774_v28  ;;  %2089 = vmatpush.msrb.mxu1 %v966_v16  ;;  %v862_v17 = vld [vmem:[#allocation2 + $0x468] sm:$0xff]  ;;  %v783_v28 = vld [vmem:[#allocation2 + $0x1f0] sm:$0xff] }
 0x24c   :  { %2133 = vmatpush.msrb.mxu3 %v1190_v50  ;;  %2198 = vmatpush.msra.mxu2 %v1023_v48  ;;  %v854_v23 = vld [vmem:[#allocation2 + $0x428] sm:$0xff]  ;;  %v975_v16 = vld [vmem:[#allocation2 + $0x7f0] sm:$0xff]  ;;  %v1032_v48 = vld [vmem:[#allocation2 + $0x9b8] sm:$0xff] }
 0x24d   :  { %2078 = vmatpush.msrb.mxu0 %v766_v56  ;;  %2090 = vmatpush.msrb.mxu1 %v958_v63  ;;  %v1199_v50 = vld [vmem:[#allocation2 + $0xef0] sm:$0xff] }
 0x24e   :  { %2134 = vmatpush.msrb.mxu3 %v1182_v60  ;;  %2199 = vmatpush.msra.mxu2 %v1015_v53  ;;  %v775_v56 = vld [vmem:[#allocation2 + $0x1b0] sm:$0xff]  ;;  %v1024_v53 = vld [vmem:[#allocation2 + $0x978] sm:$0xff] }
 0x24f   :  { %2079 = vmatpush.msrb.mxu0 %v758_v51  ;;  %2091 = vmatpush.msrb.mxu1 %v950_v27  ;;  %v967_v63 = vld [vmem:[#allocation2 + $0x7b0] sm:$0xff] }
 0x250   :  { %2135 = vmatpush.msrb.mxu3 %v1174_v7  ;;  %2200 = vmatpush.msra.mxu2 %v1007_v14  ;;  %v1191_v60 = vld [vmem:[#allocation2 + $0xeb0] sm:$0xff]  ;;  %v1016_v14 = vld [vmem:[#allocation2 + $0x938] sm:$0xff] }
 0x251   :  { %2080 = vmatpush.msrb.mxu0 %v750_v6  ;;  %2092 = vmatpush.msrb.mxu1 %v942_v39  ;;  %v767_v51 = vld [vmem:[#allocation2 + $0x170] sm:$0xff] }
 0x252   :  { %2136 = vmatpush.msrb.mxu3 %v1166_v40  ;;  %2201 = vmatpush.msra.mxu2 %v999_v10  ;;  %v959_v27 = vld [vmem:[#allocation2 + $0x770] sm:$0xff]  ;;  %v1008_v10 = vld [vmem:[#allocation2 + $0x8f8] sm:$0xff] }
 0x253   :  { %2081 = vmatpush.msrb.mxu0 %v742_v8  ;;  %2093 = vmatpush.msrb.mxu1 %v934_v9  ;;  %v1183_v7 = vld [vmem:[#allocation2 + $0xe70] sm:$0xff] }
 0x254   :  { %2137 = vmatpush.msrb.mxu3 %v1158_v11  ;;  %2202 = vmatpush.msra.mxu2 %v991_v61  ;;  %v759_v6 = vld [vmem:[#allocation2 + $0x130] sm:$0xff]  ;;  %v1000_v61 = vld [vmem:[#allocation2 + $0x8b8] sm:$0xff] }
 0x255   :  { %2082 = vmatpush.msrb.mxu0 %v734_v32  ;;  %2094 = vmatpush.msrb.mxu1 %v926_v54  ;;  %v951_v39 = vld [vmem:[#allocation2 + $0x730] sm:$0xff] }
 0x256   :  { %2138 = vmatpush.msrb.mxu3 %v1150_v52  ;;  %2203 = vmatpush.msra.mxu2 %v983_v44  ;;  %v1175_v40 = vld [vmem:[#allocation2 + $0xe30] sm:$0xff]  ;;  %v992_v44 = vld [vmem:[#allocation2 + $0x878] sm:$0xff] }
 0x257   :  { %2083 = vmatpush.msrb.mxu0 %v726_v0  ;;  %2095 = vmatpush.msrb.mxu1 %v918_v12  ;;  %v751_v8 = vld [vmem:[#allocation2 + $0xf0] sm:$0xff] }
 0x258   :  { %2139 = vmatpush.msrb.mxu3 %v1142_v55  ;;  %2204 = vmatmul.f32.vlgmr.msra.gmra.mxu2 %v3795_v30  ;;  %v943_v9 = vld [vmem:[#allocation2 + $0x6f0] sm:$0xff] }
 0x259   :  { %2268 = vmatpush.msrb.mxu2 %v1104_v1  ;;  %2084 = vmatmul.f32.vlgmr.msrb.gmra.mxu0 %v3839_v21  ;;  %v1167_v11 = vld [vmem:[#allocation2 + $0xdf0] sm:$0xff]  ;;  %v984_v1 = vld [vmem:[#allocation2 + $0x838] sm:$0xff] }
 0x25a   :  { %2148 = vmatpush.msra.mxu0 %v847_v15  ;;  %2096 = vmatpush.msrb.mxu1 %v910_v18  ;;  %v743_v32 = vld [vmem:[#allocation2 + $0xb0] sm:$0xff] }
 0x25b   :  { %2140 = vmatpush.msrb.mxu3 %v1134_v22  ;;  %2269 = vmatpush.msrb.mxu2 %v1096_v26  ;;  %v935_v54 = vld [vmem:[#allocation2 + $0x6b0] sm:$0xff]  ;;  %v3916_v22 = vpop.f32.mrf.mxu0 }
 0x25c   :  { %2149 = vmatpush.msra.mxu0 %v839_v41  ;;  %2097 = vmatpush.msrb.mxu1 %v902_v58  ;;  %v1159_v52 = vld [vmem:[#allocation2 + $0xdb0] sm:$0xff]  ;;  %v2363_v41 = vld [vmem:[#allocation7 + $0x178] sm:$0xff] }
 0x25d   :  { %2141 = vmatpush.msrb.mxu3 %v1126_v59  ;;  %2270 = vmatpush.msrb.mxu2 %v1088_v38  ;;  %v735_v0 = vld [vmem:[#allocation2 + $0x70] sm:$0xff]  ;;  %v848_v59 = vld [vmem:[#allocation2 + $0x3f8] sm:$0xff] }
 0x25e   :  { %2150 = vmatpush.msra.mxu0 %v831_v36  ;;  %2098 = vmatpush.msrb.mxu1 %v894_v43  ;;  %v927_v12 = vld [vmem:[#allocation2 + $0x670] sm:$0xff]  ;;  %v3918_v58 = vpop.f32.mrf.mxu1  ;;  %v2362_v43 = vld [vmem:[#allocation7 + $0x170] sm:$0xff] }
 0x25f   :  { %2142 = vmatpush.msrb.mxu3 %v1118_v24  ;;  %2271 = vmatpush.msrb.mxu2 %v1080_v31  ;;  %v1151_v55 = vld [vmem:[#allocation2 + $0xd70] sm:$0xff]  ;;  %v840_v24 = vld [vmem:[#allocation2 + $0x3b8] sm:$0xff] }
 0x260   :  { %2151 = vmatpush.msra.mxu0 %v823_v4  ;;  %2099 = vmatpush.msrb.mxu1 %v886_v20  ;;  %v727_v15 = vld [vmem:[#allocation2 + $0x30] sm:$0xff] }
 0x261   :  { %2143 = vmatpush.msrb.mxu3 %v1110_v19  ;;  %2272 = vmatpush.msrb.mxu2 %v1072_v46  ;;  %v919_v18 = vld [vmem:[#allocation2 + $0x630] sm:$0xff]  ;;  %v832_v19 = vld [vmem:[#allocation2 + $0x378] sm:$0xff] }
 0x262   :  { %2144 = vmatmul.f32.vlgmr.msrb.gmra.mxu3 %v3873_v5  ;;  %2152 = vmatpush.msra.mxu0 %v815_v47  ;;  %v1143_v26 = vld [vmem:[#allocation2 + $0xd30] sm:$0xff] }
 0x263   :  { %2208 = vmatpush.msra.mxu3 %v1231_v3  ;;  %2100 = vmatpush.msrb.mxu1 %v878_v29  ;;  %v911_v38 = vld [vmem:[#allocation2 + $0x5f0] sm:$0xff]  ;;  %v2360_v3 = vld [vmem:[#allocation7 + $0x160] sm:$0xff]  ;;  %v824_v29 = vld [vmem:[#allocation2 + $0x338] sm:$0xff] }
 0x264   :  { %2273 = vmatpush.msrb.mxu2 %v1064_v37  ;;  %2153 = vmatpush.msra.mxu0 %v807_v42  ;;  %v1135_v36 = vld [vmem:[#allocation2 + $0xcf0] sm:$0xff] }
 0x265   :  { %2209 = vmatpush.msra.mxu3 %v1223_v2  ;;  %2101 = vmatpush.msrb.mxu1 %v870_v45  ;;  %v903_v31 = vld [vmem:[#allocation2 + $0x5b0] sm:$0xff]  ;;  %v2359_v2 = vld [vmem:[#allocation7 + $0x158] sm:$0xff]  ;;  %v3924_v45 = vpop.f32.mrf.mxu0 }
 0x266   :  { %2274 = vmatpush.msrb.mxu2 %v1056_v34  ;;  %2154 = vmatpush.msra.mxu0 %v799_v33  ;;  %v1127_v4 = vld [vmem:[#allocation2 + $0xcb0] sm:$0xff]  ;;  %v816_v34 = vld [vmem:[#allocation2 + $0x2f8] sm:$0xff] }
 0x267   :  { %2210 = vmatpush.msra.mxu3 %v1215_v62  ;;  %2102 = vmatpush.msrb.mxu1 %v862_v17  ;;  %v2361_v20 = vld [vmem:[#allocation7 + $0x168] sm:$0xff]  ;;  %v1232_v33 = vld [vmem:[#allocation2 + $0xff8] sm:$0xff]  ;;  %v3926_v17 = vpop.f32.mrf.mxu3 }
 0x268   :  { %2275 = vmatpush.msrb.mxu2 %v1048_v57  ;;  %2155 = vmatpush.msra.mxu0 %v791_v25  ;;  %v895_v46 = vld [vmem:[#allocation2 + $0x570] sm:$0xff]  ;;  %v3928_v57 = vpop.f32.mrf.mxu1  ;;  %v2358_v25 = vld [vmem:[#allocation7 + $0x150] sm:$0xff] }
 0x269   :  { %2211 = vmatpush.msra.mxu3 %v1207_v13  ;;  %2103 = vmatpush.msrb.mxu1 %v854_v23  ;;  %v1119_v47 = vld [vmem:[#allocation2 + $0xc70] sm:$0xff]  ;;  %v808_v13 = vld [vmem:[#allocation2 + $0x2b8] sm:$0xff] }
 0x26a   :  { %2276 = vmatpush.msrb.mxu2 %v1040_v49  ;;  %2104 = vmatmul.f32.vlgmr.msrb.gmra.mxu1 %v3895_v35  ;;  %v887_v37 = vld [vmem:[#allocation2 + $0x530] sm:$0xff]  ;;  %v1224_v23 = vld [vmem:[#allocation2 + $0xfb8] sm:$0xff] }
 0x26b   :  { %2156 = vmatpush.msra.mxu0 %v783_v28  ;;  %2168 = vmatpush.msra.mxu1 %v975_v16  ;;  %v1111_v42 = vld [vmem:[#allocation2 + $0xc30] sm:$0xff]  ;;  %v800_v16 = vld [vmem:[#allocation2 + $0x278] sm:$0xff] }
 0x26c   :  { %2212 = vmatpush.msra.mxu3 %v1199_v50  ;;  %2277 = vmatpush.msrb.mxu2 %v1032_v48  ;;  %v879_v62 = vld [vmem:[#allocation2 + $0x4f0] sm:$0xff]  ;;  %v1216_v50 = vld [vmem:[#allocation2 + $0xf78] sm:$0xff] }
 0x26d   :  { %2157 = vmatpush.msra.mxu0 %v775_v56  ;;  %2169 = vmatpush.msra.mxu1 %v967_v63  ;;  %v871_v49 = vld [vmem:[#allocation2 + $0x4b0] sm:$0xff]  ;;  %v3931_v56 = vld [vmem:[#allocation5] sm:$0xff]  ;;  %v2356_v63 = vld [vmem:[#allocation7 + $0x140] sm:$0xff] }
 0x26e   :  { %2213 = vmatpush.msra.mxu3 %v1191_v60  ;;  %2278 = vmatpush.msrb.mxu2 %v1024_v53  ;;  %v2357_v28 = vld [vmem:[#allocation7 + $0x148] sm:$0xff]  ;;  %v792_v60 = vld [vmem:[#allocation2 + $0x238] sm:$0xff]  ;;  %v1237_v53 = vperm.slane %v3931_v56, 2 }
 0x26f   :  { %2158 = vmatpush.msra.mxu0 %v767_v51  ;;  %2170 = vmatpush.msra.mxu1 %v959_v27  ;;  %v863_v48 = vld [vmem:[#allocation2 + $0x470] sm:$0xff]  ;;  %v1208_v51 = vld [vmem:[#allocation2 + $0xf38] sm:$0xff] }
 0x270   :  { %2214 = vmatpush.msra.mxu3 %v1183_v7  ;;  %2279 = vmatpush.msrb.mxu2 %v1016_v14  ;;  %v855_v27 = vld [vmem:[#allocation2 + $0x430] sm:$0xff]  ;;  %v1845_v14 = vpop.f32.mrf.mxu0 }
 0x271   :  { %2159 = vmatpush.msra.mxu0 %v759_v6  ;;  %2171 = vmatpush.msra.mxu1 %v951_v39  ;;  %v2355_v6 = vld [vmem:[#allocation7 + $0x138] sm:$0xff]  ;;  %v784_v39 = vld [vmem:[#allocation2 + $0x1f8] sm:$0xff] }
 0x272   :  { %2215 = vmatpush.msra.mxu3 %v1175_v40  ;;  %2280 = vmatpush.msrb.mxu2 %v1008_v10  ;;  %v976_v40 = vld [vmem:[#allocation2 + $0x7f8] sm:$0xff] }
 0x273   :  { %2160 = vmatpush.msra.mxu0 %v751_v8  ;;  %2172 = vmatpush.msra.mxu1 %v943_v9  ;;  %v1200_v10 = vld [vmem:[#allocation2 + $0xef8] sm:$0xff] }
 0x274   :  { %2216 = vmatpush.msra.mxu3 %v1167_v11  ;;  %2281 = vmatpush.msrb.mxu2 %v1000_v61  ;;  %v2354_v9 = vld [vmem:[#allocation7 + $0x130] sm:$0xff]  ;;  %v1846_v11 = vadd.f32 %v1845_v14, %v1237_v53 }
 0x275   :  { %2161 = vmatpush.msra.mxu0 %v743_v32  ;;  %2173 = vmatpush.msra.mxu1 %v935_v54  ;;  %v776_v61 = vld [vmem:[#allocation2 + $0x1b8] sm:$0xff]  ;;  %v3937_v54 = vpop.f32.mrf.mxu3 }
 0x276   :  { %2217 = vmatpush.msra.mxu3 %v1159_v52  ;;  %2282 = vmatpush.msrb.mxu2 %v992_v44  ;;  %v968_v32 = vld [vmem:[#allocation2 + $0x7b8] sm:$0xff]  ;;  %v2353_v44 = vld [vmem:[#allocation7 + $0x128] sm:$0xff] }
 0x277   :  { %2162 = vmatpush.msra.mxu0 %v735_v0  ;;  %2174 = vmatpush.msra.mxu1 %v927_v12  ;;  %v1192_v52 = vld [vmem:[#allocation2 + $0xeb8] sm:$0xff] }
 0x278   :  { %2218 = vmatpush.msra.mxu3 %v1151_v55  ;;  %2283 = vmatpush.msrb.mxu2 %v984_v1  ;;  %v768_v12 = vld [vmem:[#allocation2 + $0x178] sm:$0xff] }
 0x279   :  { %2163 = vmatpush.msra.mxu0 %v727_v15  ;;  %2175 = vmatpush.msra.mxu1 %v919_v18  ;;  %v960_v55 = vld [vmem:[#allocation2 + $0x778] sm:$0xff]  ;;  %v2352_v15 = vld [vmem:[#allocation7 + $0x120] sm:$0xff] }
 0x27a   :  { %2219 = vmatpush.msra.mxu3 %v1143_v26  ;;  %2284 = vmatmul.f32.vlgmr.msrb.gmra.mxu2 %v3795_v30  ;;  %v3922_v30 = vpop.f32.mrf.mxu2  ;;  %v1184_v1 = vld [vmem:[#allocation2 + $0xe78] sm:$0xff] }
 0x27b   :  { %2488 = vmatpush.msra.mxu2 %v2363_v41  ;;  %2164 = vmatmul.f32.vlgmr.msra.gmra.mxu0 %v3839_v21  ;;  %v760_v18 = vld [vmem:[#allocation2 + $0x138] sm:$0xff] }
 0x27c   :  { %2228 = vmatpush.msrb.mxu0 %v848_v59  ;;  %2176 = vmatpush.msra.mxu1 %v911_v38  ;;  %v952_v26 = vld [vmem:[#allocation2 + $0x738] sm:$0xff]  ;;  %v2351_v38 = vld [vmem:[#allocation7 + $0x118] sm:$0xff] }
 0x27d   :  { %2220 = vmatpush.msra.mxu3 %v1135_v36  ;;  %2489 = vmatpush.msra.mxu2 %v2362_v43  ;;  %v1176_v59 = vld [vmem:[#allocation2 + $0xe38] sm:$0xff] }
 0x27e   :  { %2229 = vmatpush.msrb.mxu0 %v840_v24  ;;  %2177 = vmatpush.msra.mxu1 %v903_v31  ;;  %v752_v43 = vld [vmem:[#allocation2 + $0xf8] sm:$0xff] }
 0x27f   :  { %2221 = vmatpush.msra.mxu3 %v1127_v4  ;;  %2490 = vmatpush.msra.mxu2 %v2361_v20  ;;  %v944_v24 = vld [vmem:[#allocation2 + $0x6f8] sm:$0xff] }
 0x280   :  { %2230 = vmatpush.msrb.mxu0 %v832_v19  ;;  %2178 = vmatpush.msra.mxu1 %v895_v46  ;;  %v1168_v31 = vld [vmem:[#allocation2 + $0xdf8] sm:$0xff]  ;;  %v1905_v46 = vpop.f32.mrf.mxu3 }
 0x281   :  { %2222 = vmatpush.msra.mxu3 %v1119_v47  ;;  %2491 = vmatpush.msra.mxu2 %v2360_v3  ;;  %v1865_v8 = vpop.f32.mrf.mxu1  ;;  %v2350_v4 = vld [vmem:[#allocation7 + $0x110] sm:$0xff]  ;;  %v2349_v3 = vld [vmem:[#allocation7 + $0x108] sm:$0xff] }
 0x282   :  { %2231 = vmatpush.msrb.mxu0 %v824_v29  ;;  %2179 = vmatpush.msra.mxu1 %v887_v37  ;;  %v3934_v7 = vpop.f32.mrf.mxu2  ;;  %v1866_v0 = vadd.f32 %v1865_v8, %v1846_v11  ;;  %v744_v20 = vld [vmem:[#allocation2 + $0xb8] sm:$0xff]  ;;  %v2325_v11 = vld [vmem:[#allocation7 + $0x48] sm:$0xff] }
 0x283   :  { %2223 = vmatpush.msra.mxu3 %v1111_v42  ;;  %2492 = vmatpush.msra.mxu2 %v2359_v2  ;;  %v936_v19 = vld [vmem:[#allocation2 + $0x6b8] sm:$0xff] }
 0x284   :  { %2224 = vmatmul.f32.vlgmr.msra.gmra.mxu3 %v3873_v5  ;;  %2232 = vmatpush.msrb.mxu0 %v816_v34  ;;  %v1160_v47 = vld [vmem:[#allocation2 + $0xdb8] sm:$0xff]  ;;  %v2348_v34 = vld [vmem:[#allocation7 + $0x100] sm:$0xff] }
 0x285   :  { %2288 = vmatpush.msrb.mxu3 %v1232_v33  ;;  %2180 = vmatpush.msra.mxu1 %v879_v62  ;;  %v736_v37 = vld [vmem:[#allocation2 + $0x78] sm:$0xff] }
 0x286   :  { %2493 = vmatpush.msra.mxu2 %v2358_v25  ;;  %2233 = vmatpush.msrb.mxu0 %v808_v13  ;;  %v928_v42 = vld [vmem:[#allocation2 + $0x678] sm:$0xff] }
 0x287   :  { %2289 = vmatpush.msrb.mxu3 %v1224_v23  ;;  %2181 = vmatpush.msra.mxu1 %v871_v49  ;;  %v1152_v2 = vld [vmem:[#allocation2 + $0xd78] sm:$0xff]  ;;  %v2331_v49 = vld [vmem:[#allocation7 + $0x78] sm:$0xff] }
 0x288   :  { %2494 = vmatpush.msra.mxu2 %v2357_v28  ;;  %2234 = vmatpush.msrb.mxu0 %v800_v16  ;;  %v728_v33 = vld [vmem:[#allocation2 + $0x38] sm:$0xff] }
 0x289   :  { %2290 = vmatpush.msrb.mxu3 %v1216_v50  ;;  %2182 = vmatpush.msra.mxu1 %v863_v48  ;;  %v920_v62 = vld [vmem:[#allocation2 + $0x638] sm:$0xff] }
 0x28a   :  { %2495 = vmatpush.msra.mxu2 %v2356_v63  ;;  %2235 = vmatpush.msrb.mxu0 %v792_v60  ;;  %v1885_v41 = vpop.f32.mrf.mxu2  ;;  %v1144_v25 = vld [vmem:[#allocation2 + $0xd38] sm:$0xff]  ;;  %v2329_v60 = vld [vmem:[#allocation7 + $0x68] sm:$0xff] }
 0x28b   :  { %2291 = vmatpush.msrb.mxu3 %v1208_v51  ;;  %2183 = vmatpush.msra.mxu1 %v855_v27  ;;  %v1886_v36 = vadd.f32 %v1885_v41, %v1866_v0  ;;  %v912_v23 = vld [vmem:[#allocation2 + $0x5f8] sm:$0xff]  ;;  %v2328_v27 = vld [vmem:[#allocation7 + $0x60] sm:$0xff] }
 0x28c   :  { %2496 = vmatpush.msra.mxu2 %v2355_v6  ;;  %2184 = vmatmul.f32.vlgmr.msra.gmra.mxu1 %v3895_v35  ;;  %v1136_v28 = vld [vmem:[#allocation2 + $0xcf8] sm:$0xff]  ;;  %v2376_v0 = vld [vmem:[#allocation7 + $0x1e0] sm:$0xff] }
 0x28d   :  { %2236 = vmatpush.msrb.mxu0 %v784_v39  ;;  %2248 = vmatpush.msrb.mxu1 %v976_v40  ;;  %v1906_v29 = vadd.f32 %v1905_v46, %v1886_v36  ;;  %v904_v16 = vld [vmem:[#allocation2 + $0x5b8] sm:$0xff]  ;;  %v2379_v39 = vld [vmem:[#allocation7 + $0x1f8] sm:$0xff]  ;;  %v2373_v36 = vld [vmem:[#allocation7 + $0x1c8] sm:$0xff] }
 0x28e   :  { %2292 = vmatpush.msrb.mxu3 %v1200_v10  ;;  %2497 = vmatpush.msra.mxu2 %v2354_v9  ;;  %v2330_v50 = vld [vmem:[#allocation7 + $0x70] sm:$0xff] }
 0x28f   :  { %2237 = vmatpush.msrb.mxu0 %v776_v61  ;;  %2249 = vmatpush.msrb.mxu1 %v968_v32  ;;  %v2310_v13 = vmax.f32 %v1906_v29, 0.0  ;;  %v1128_v48 = vld [vmem:[#allocation2 + $0xcb8] sm:$0xff]  ;;  %v2377_v61 = vld [vmem:[#allocation7 + $0x1e8] sm:$0xff] }
 0x290   :  { %2293 = vmatpush.msrb.mxu3 %v1192_v52  ;;  %2498 = vmatpush.msra.mxu2 %v2353_v44  ;;  %v896_v63 = vld [vmem:[#allocation2 + $0x578] sm:$0xff]  ;;  %v1235_v52 = vperm.slane %v3931_v56, 0  ;;  %v2324_v44 = vld [vmem:[#allocation7 + $0x40] sm:$0xff] }
 0x291   :  { %2238 = vmatpush.msrb.mxu0 %v768_v12  ;;  %2250 = vmatpush.msrb.mxu1 %v960_v55  ;;  %v1120_v53 = vld [vmem:[#allocation2 + $0xc78] sm:$0xff]  ;;  %v2347_v12 = vld [vmem:[#allocation7 + $0xf8] sm:$0xff] }
 0x292   :  { %2294 = vmatpush.msrb.mxu3 %v1184_v1  ;;  %2499 = vmatpush.msra.mxu2 %v2352_v15  ;;  %v888_v51 = vld [vmem:[#allocation2 + $0x538] sm:$0xff]  ;;  %v2375_v55 = vld [vmem:[#allocation7 + $0x1d8] sm:$0xff]  ;;  %v1686_v1 = vadd.f32 %v3916_v22, %v1235_v52  ;;  %v1238_v22 = vperm.slane %v3931_v56, 3 }
 0x293   :  { %2239 = vmatpush.msrb.mxu0 %v760_v18  ;;  %2251 = vmatpush.msrb.mxu1 %v952_v26  ;;  %v1112_v14 = vld [vmem:[#allocation2 + $0xc38] sm:$0xff] }
 0x294   :  { %2295 = vmatpush.msrb.mxu3 %v1176_v59  ;;  %2500 = vmatpush.msra.mxu2 %v2351_v38  ;;  %v880_v6 = vld [vmem:[#allocation2 + $0x4f8] sm:$0xff]  ;;  %v1706_v41 = vadd.f32 %v3918_v58, %v1686_v1  ;;  %v2321_v59 = vld [vmem:[#allocation7 + $0x28] sm:$0xff]  ;;  %v2343_v58 = vld [vmem:[#allocation7 + $0xd8] sm:$0xff] }
 0x295   :  { %2240 = vmatpush.msrb.mxu0 %v752_v43  ;;  %2252 = vmatpush.msrb.mxu1 %v944_v24  ;;  %v872_v40 = vld [vmem:[#allocation2 + $0x4b8] sm:$0xff]  ;;  %v2345_v38 = vld [vmem:[#allocation7 + $0xe8] sm:$0xff]  ;;  %v2320_v43 = vld [vmem:[#allocation7 + $0x20] sm:$0xff] }
 0x296   :  { %2296 = vmatpush.msrb.mxu3 %v1168_v31  ;;  %2501 = vmatpush.msra.mxu2 %v2350_v4  ;;  %v2326_v10 = vld [vmem:[#allocation7 + $0x50] sm:$0xff]  ;;  %v2344_v24 = vld [vmem:[#allocation7 + $0xe0] sm:$0xff]  ;;  %v1726_v31 = vadd.f32 %v3922_v30, %v1706_v41  ;;  %v1925_v4 = vpop.f32.mrf.mxu0  ;;  %v2341_v30 = vld [vmem:[#allocation7 + $0xc8] sm:$0xff] }
 0x297   :  { %2241 = vmatpush.msrb.mxu0 %v744_v20  ;;  %2253 = vmatpush.msrb.mxu1 %v936_v19  ;;  %v2378_v8 = vld [vmem:[#allocation7 + $0x1f0] sm:$0xff]  ;;  %v2319_v20 = vld [vmem:[#allocation7 + $0x18] sm:$0xff]  ;;  %v1926_v29 = vadd.f32 %v1925_v4, %v1238_v22  ;;  %v2332_v1 = vld [vmem:[#allocation7 + $0x80] sm:$0xff] }
 0x298   :  { %2297 = vmatpush.msrb.mxu3 %v1160_v47  ;;  %2502 = vmatpush.msra.mxu2 %v2349_v3  ;;  %v864_v9 = vld [vmem:[#allocation2 + $0x478] sm:$0xff]  ;;  %v2371_v19 = vld [vmem:[#allocation7 + $0x1b8] sm:$0xff] }
 0x299   :  { %2242 = vmatpush.msrb.mxu0 %v736_v37  ;;  %2254 = vmatpush.msrb.mxu1 %v928_v42  ;;  %v856_v32 = vld [vmem:[#allocation2 + $0x438] sm:$0xff]  ;;  %v1746_v42 = vadd.f32 %v3926_v17, %v1726_v31  ;;  %v2339_v17 = vld [vmem:[#allocation7 + $0xb8] sm:$0xff]  ;;  %v2384_v31 = vld [vmem:[#allocation7 + $0x220] sm:$0xff] }
 0x29a   :  { %2298 = vmatpush.msrb.mxu3 %v1152_v2  ;;  %2503 = vmatpush.msra.mxu2 %v2348_v34  ;;  %v2322_v15 = vld [vmem:[#allocation7 + $0x30] sm:$0xff]  ;;  %v2317_v2 = vld [vmem:[#allocation7 + $0x8] sm:$0xff]  ;;  %v2411_v41 = vld [vmem:[#allocation7 + $0x2f8] sm:$0xff] }
 0x29b   :  { %2243 = vmatpush.msrb.mxu0 %v728_v33  ;;  %2255 = vmatpush.msrb.mxu1 %v920_v62  ;;  %v2346_v18 = vld [vmem:[#allocation7 + $0xf0] sm:$0xff]  ;;  %v2369_v33 = vld [vmem:[#allocation7 + $0x1a8] sm:$0xff]  ;;  %v2316_v62 = vld [vmem:[#allocation7] sm:$0xff] }
 0x29c   :  { %2299 = vmatpush.msrb.mxu3 %v1144_v25  ;;  %2504 = vmatmul.f32.vlgmr.msra.gmra.mxu2 %v2310_v13  ;;  %v2374_v26 = vld [vmem:[#allocation7 + $0x1d0] sm:$0xff]  ;;  %v2340_v25 = vld [vmem:[#allocation7 + $0xc0] sm:$0xff]  ;;  %v1236_v13 = vperm.slane %v3931_v56, 1  ;;  %v2427_v22 = vld [vmem:[#allocation7 + $0x378] sm:$0xff] }
 0x29d   :  { %2244 = vmatmul.f32.vlgmr.msrb.gmra.mxu0 %v3839_v21  ;;  %2256 = vmatpush.msrb.mxu1 %v912_v23  ;;  %v2327_v21 = vld [vmem:[#allocation7 + $0x58] sm:$0xff]  ;;  %v2318_v47 = vld [vmem:[#allocation7 + $0x10] sm:$0xff]  ;;  %v2368_v23 = vld [vmem:[#allocation7 + $0x1a0] sm:$0xff] }
 0x29e   :  { %2448 = vmatpush.msra.mxu0 %v2331_v49  ;;  %2300 = vmatpush.msrb.mxu3 %v1136_v28  ;;  %v2342_v3 = vld [vmem:[#allocation7 + $0xd0] sm:$0xff]  ;;  %v2308_v49 = vmax.f32 %v1746_v42, 0.0  ;;  %v1965_v28 = vpop.f32.mrf.mxu2 }
 0x29f   :  { %2257 = vmatpush.msrb.mxu1 %v904_v16  ;;  %v2370_v37 = vld [vmem:[#allocation7 + $0x1b0] sm:$0xff]  ;;  %v2395_v16 = vld [vmem:[#allocation7 + $0x278] sm:$0xff]  ;;  %2568 = vmatpush.msrb.mxu2 %v2427_v22 }
 0x2a0   :  { %2449 = vmatpush.msra.mxu0 %v2330_v50  ;;  %2301 = vmatpush.msrb.mxu3 %v1128_v48  ;;  %v2367_v48 = vld [vmem:[#allocation7 + $0x198] sm:$0xff]  ;;  %v2334_v52 = vld [vmem:[#allocation7 + $0x90] sm:$0xff] }
 0x2a1   :  { %2258 = vmatpush.msrb.mxu1 %v896_v63  ;;  %v2394_v63 = vld [vmem:[#allocation7 + $0x270] sm:$0xff] }
 0x2a2   :  { %2450 = vmatpush.msra.mxu0 %v2329_v60  ;;  %2302 = vmatpush.msrb.mxu3 %v1120_v53  ;;  %v2338_v60 = vld [vmem:[#allocation7 + $0xb0] sm:$0xff]  ;;  %v1766_v53 = vadd.f32 %v3924_v45, %v1236_v13  ;;  %v2391_v45 = vld [vmem:[#allocation7 + $0x258] sm:$0xff] }
 0x2a3   :  { %2259 = vmatpush.msrb.mxu1 %v888_v51  ;;  %v1945_v46 = vpop.f32.mrf.mxu1  ;;  %v2366_v51 = vld [vmem:[#allocation7 + $0x190] sm:$0xff] }
 0x2a4   :  { %2451 = vmatpush.msra.mxu0 %v2328_v27  ;;  %2303 = vmatpush.msrb.mxu3 %v1112_v14  ;;  %v1946_v34 = vadd.f32 %v1945_v46, %v1926_v29  ;;  %v1985_v27 = vpop.f32.mrf.mxu3  ;;  %v2393_v14 = vld [vmem:[#allocation7 + $0x268] sm:$0xff]  ;;  %v2383_v46 = vld [vmem:[#allocation7 + $0x218] sm:$0xff] }
 0x2a5   :  { %2304 = vmatmul.f32.vlgmr.msrb.gmra.mxu3 %v3873_v5  ;;  %2260 = vmatpush.msrb.mxu1 %v880_v6  ;;  %v2323_v5 = vld [vmem:[#allocation7 + $0x38] sm:$0xff]  ;;  %v2337_v6 = vld [vmem:[#allocation7 + $0xa8] sm:$0xff] }
 0x2a6   :  { %2452 = vmatpush.msra.mxu0 %v2327_v21  ;;  %2508 = vmatpush.msra.mxu3 %v2379_v39  ;;  %v1966_v50 = vadd.f32 %v1965_v28, %v1946_v34  ;;  %v1786_v21 = vadd.f32 %v3928_v57, %v1766_v53  ;;  %v2390_v57 = vld [vmem:[#allocation7 + $0x250] sm:$0xff]  ;;  %v2045_v4 = vpop.f32.mrf.mxu2  ;;  %v2380_v34 = vld [vmem:[#allocation7 + $0x200] sm:$0xff]  ;;  %v2421_v28 = vld [vmem:[#allocation7 + $0x348] sm:$0xff] }
 0x2a7   :  { %2261 = vmatpush.msrb.mxu1 %v872_v40  ;;  %v2365_v40 = vld [vmem:[#allocation7 + $0x188] sm:$0xff] }
 0x2a8   :  { %2453 = vmatpush.msra.mxu0 %v2326_v10  ;;  %2509 = vmatpush.msra.mxu3 %v2378_v8  ;;  %v1986_v39 = vadd.f32 %v1985_v27, %v1966_v50  ;;  %v2392_v10 = vld [vmem:[#allocation7 + $0x260] sm:$0xff]  ;;  %v2401_v50 = vld [vmem:[#allocation7 + $0x2a8] sm:$0xff]  ;;  %v2399_v27 = vld [vmem:[#allocation7 + $0x298] sm:$0xff] }
 0x2a9   :  { %2262 = vmatpush.msrb.mxu1 %v864_v9  ;;  %v2336_v8 = vld [vmem:[#allocation7 + $0xa0] sm:$0xff] }
 0x2aa   :  { %2454 = vmatpush.msra.mxu0 %v2325_v11  ;;  %2510 = vmatpush.msra.mxu3 %v2377_v61  ;;  %v2364_v9 = vld [vmem:[#allocation7 + $0x180] sm:$0xff]  ;;  %v1806_v11 = vadd.f32 %v3934_v7, %v1786_v21  ;;  %v2311_v61 = vmax.f32 %v1986_v39, 0.0  ;;  %v2417_v39 = vld [vmem:[#allocation7 + $0x328] sm:$0xff] }
 0x2ab   :  { %2263 = vmatpush.msrb.mxu1 %v856_v32  ;;  %v2335_v32 = vld [vmem:[#allocation7 + $0x98] sm:$0xff] }
 0x2ac   :  { %2455 = vmatpush.msra.mxu0 %v2324_v44  ;;  %2511 = vmatpush.msra.mxu3 %v2376_v0  ;;  %v2389_v44 = vld [vmem:[#allocation7 + $0x248] sm:$0xff]  ;;  %v1826_v0 = vadd.f32 %v3937_v54, %v1806_v11  ;;  %v2410_v54 = vld [vmem:[#allocation7 + $0x2f0] sm:$0xff] }
 0x2ad   :  { %2264 = vmatmul.f32.vlgmr.msrb.gmra.mxu1 %v3895_v35  ;;  %v2372_v35 = vld [vmem:[#allocation7 + $0x1c0] sm:$0xff] }
 0x2ae   :  { %2456 = vmatpush.msra.mxu0 %v2323_v5  ;;  %2468 = vmatpush.msra.mxu1 %v2347_v12  ;;  %v2333_v5 = vld [vmem:[#allocation7 + $0x88] sm:$0xff]  ;;  %v1239_v12 = vperm.slane %v3931_v56, 4 }
 0x2af   :  { %2512 = vmatpush.msra.mxu3 %v2375_v55  ;;  %v2388_v55 = vld [vmem:[#allocation7 + $0x240] sm:$0xff] }
 0x2b0   :  { %2457 = vmatpush.msra.mxu0 %v2322_v15  ;;  %2469 = vmatpush.msra.mxu1 %v2346_v18  ;;  %v2387_v15 = vld [vmem:[#allocation7 + $0x238] sm:$0xff]  ;;  %v2309_v18 = vmax.f32 %v1826_v0, 0.0  ;;  %v2413_v0 = vld [vmem:[#allocation7 + $0x308] sm:$0xff] }
 0x2b1   :  { %2513 = vmatpush.msra.mxu3 %v2374_v26 }
 0x2b2   :  { %2458 = vmatpush.msra.mxu0 %v2321_v59  ;;  %2470 = vmatpush.msra.mxu1 %v2345_v38  ;;  %v2386_v38 = vld [vmem:[#allocation7 + $0x230] sm:$0xff] }
 0x2b3   :  { %2514 = vmatpush.msra.mxu3 %v2373_v36 }
 0x2b4   :  { %2459 = vmatpush.msra.mxu0 %v2320_v43  ;;  %2471 = vmatpush.msra.mxu1 %v2344_v24  ;;  %v2005_v7 = vpop.f32.mrf.mxu0  ;;  %v2385_v43 = vld [vmem:[#allocation7 + $0x228] sm:$0xff] }
 0x2b5   :  { %2515 = vmatpush.msra.mxu3 %v2372_v35  ;;  %v2006_v59 = vadd.f32 %v2005_v7, %v1239_v12  ;;  %v2409_v24 = vld [vmem:[#allocation7 + $0x2e8] sm:$0xff]  ;;  %v2426_v35 = vld [vmem:[#allocation7 + $0x370] sm:$0xff]  ;;  %v2443_v12 = vld [vmem:[#allocation7 + $0x3f8] sm:$0xff] }
 0x2b6   :  { %2460 = vmatpush.msra.mxu0 %v2319_v20  ;;  %2472 = vmatpush.msra.mxu1 %v2343_v58  ;;  %v2408_v20 = vld [vmem:[#allocation7 + $0x2e0] sm:$0xff]  ;;  %v2425_v58 = vld [vmem:[#allocation7 + $0x368] sm:$0xff] }
 0x2b7   :  { %2516 = vmatpush.msra.mxu3 %v2371_v19  ;;  %2569 = vmatpush.msrb.mxu2 %v2426_v35  ;;  %v2441_v7 = vld [vmem:[#allocation7 + $0x3e8] sm:$0xff] }
 0x2b8   :  { %2461 = vmatpush.msra.mxu0 %v2318_v47  ;;  %2473 = vmatpush.msra.mxu1 %v2342_v3  ;;  %v2407_v47 = vld [vmem:[#allocation7 + $0x2d8] sm:$0xff]  ;;  %v2382_v3 = vld [vmem:[#allocation7 + $0x210] sm:$0xff] }
 0x2b9   :  { %2517 = vmatpush.msra.mxu3 %v2370_v37  ;;  %2570 = vmatpush.msrb.mxu2 %v2425_v58  ;;  %v2406_v37 = vld [vmem:[#allocation7 + $0x2d0] sm:$0xff] }
 0x2ba   :  { %2462 = vmatpush.msra.mxu0 %v2317_v2  ;;  %2474 = vmatpush.msra.mxu1 %v2341_v30  ;;  %v2381_v2 = vld [vmem:[#allocation7 + $0x208] sm:$0xff] }
 0x2bb   :  { %2518 = vmatpush.msra.mxu3 %v2369_v33  ;;  %v2405_v30 = vld [vmem:[#allocation7 + $0x2c8] sm:$0xff]  ;;  %v2424_v33 = vld [vmem:[#allocation7 + $0x360] sm:$0xff] }
 0x2bc   :  { %2463 = vmatpush.msra.mxu0 %v2316_v62  ;;  %2475 = vmatpush.msra.mxu1 %v2340_v25  ;;  %v2423_v62 = vld [vmem:[#allocation7 + $0x358] sm:$0xff]  ;;  %v2404_v25 = vld [vmem:[#allocation7 + $0x2c0] sm:$0xff] }
 0x2bd   :  { %2519 = vmatpush.msra.mxu3 %v2368_v23  ;;  %2464 = vmatmul.f32.vlgmr.msra.gmra.mxu0 %v2308_v49  ;;  %v2422_v23 = vld [vmem:[#allocation7 + $0x350] sm:$0xff]  ;;  %v2403_v49 = vld [vmem:[#allocation7 + $0x2b8] sm:$0xff] }
 0x2be   :  { %2528 = vmatpush.msrb.mxu0 %v2395_v16  ;;  %2476 = vmatpush.msra.mxu1 %v2339_v17  ;;  %v2402_v16 = vld [vmem:[#allocation7 + $0x2b0] sm:$0xff]  ;;  %v2420_v17 = vld [vmem:[#allocation7 + $0x340] sm:$0xff] }
 0x2bf   :  { %2520 = vmatpush.msra.mxu3 %v2367_v48  ;;  %2571 = vmatpush.msrb.mxu2 %v2424_v33  ;;  %v2419_v48 = vld [vmem:[#allocation7 + $0x338] sm:$0xff] }
 0x2c0   :  { %2529 = vmatpush.msrb.mxu0 %v2394_v63  ;;  %2477 = vmatpush.msra.mxu1 %v2338_v60  ;;  %v1240_v63 = vperm.slane %v3931_v56, 5  ;;  %v2400_v60 = vld [vmem:[#allocation7 + $0x2a0] sm:$0xff] }
 0x2c1   :  { %2521 = vmatpush.msra.mxu3 %v2366_v51  ;;  %2572 = vmatpush.msrb.mxu2 %v2423_v62  ;;  %v2418_v51 = vld [vmem:[#allocation7 + $0x330] sm:$0xff] }
 0x2c2   :  { %2530 = vmatpush.msrb.mxu0 %v2393_v14  ;;  %2478 = vmatpush.msra.mxu1 %v2337_v6  ;;  %v2398_v6 = vld [vmem:[#allocation7 + $0x290] sm:$0xff] }
 0x2c3   :  { %2522 = vmatpush.msra.mxu3 %v2365_v40  ;;  %v2065_v29 = vpop.f32.mrf.mxu3  ;;  %2573 = vmatpush.msrb.mxu2 %v2422_v23 }
 0x2c4   :  { %2531 = vmatpush.msrb.mxu0 %v2392_v10  ;;  %2479 = vmatpush.msra.mxu1 %v2336_v8  ;;  %v2397_v10 = vld [vmem:[#allocation7 + $0x288] sm:$0xff]  ;;  %v2125_v8 = vpop.f32.mrf.mxu2 }
 0x2c5   :  { %2523 = vmatpush.msra.mxu3 %v2364_v9  ;;  %v2025_v26 = vpop.f32.mrf.mxu1  ;;  %2574 = vmatpush.msrb.mxu2 %v2421_v28  ;;  %v2657_v28 = vld [vmem:[#allocation8] ss:$0 sm:$0xff] }
 0x2c6   :  { %2524 = vmatmul.f32.vlgmr.msra.gmra.mxu3 %v2311_v61  ;;  %2532 = vmatpush.msrb.mxu0 %v2391_v45  ;;  %v2026_v36 = vadd.f32 %v2025_v26, %v2006_v59  ;;  %v2396_v45 = vld [vmem:[#allocation7 + $0x280] sm:$0xff]  ;;  %v2437_v26 = vld [vmem:[#allocation7 + $0x3c8] sm:$0xff]  ;;  %v2435_v59 = vld [vmem:[#allocation7 + $0x3b8] sm:$0xff] }
 0x2c7   :  { %2480 = vmatpush.msra.mxu1 %v2335_v32  ;;  %2575 = vmatpush.msrb.mxu2 %v2420_v17  ;;  %v2416_v32 = vld [vmem:[#allocation7 + $0x320] sm:$0xff] }
 0x2c8   :  { %2533 = vmatpush.msrb.mxu0 %v2390_v57  ;;  %v2046_v19 = vadd.f32 %v2045_v4, %v2026_v36  ;;  %2588 = vmatpush.msrb.mxu3 %v2443_v12  ;;  %v2434_v36 = vld [vmem:[#allocation7 + $0x3b0] sm:$0xff]  ;;  %v2432_v4 = vld [vmem:[#allocation7 + $0x3a0] sm:$0xff] }
 0x2c9   :  { %2481 = vmatpush.msra.mxu1 %v2334_v52  ;;  %2576 = vmatpush.msrb.mxu2 %v2419_v48  ;;  %v2415_v52 = vld [vmem:[#allocation7 + $0x318] sm:$0xff] }
 0x2ca   :  { %2534 = vmatpush.msrb.mxu0 %v2389_v44  ;;  %v2066_v42 = vadd.f32 %v2065_v29, %v2046_v19  ;;  %v2414_v44 = vld [vmem:[#allocation7 + $0x310] sm:$0xff]  ;;  %v2431_v19 = vld [vmem:[#allocation7 + $0x398] sm:$0xff]  ;;  %v2429_v29 = vld [vmem:[#allocation7 + $0x388] sm:$0xff] }
 0x2cb   :  { %2482 = vmatpush.msra.mxu1 %v2333_v5  ;;  %2577 = vmatpush.msrb.mxu2 %v2418_v51  ;;  %v2412_v5 = vld [vmem:[#allocation7 + $0x300] sm:$0xff] }
 0x2cc   :  { %2535 = vmatpush.msrb.mxu0 %v2388_v55  ;;  %v2312_v13 = vmax.f32 %v2066_v42, 0.0  ;;  %v2442_v55 = vld [vmem:[#allocation7 + $0x3f0] sm:$0xff]  ;;  %v1242_v42 = vperm.slane %v3931_v56, 7 }
 0x2cd   :  { %2483 = vmatpush.msra.mxu1 %v2332_v1  ;;  %2578 = vmatpush.msrb.mxu2 %v2417_v39  ;;  %v2440_v1 = vld [vmem:[#allocation7 + $0x3e0] sm:$0xff] }
 0x2ce   :  { %2484 = vmatmul.f32.vlgmr.msra.gmra.mxu1 %v2309_v18  ;;  %2536 = vmatpush.msrb.mxu0 %v2387_v15  ;;  %v2439_v15 = vld [vmem:[#allocation7 + $0x3d8] sm:$0xff]  ;;  %v2438_v18 = vld [vmem:[#allocation7 + $0x3d0] sm:$0xff] }
 0x2cf   :  { %2548 = vmatpush.msrb.mxu1 %v2411_v41  ;;  %2579 = vmatpush.msrb.mxu2 %v2416_v32  ;;  %v2436_v41 = vld [vmem:[#allocation7 + $0x3c0] sm:$0xff] }
 0x2d0   :  { %2537 = vmatpush.msrb.mxu0 %v2386_v38  ;;  %2589 = vmatpush.msrb.mxu3 %v2442_v55  ;;  %v1241_v38 = vperm.slane %v3931_v56, 6 }
 0x2d1   :  { %2549 = vmatpush.msrb.mxu1 %v2410_v54  ;;  %2580 = vmatpush.msrb.mxu2 %v2415_v52 }
 0x2d2   :  { %2538 = vmatpush.msrb.mxu0 %v2385_v43  ;;  %2590 = vmatpush.msrb.mxu3 %v2441_v7 }
 0x2d3   :  { %2550 = vmatpush.msrb.mxu1 %v2409_v24  ;;  %2581 = vmatpush.msrb.mxu2 %v2414_v44  ;;  %v2433_v24 = vld [vmem:[#allocation7 + $0x3a8] sm:$0xff] }
 0x2d4   :  { %2539 = vmatpush.msrb.mxu0 %v2384_v31  ;;  %2591 = vmatpush.msrb.mxu3 %v2440_v1 }
 0x2d5   :  { %2551 = vmatpush.msrb.mxu1 %v2408_v20  ;;  %2582 = vmatpush.msrb.mxu2 %v2413_v0 }
 0x2d6   :  { %2540 = vmatpush.msrb.mxu0 %v2383_v46  ;;  %v2085_v53 = vpop.f32.mrf.mxu0  ;;  %2592 = vmatpush.msrb.mxu3 %v2439_v15 }
 0x2d7   :  { %2552 = vmatpush.msrb.mxu1 %v2407_v47  ;;  %v2086_v14 = vadd.f32 %v2085_v53, %v1240_v63  ;;  %2583 = vmatpush.msrb.mxu2 %v2412_v5  ;;  %v2430_v47 = vld [vmem:[#allocation7 + $0x390] sm:$0xff] }
 0x2d8   :  { %2541 = vmatpush.msrb.mxu0 %v2382_v3  ;;  %2593 = vmatpush.msrb.mxu3 %v2438_v18 }
 0x2d9   :  { %2553 = vmatpush.msrb.mxu1 %v2406_v37  ;;  %v2428_v37 = vld [vmem:[#allocation7 + $0x380] sm:$0xff] }
 0x2da   :  { %2542 = vmatpush.msrb.mxu0 %v2381_v2  ;;  %2594 = vmatpush.msrb.mxu3 %v2437_v26 }
 0x2db   :  { %2554 = vmatpush.msrb.mxu1 %v2405_v30  ;;  %v2205_v31 = vpop.f32.mrf.mxu2 }
 0x2dc   :  { %2543 = vmatpush.msrb.mxu0 %v2380_v34  ;;  %2595 = vmatpush.msrb.mxu3 %v2436_v41 }
 0x2dd   :  { %2544 = vmatmul.f32.vlgmr.msrb.gmra.mxu0 %v2312_v13  ;;  %2555 = vmatpush.msrb.mxu1 %v2404_v25 }
 0x2de   :  { %2596 = vmatpush.msrb.mxu3 %v2435_v59 }
 0x2df   :  { %2556 = vmatpush.msrb.mxu1 %v2403_v49 }
 0x2e0   :  { %2597 = vmatpush.msrb.mxu3 %v2434_v36 }
 0x2e1   :  { %2557 = vmatpush.msrb.mxu1 %v2402_v16 }
 0x2e2   :  { %2598 = vmatpush.msrb.mxu3 %v2433_v24 }
 0x2e3   :  { %2558 = vmatpush.msrb.mxu1 %v2401_v50 }
 0x2e4   :  { %2599 = vmatpush.msrb.mxu3 %v2432_v4 }
 0x2e5   :  { %2559 = vmatpush.msrb.mxu1 %v2400_v60  ;;  %v2145_v11 = vpop.f32.mrf.mxu3 }
 0x2e6   :  { %2600 = vmatpush.msrb.mxu3 %v2431_v19 }
 0x2e7   :  { %v2105_v21 = vpop.f32.mrf.mxu1  ;;  %2560 = vmatpush.msrb.mxu1 %v2399_v27 }
 0x2e8   :  { %v2106_v40 = vadd.f32 %v2105_v21, %v2086_v14  ;;  %2601 = vmatpush.msrb.mxu3 %v2430_v47 }
 0x2e9   :  { %2561 = vmatpush.msrb.mxu1 %v2398_v6 }
 0x2ea   :  { %v2126_v9 = vadd.f32 %v2125_v8, %v2106_v40  ;;  %2602 = vmatpush.msrb.mxu3 %v2429_v29 }
 0x2eb   :  { %2562 = vmatpush.msrb.mxu1 %v2397_v10 }
 0x2ec   :  { %v2146_v61 = vadd.f32 %v2145_v11, %v2126_v9  ;;  %2603 = vmatpush.msrb.mxu3 %v2428_v37 }
 0x2ed   :  { %2563 = vmatpush.msrb.mxu1 %v2396_v45 }
 0x2ee   :  { %v2313_v57 = vmax.f32 %v2146_v61, 0.0 }
 0x2f0   :  { %2564 = vmatmul.f32.vlgmr.msrb.gmra.mxu1 %v2313_v57 }
 0x2f8   :  { %v2165_v54 = vpop.f32.mrf.mxu0 }
 0x2f9   :  { %v2166_v43 = vadd.f32 %v2165_v54, %v1241_v38 }
 0x2fd   :  { %v2285_v62 = vpop.f32.mrf.mxu2 }
 0x307   :  { %v2225_v58 = vpop.f32.mrf.mxu3 }
 0x309   :  { %v2185_v22 = vpop.f32.mrf.mxu1 }
 0x30a   :  { %v2186_v35 = vadd.f32 %v2185_v22, %v2166_v43 }
 0x30c   :  { %v2206_v20 = vadd.f32 %v2205_v31, %v2186_v35 }
 0x30e   :  { %v2226_v46 = vadd.f32 %v2225_v58, %v2206_v20 }
 0x310   :  { %v2314_v3 = vmax.f32 %v2226_v46, 0.0 }
 0x312   :  { %2584 = vmatmul.f32.vlgmr.msrb.gmra.mxu2 %v2314_v3 }
 0x31a   :  { %v2245_v2 = vpop.f32.mrf.mxu0 }
 0x31b   :  { %v2246_v30 = vadd.f32 %v2245_v2, %v1242_v42 }
 0x31f   :  { %v2505_v63 = vpop.f32.mrf.mxu2 }
 0x328   :  { %v2305_v13 = vpop.f32.mrf.mxu3 }
 0x32a   :  { %v2265_v34 = vpop.f32.mrf.mxu1 }
 0x32b   :  { %v2266_v33 = vadd.f32 %v2265_v34, %v2246_v30 }
 0x32d   :  { %v2286_v25 = vadd.f32 %v2285_v62, %v2266_v33 }
 0x32f   :  { %v2306_v23 = vadd.f32 %v2305_v13, %v2286_v25 }
 0x331   :  { %v2315_v49 = vmax.f32 %v2306_v23, 0.0 }
 0x333   :  { %2604 = vmatmul.f32.vlgmr.msrb.gmra.mxu3 %v2315_v49 }
 0x33a   :  { %v2465_v16 = vpop.f32.mrf.mxu0 }
 0x33b   :  { %v2466_v50 = vadd.f32 %v2657_v28, %v2465_v16 }
 0x349   :  { %v2525_v53 = vpop.f32.mrf.mxu3 }
 0x34b   :  { %v2485_v17 = vpop.f32.mrf.mxu1 }
 0x34c   :  { %v2486_v48 = vadd.f32 %v2485_v17, %v2466_v50 }
 0x34e   :  { %v2506_v60 = vadd.f32 %v2505_v63, %v2486_v48 }
 0x350   :  { %v2526_v56 = vadd.f32 %v2525_v53, %v2506_v60 }
 0x35a   :  { %v2545_v51 = vpop.f32.mrf.mxu0 }
 0x35b   :  { %v2546_v14 = vadd.f32 %v2545_v51, %v2526_v56 }
 0x36d   :  { %v2565_v27 = vpop.f32.mrf.mxu1 }
 0x36e   :  { %v2566_v21 = vadd.f32 %v2565_v27, %v2546_v14 }
 0x395   :  { %v2585_v6 = vpop.f32.mrf.mxu2 }
 0x396   :  { %v2586_v39 = vadd.f32 %v2585_v6, %v2566_v21 }
 0x3b6   :  { %v2605_v40 = vpop.f32.mrf.mxu3 }
 0x3b7   :  { %v2606_v10 = vadd.f32 %v2605_v40, %v2586_v39 }
 0x3b9   :  { %v2647_v8 = vmul.f32 -1.442695, %v2606_v10 }
 0x3bb   :  { %2658 = vpow2.f32 %v2647_v8 }
 0x3c1   :  { %v2659_v9 = vpop.eup %2658 }
 0x3c2   :  { %v2611_v45 = vadd.f32 1.0, %v2659_v9 }
 0x3c4   :  { %2660 = vrcp.f32 %v2611_v45  ;;  %v2623_v57 = vand.u32 2147483648, %v2611_v45  ;;  %v2621_v44 = vand.u32 2147483647, %v2611_v45  ;;  %vm2617_vm2 = vweird.f32 %v2611_v45 }
 0x3c6   :  { %v2624_v5 = vor.u32 1.1754944e-38, %v2623_v57  ;;  %vm2622_vm4 = vcmp.eq.f32.partialorder %v2621_v44, 8.507059e+37 }
 0x3ca   :  { %v2661_v11 = vpop.eup %2660 }
 0x3cb   :  { %v2613_v61 = vmul.f32 %v2661_v11, %v2611_v45  ;;  %vm2618_vm1 = vweird.f32 %v2661_v11 }
 0x3cc   :  { %vm2619_vm3 = vmor %vm2617_vm2, %vm2618_vm1 }
 0x3cd   :  { %v2614_v32 = vsub.f32 1.0, %v2613_v61 }
 0x3cf   :  { %v2615_v52 = vmul.f32 %v2661_v11, %v2614_v32 }
 0x3d1   :  { %v2616_v0 = vadd.f32 %v2661_v11, %v2615_v52 }
 0x3d3   :  { %v2620_v12 = vsel %vm2619_vm3, %v2661_v11, %v2616_v0 }
 0x3d4   :  { %v2625_v55 = vsel %vm2622_vm4, %v2624_v5, %v2620_v12 }
 0x3d5   :  { %2627 = vst [vmem:[#allocation10] sm:$0x3] %v2625_v55 }
 0x3d6   :  { %2638 = dma.vmem_to_hbm [thread:$0]  %s2634_s1, 32, %s2636_s13, [#allocation4]  }
 0x3d7   :  { %2788 = dma.done.wait [#allocation4], 32  }
 0x3d8   :  { %2789 = vsyncadd [#allocation4], 4294967264 }
 0x3d9   :  { %2643 = vsyncpa [#allocation3], 1 }
 0x3da   :  { %2644 = vsyncpa [#allocation6], 1 }
 0x3db   :  { %2645 = vsyncpa [#allocation9], 1 }
 0x3dc   :  { %2646 = vsyncpa [#allocation4], 1 }

</bundles_post_ra>
